<compile_context>
chip_gen: v5e
topology: v5e:2x2
jax: 0.10.0
libtpu: 0.0.40
codegen_flags: <defaults>
</compile_context>

<pallas_src>
import jax
import jax.numpy as jnp
import numpy as np
from jax import lax
from jax.experimental import pallas as pl
from jax.experimental.pallas import tpu as pltpu

EMB = 29          # embedded_dim
HID = 29          # lstm hidden_size
HP = 32           # padded hidden (4*HP = 128 -> one lane-aligned gate row)
SEQ = 12          # sequence length (conv/pool stack then yields 18*1*5 = 90)
BATCH = 2

KH = KW = 3
C1_OUT, C2_OUT = 6, 18
H1, W1 = SEQ, HID                 # conv1 input "image" (12, 29)
HO1, WO1 = H1 - 2, W1 - 2         # (10, 27)
HP1, WP1 = HO1 // 2, WO1 // 2     # (5, 13)
HO2, WO2 = HP1 - 2, WP1 - 2       # (3, 11)
HP2, WP2 = HO2 // 2, WO2 // 2     # (1, 5)
FLAT = C2_OUT * WP2               # 90


# ----------------------------- in-kernel helpers (traced) -------------------
def _band_conv_relu(x, a_ref, b_row, ho, bsz):
    """x: (rows_in, Win*Ci) with row index i*bsz+b.  a_ref: (KH, Win*Ci, Wo*Co)
    banded weight matrices.  Returns relu(conv + bias): (ho*bsz, Wo*Co) with
    rows i*bsz+b and columns j*Co+co.  All work is 2-D MXU matmuls."""
    acc = b_row
    for ki in range(KH):
        acc = acc + jnp.dot(x[ki * bsz:(ki + ho) * bsz, :], a_ref[ki],
                            preferred_element_type=jnp.float32)
    return jnp.maximum(acc, 0.0)


def _pool_rows(x, bsz):
    """2x max-pool (floor) over the row-block index i (rows = i*bsz + b)."""
    n = x.shape[0] // (2 * bsz)
    parts = [jnp.maximum(x[(2 * p) * bsz:(2 * p + 1) * bsz, :],
                         x[(2 * p + 1) * bsz:(2 * p + 2) * bsz, :])
             for p in range(n)]
    return parts[0] if n == 1 else jnp.concatenate(parts, axis=0)


def _pool_cols(x, c):
    """2x max-pool (floor) over the column-block index j (cols = j*c + ch)."""
    n = (x.shape[1] // c) // 2
    parts = [jnp.maximum(x[:, (2 * q) * c:(2 * q + 1) * c],
                         x[:, (2 * q + 1) * c:(2 * q + 2) * c])
             for q in range(n)]
    return parts[0] if n == 1 else jnp.concatenate(parts, axis=-1)


# ------------------------------------ the Pallas kernel ---------------------
def net_kernel(word_ref, wih_ref, whh_ref, bl_ref,
               a1_ref, b1_ref, a2_ref, b2_ref,
               wh1_ref, bh1_ref, wh2_ref, bh2_ref, wh3_ref, bh3_ref,
               out_ref, h_scratch):
    B = out_ref.shape[0]
    T = word_ref.shape[0] // B

    # ---- LSTM: hoisted input projection (one matmul for all timesteps) ------
    gx = jnp.dot(word_ref[...], wih_ref[...],
                 preferred_element_type=jnp.float32) + bl_ref[...]   # (T*B, 128)
    whh = whh_ref[...]                                               # (32, 128)

    h = jnp.zeros((B, HP), jnp.float32)
    c = jnp.zeros((B, HP), jnp.float32)
    for t in range(T):                    # serial recurrence, fully unrolled
        gates = gx[t * B:(t + 1) * B, :] + jnp.dot(
            h, whh, preferred_element_type=jnp.float32)              # (B, 128)
        i_g = jax.nn.sigmoid(gates[:, 0 * HP:1 * HP])                # 32-aligned
        f_g = jax.nn.sigmoid(gates[:, 1 * HP:2 * HP])
        g_g = jnp.tanh(gates[:, 2 * HP:3 * HP])
        o_g = jax.nn.sigmoid(gates[:, 3 * HP:4 * HP])
        c = f_g * c + i_g * g_g
        h = o_g * jnp.tanh(c)
        h_scratch[t * B:(t + 1) * B, :] = h                          # row = t*B+b

    x = h_scratch[...][:, :HID]           # (T*B, 29): drop the 3 pad lanes

    # ---- conv1 + pool1 (rows = i*B+b, cols = j*C + c) ------------------------
    y1 = _band_conv_relu(x, a1_ref, b1_ref[...], HO1, B)       # (HO1*B, WO1*6)
    p1 = _pool_cols(_pool_rows(y1, B), C1_OUT)                 # (HP1*B, WP1*6)

    # ---- conv2 + pool2 -------------------------------------------------------
    y2 = _band_conv_relu(p1, a2_ref, b2_ref[...], HO2, B)      # (HO2*B, WO2*18)
    p2 = _pool_cols(_pool_rows(y2, B), C2_OUT)                 # (B, 5*18) = (B,90)

    # p2 columns are already w*18 + c (hidden1's weight was permuted to match).
    # ---- MLP head ------------------------------------------------------------
    h1 = jnp.maximum(
        jnp.dot(p2, wh1_ref[...].astype(jnp.float32),
                preferred_element_type=jnp.float32) + bh1_ref[...], 0.0)
    h2 = jnp.maximum(
        jnp.dot(h1, wh2_ref[...].astype(jnp.float32),
                preferred_element_type=jnp.float32) + bh2_ref[...], 0.0)
    h3 = jnp.dot(h2, wh3_ref[...], preferred_element_type=jnp.float32) + bh3_ref[...]
    out_ref[...] = jax.nn.sigmoid(h3)                          # (B, 1)


# ------------------------------------ wrapper (plain-JAX weight prep) -------
def _banded_conv_matrices(w_oihw, win, ci, co, wo):
    """Build (KH, win*ci, wo*co) banded matrices M[ki, q*ci+cin, j*co+cout] =
    w[cout, cin, ki, q-j] for 0 <= q-j < KW (else 0), so that a conv row slab
    (rows, win*ci) @ M[ki] gives the ki-th row-tap contribution as (rows, wo*co)."""
    w_t = jnp.transpose(w_oihw, (2, 3, 1, 0)).astype(jnp.float32)  # (KH,KW,Ci,Co)
    row = np.arange(win * ci)
    q_idx = (row // ci)[:, None]
    ci_idx = (row % ci)[:, None]
    col = np.arange(wo * co)[None, :]
    j_idx = col // co
    co_idx = col % co
    kj = q_idx - j_idx
    valid = (kj >= 0) & (kj < KW)
    kj_c = np.clip(kj, 0, KW - 1)
    gathered = w_t[:, kj_c, ci_idx, co_idx]                        # (KH, R, C)
    return jnp.where(jnp.asarray(valid)[None], gathered, 0.0)


def net_forward(word, params):
    (W_ih, W_hh, b_ih, b_hh, c1w, c1b, c2w, c2b,
     h1w, h1b, h2w, h2b, h3w, h3b) = params
    B, T, E = word.shape
    H = W_hh.shape[1]            # 29
    G4 = 4 * HP                  # 128

    # LSTM weights: pad each gate block from 29 to 32 lanes (offsets 0/32/64/96)
    def pad_gates(w):            # w: (rows, 4*H)
        out = jnp.zeros((w.shape[0], G4), jnp.float32)
        for g in range(4):
            out = out.at[:, g * HP:g * HP + H].set(w[:, g * H:(g + 1) * H])
        return out

    wih_p = pad_gates(W_ih.T)                                           # (E, 128)
    whh_p = jnp.zeros((HP, G4), jnp.float32).at[:H].set(pad_gates(W_hh.T))  # (32,128)
    bl_p = pad_gates((b_ih + b_hh)[None, :])                            # (1, 128)

    # time-major, row = t*B + b, so per-step in-kernel slices are contiguous
    word_tb = jnp.transpose(word, (1, 0, 2)).reshape(T * B, E)

    # conv weights as banded-matmul operands
    a1 = _banded_conv_matrices(c1w, W1, 1, C1_OUT, WO1)                 # (3, 29, 162)
    b1 = jnp.tile(c1b, WO1)[None, :].astype(jnp.float32)                # (1, 162)
    a2 = _banded_conv_matrices(c2w, WP1, C1_OUT, C2_OUT, WO2)           # (3, 78, 198)
    b2 = jnp.tile(c2b, WO2)[None, :].astype(jnp.float32)                # (1, 198)

    # MLP head.  Kernel flat column = w*18 + c; PyTorch flatten = c*5 + w.
    perm = np.array([c * WP2 + w for w in range(WP2) for c in range(C2_OUT)])
    wh1 = h1w.T[perm, :].astype(jnp.bfloat16)                           # (90, 1000)
    bh1 = h1b[None, :].astype(jnp.float32)
    wh2 = h2w.T.astype(jnp.bfloat16)                                    # (1000, 100)
    bh2 = h2b[None, :].astype(jnp.float32)
    wh3 = h3w.T.astype(jnp.float32)                                     # (100, 1)
    bh3 = h3b[None, :].astype(jnp.float32)

    ins = (word_tb, wih_p, whh_p, bl_p, a1, b1, a2, b2,
           wh1, bh1, wh2, bh2, wh3, bh3)
    vmem = pl.BlockSpec(memory_space=pltpu.MemorySpace.VMEM)   # whole array resident
    cost = pl.CostEstimate(flops=2_300_000, transcendentals=3_900,
                           bytes_accessed=670_000)
    # TODO(synk): if batch ever grows, add a leading grid axis over batch with
    # dimension_semantics=("parallel",) so v7x can shard it across both TCs.
    return pl.pallas_call(
        net_kernel,
        out_shape=jax.ShapeDtypeStruct((B, 1), jnp.float32),
        in_specs=[vmem] * len(ins),
        out_specs=vmem,
        scratch_shapes=[pltpu.VMEM((T * B, HP), jnp.float32)],
        cost_estimate=cost,
    )(*ins)


# ------------------------------------ params & pure-JAX reference -----------
def init_params(key):
    ks = jax.random.split(key, 14)

    def u(k, shape, fan_in):
        b = 1.0 / np.sqrt(fan_in)
        return jax.random.uniform(k, shape, jnp.float32, -b, b)

    return (u(ks[0], (4 * HID, EMB), HID), u(ks[1], (4 * HID, HID), HID),
            u(ks[2], (4 * HID,), HID), u(ks[3], (4 * HID,), HID),
            u(ks[4], (6, 1, 3, 3), 9), u(ks[5], (6,), 9),
            u(ks[6], (18, 6, 3, 3), 54), u(ks[7], (18,), 54),
            u(ks[8], (1000, 90), 90), u(ks[9], (1000,), 90),
            u(ks[10], (100, 1000), 1000), u(ks[11], (100,), 1000),
            u(ks[12], (1, 100), 100), u(ks[13], (1,), 100))


def reference_forward(word, params):
    """Plain-JAX/XLA mirror of the PyTorch forward (NCHW), for verification."""
    (W_ih, W_hh, b_ih, b_hh, c1w, c1b, c2w, c2b,
     h1w, h1b, h2w, h2b, h3w, h3b) = params
    B, T, _ = word.shape
    H = W_hh.shape[1]
    h = jnp.zeros((B, H), jnp.float32)
    c = jnp.zeros((B, H), jnp.float32)
    outs = []
    for t in range(T):
        g = word[:, t] @ W_ih.T + b_ih + h @ W_hh.T + b_hh
        i_g = jax.nn.sigmoid(g[:, :H]); f_g = jax.nn.sigmoid(g[:, H:2 * H])
        g_g = jnp.tanh(g[:, 2 * H:3 * H]); o_g = jax.nn.sigmoid(g[:, 3 * H:])
        c = f_g * c + i_g * g_g
        h = o_g * jnp.tanh(c)
        outs.append(h)
    x = jnp.stack(outs, axis=1)[:, None]                 # (B,1,T,H) NCHW
    dn = ('NCHW', 'OIHW', 'NCHW')
    x = jax.nn.relu(lax.conv_general_dilated(x, c1w, (1, 1), 'VALID',
                                             dimension_numbers=dn) + c1b[None, :, None, None])
    x = lax.reduce_window(x, -jnp.inf, lax.max, (1, 1, 2, 2), (1, 1, 2, 2), 'VALID')
    x = jax.nn.relu(lax.conv_general_dilated(x, c2w, (1, 1), 'VALID',
                                             dimension_numbers=dn) + c2b[None, :, None, None])
    x = lax.reduce_window(x, -jnp.inf, lax.max, (1, 1, 2, 2), (1, 1, 2, 2), 'VALID')
    x = x.reshape(B, 18 * 5)
    x = jax.nn.relu(x @ h1w.T + h1b)
    x = jax.nn.relu(x @ h2w.T + h2b)
    return jax.nn.sigmoid(x @ h3w.T + h3b)


if __name__ == "__main__":
    key = jax.random.PRNGKey(0)
    pkey, xkey = jax.random.split(key)
    params = init_params(pkey)
    word = jax.random.normal(xkey, (BATCH, SEQ, EMB), jnp.float32)

    out = jax.block_until_ready(net_forward(word, params))
    ref = jax.block_until_ready(reference_forward(word, params))
    assert out.shape == (BATCH, 1)
    np.testing.assert_allclose(np.asarray(out), np.asarray(ref), rtol=5e-3, atol=5e-3)
    print("KERNEL_OK")
</pallas_src>

<mosaic_0001>
module attributes {stable_mosaic.version = 11 : i64} {
  func.func @net_kernel(%arg0: memref<24x29xf32, #tpu.memory_space<vmem>>, %arg1: memref<29x128xf32, #tpu.memory_space<vmem>>, %arg2: memref<32x128xf32, #tpu.memory_space<vmem>>, %arg3: memref<1x128xf32, #tpu.memory_space<vmem>>, %arg4: memref<3x29x162xf32, #tpu.memory_space<vmem>>, %arg5: memref<1x162xf32, #tpu.memory_space<vmem>>, %arg6: memref<3x78x198xf32, #tpu.memory_space<vmem>>, %arg7: memref<1x198xf32, #tpu.memory_space<vmem>>, %arg8: memref<90x1000xbf16, #tpu.memory_space<vmem>>, %arg9: memref<1x1000xf32, #tpu.memory_space<vmem>>, %arg10: memref<1000x100xbf16, #tpu.memory_space<vmem>>, %arg11: memref<1x100xf32, #tpu.memory_space<vmem>>, %arg12: memref<100x1xf32, #tpu.memory_space<vmem>>, %arg13: memref<1x1xf32, #tpu.memory_space<vmem>>, %arg14: memref<2x1xf32, #tpu.memory_space<vmem>>, %arg15: memref<24x32xf32, #tpu.memory_space<vmem>>) attributes {dimension_semantics = [], scalar_prefetch = 0 : i64, scratch_operands = 1 : i64, tpu.core_type = #tpu.core_type<tc>} {
    %c0 = arith.constant 0 : index
    %c0_0 = arith.constant 0 : index
    %0 = vector.load %arg0[%c0, %c0_0] : memref<24x29xf32, #tpu.memory_space<vmem>>, vector<24x29xf32>
    %c0_1 = arith.constant 0 : index
    %c0_2 = arith.constant 0 : index
    %1 = vector.load %arg1[%c0_1, %c0_2] : memref<29x128xf32, #tpu.memory_space<vmem>>, vector<29x128xf32>
    %cst = arith.constant dense<0.000000e+00> : vector<24x128xf32>
    %2 = tpu.matmul %0, %1, %cst {dimension_numbers = #tpu.dot_dimension_numbers<[1], [0], [0], [1], [0, 0, 1, 1], [], []>} : vector<24x29xf32>, vector<29x128xf32>, vector<24x128xf32> -> vector<24x128xf32>
    %c0_3 = arith.constant 0 : index
    %c0_4 = arith.constant 0 : index
    %3 = vector.load %arg3[%c0_3, %c0_4] : memref<1x128xf32, #tpu.memory_space<vmem>>, vector<1x128xf32>
    %4 = vector.broadcast %3 : vector<1x128xf32> to vector<24x128xf32>
    %5 = arith.addf %2, %4 : vector<24x128xf32>
    %c0_5 = arith.constant 0 : index
    %c0_6 = arith.constant 0 : index
    %6 = vector.load %arg2[%c0_5, %c0_6] : memref<32x128xf32, #tpu.memory_space<vmem>>, vector<32x128xf32>
    %cst_7 = arith.constant 0.000000e+00 : f32
    %7 = vector.broadcast %cst_7 : f32 to vector<2x32xf32>
    %cst_8 = arith.constant 0.000000e+00 : f32
    %8 = vector.broadcast %cst_8 : f32 to vector<2x32xf32>
    %9 = vector.extract_strided_slice %5 {offsets = [0, 0], sizes = [2, 128], strides = [1, 1]} : vector<24x128xf32> to vector<2x128xf32>
    %cst_9 = arith.constant dense<0.000000e+00> : vector<2x128xf32>
    %10 = tpu.matmul %7, %6, %cst_9 {dimension_numbers = #tpu.dot_dimension_numbers<[1], [0], [0], [1], [0, 0, 1, 1], [], []>} : vector<2x32xf32>, vector<32x128xf32>, vector<2x128xf32> -> vector<2x128xf32>
    %11 = arith.addf %9, %10 : vector<2x128xf32>
    %12 = vector.extract_strided_slice %11 {offsets = [0, 0], sizes = [2, 32], strides = [1, 1]} : vector<2x128xf32> to vector<2x32xf32>
    %13 = arith.negf %12 : vector<2x32xf32>
    %14 = math.exp %13 : vector<2x32xf32>
    %cst_10 = arith.constant 1.000000e+00 : f32
    %15 = vector.broadcast %cst_10 : f32 to vector<2x32xf32>
    %16 = arith.addf %15, %14 : vector<2x32xf32>
    %17 = arith.divf %15, %16 : vector<2x32xf32>
    %18 = vector.extract_strided_slice %11 {offsets = [0, 32], sizes = [2, 32], strides = [1, 1]} : vector<2x128xf32> to vector<2x32xf32>
    %19 = arith.negf %18 : vector<2x32xf32>
    %20 = math.exp %19 : vector<2x32xf32>
    %cst_11 = arith.constant 1.000000e+00 : f32
    %21 = vector.broadcast %cst_11 : f32 to vector<2x32xf32>
    %22 = arith.addf %21, %20 : vector<2x32xf32>
    %23 = arith.divf %21, %22 : vector<2x32xf32>
    %24 = vector.extract_strided_slice %11 {offsets = [0, 64], sizes = [2, 32], strides = [1, 1]} : vector<2x128xf32> to vector<2x32xf32>
    %25 = math.tanh %24 : vector<2x32xf32>
    %26 = vector.extract_strided_slice %11 {offsets = [0, 96], sizes = [2, 32], strides = [1, 1]} : vector<2x128xf32> to vector<2x32xf32>
    %27 = arith.negf %26 : vector<2x32xf32>
    %28 = math.exp %27 : vector<2x32xf32>
    %cst_12 = arith.constant 1.000000e+00 : f32
    %29 = vector.broadcast %cst_12 : f32 to vector<2x32xf32>
    %30 = arith.addf %29, %28 : vector<2x32xf32>
    %31 = arith.divf %29, %30 : vector<2x32xf32>
    %32 = arith.mulf %23, %8 : vector<2x32xf32>
    %33 = arith.mulf %17, %25 : vector<2x32xf32>
    %34 = arith.addf %32, %33 : vector<2x32xf32>
    %35 = math.tanh %34 : vector<2x32xf32>
    %36 = arith.mulf %31, %35 : vector<2x32xf32>
    %c0_13 = arith.constant 0 : index
    %c0_14 = arith.constant 0 : index
    %37 = vector.load %arg15[%c0_13, %c0_14] : memref<24x32xf32, #tpu.memory_space<vmem>>, vector<2x32xf32>
    tpu.vector_store %arg15[%c0_13, %c0_14], %36 {strides = array<i32>} : memref<24x32xf32, #tpu.memory_space<vmem>>, vector<2x32xf32>,
    %38 = vector.extract_strided_slice %5 {offsets = [2, 0], sizes = [2, 128], strides = [1, 1]} : vector<24x128xf32> to vector<2x128xf32>
    %cst_15 = arith.constant dense<0.000000e+00> : vector<2x128xf32>
    %39 = tpu.matmul %36, %6, %cst_15 {dimension_numbers = #tpu.dot_dimension_numbers<[1], [0], [0], [1], [0, 0, 1, 1], [], []>} : vector<2x32xf32>, vector<32x128xf32>, vector<2x128xf32> -> vector<2x128xf32>
    %40 = arith.addf %38, %39 : vector<2x128xf32>
    %41 = vector.extract_strided_slice %40 {offsets = [0, 0], sizes = [2, 32], strides = [1, 1]} : vector<2x128xf32> to vector<2x32xf32>
    %42 = arith.negf %41 : vector<2x32xf32>
    %43 = math.exp %42 : vector<2x32xf32>
    %cst_16 = arith.constant 1.000000e+00 : f32
    %44 = vector.broadcast %cst_16 : f32 to vector<2x32xf32>
    %45 = arith.addf %44, %43 : vector<2x32xf32>
    %46 = arith.divf %44, %45 : vector<2x32xf32>
    %47 = vector.extract_strided_slice %40 {offsets = [0, 32], sizes = [2, 32], strides = [1, 1]} : vector<2x128xf32> to vector<2x32xf32>
    %48 = arith.negf %47 : vector<2x32xf32>
    %49 = math.exp %48 : vector<2x32xf32>
    %cst_17 = arith.constant 1.000000e+00 : f32
    %50 = vector.broadcast %cst_17 : f32 to vector<2x32xf32>
    %51 = arith.addf %50, %49 : vector<2x32xf32>
    %52 = arith.divf %50, %51 : vector<2x32xf32>
    %53 = vector.extract_strided_slice %40 {offsets = [0, 64], sizes = [2, 32], strides = [1, 1]} : vector<2x128xf32> to vector<2x32xf32>
    %54 = math.tanh %53 : vector<2x32xf32>
    %55 = vector.extract_strided_slice %40 {offsets = [0, 96], sizes = [2, 32], strides = [1, 1]} : vector<2x128xf32> to vector<2x32xf32>
    %56 = arith.negf %55 : vector<2x32xf32>
    %57 = math.exp %56 : vector<2x32xf32>
    %cst_18 = arith.constant 1.000000e+00 : f32
    %58 = vector.broadcast %cst_18 : f32 to vector<2x32xf32>
    %59 = arith.addf %58, %57 : vector<2x32xf32>
    %60 = arith.divf %58, %59 : vector<2x32xf32>
    %61 = arith.mulf %52, %34 : vector<2x32xf32>
    %62 = arith.mulf %46, %54 : vector<2x32xf32>
    %63 = arith.addf %61, %62 : vector<2x32xf32>
    %64 = math.tanh %63 : vector<2x32xf32>
    %65 = arith.mulf %60, %64 : vector<2x32xf32>
    %c2 = arith.constant 2 : index
    %c0_19 = arith.constant 0 : index
    %66 = vector.load %arg15[%c2, %c0_19] : memref<24x32xf32, #tpu.memory_space<vmem>>, vector<2x32xf32>
    tpu.vector_store %arg15[%c2, %c0_19], %65 {strides = array<i32>} : memref<24x32xf32, #tpu.memory_space<vmem>>, vector<2x32xf32>,
    %67 = vector.extract_strided_slice %5 {offsets = [4, 0], sizes = [2, 128], strides = [1, 1]} : vector<24x128xf32> to vector<2x128xf32>
    %cst_20 = arith.constant dense<0.000000e+00> : vector<2x128xf32>
    %68 = tpu.matmul %65, %6, %cst_20 {dimension_numbers = #tpu.dot_dimension_numbers<[1], [0], [0], [1], [0, 0, 1, 1], [], []>} : vector<2x32xf32>, vector<32x128xf32>, vector<2x128xf32> -> vector<2x128xf32>
    %69 = arith.addf %67, %68 : vector<2x128xf32>
    %70 = vector.extract_strided_slice %69 {offsets = [0, 0], sizes = [2, 32], strides = [1, 1]} : vector<2x128xf32> to vector<2x32xf32>
    %71 = arith.negf %70 : vector<2x32xf32>
    %72 = math.exp %71 : vector<2x32xf32>
    %cst_21 = arith.constant 1.000000e+00 : f32
    %73 = vector.broadcast %cst_21 : f32 to vector<2x32xf32>
    %74 = arith.addf %73, %72 : vector<2x32xf32>
    %75 = arith.divf %73, %74 : vector<2x32xf32>
    %76 = vector.extract_strided_slice %69 {offsets = [0, 32], sizes = [2, 32], strides = [1, 1]} : vector<2x128xf32> to vector<2x32xf32>
    %77 = arith.negf %76 : vector<2x32xf32>
    %78 = math.exp %77 : vector<2x32xf32>
    %cst_22 = arith.constant 1.000000e+00 : f32
    %79 = vector.broadcast %cst_22 : f32 to vector<2x32xf32>
    %80 = arith.addf %79, %78 : vector<2x32xf32>
    %81 = arith.divf %79, %80 : vector<2x32xf32>
    %82 = vector.extract_strided_slice %69 {offsets = [0, 64], sizes = [2, 32], strides = [1, 1]} : vector<2x128xf32> to vector<2x32xf32>
    %83 = math.tanh %82 : vector<2x32xf32>
    %84 = vector.extract_strided_slice %69 {offsets = [0, 96], sizes = [2, 32], strides = [1, 1]} : vector<2x128xf32> to vector<2x32xf32>
    %85 = arith.negf %84 : vector<2x32xf32>
    %86 = math.exp %85 : vector<2x32xf32>
    %cst_23 = arith.constant 1.000000e+00 : f32
    %87 = vector.broadcast %cst_23 : f32 to vector<2x32xf32>
    %88 = arith.addf %87, %86 : vector<2x32xf32>
    %89 = arith.divf %87, %88 : vector<2x32xf32>
    %90 = arith.mulf %81, %63 : vector<2x32xf32>
    %91 = arith.mulf %75, %83 : vector<2x32xf32>
    %92 = arith.addf %90, %91 : vector<2x32xf32>
    %93 = math.tanh %92 : vector<2x32xf32>
    %94 = arith.mulf %89, %93 : vector<2x32xf32>
    %c4 = arith.constant 4 : index
    %c0_24 = arith.constant 0 : index
    %95 = vector.load %arg15[%c4, %c0_24] : memref<24x32xf32, #tpu.memory_space<vmem>>, vector<2x32xf32>
    tpu.vector_store %arg15[%c4, %c0_24], %94 {strides = array<i32>} : memref<24x32xf32, #tpu.memory_space<vmem>>, vector<2x32xf32>,
    %96 = vector.extract_strided_slice %5 {offsets = [6, 0], sizes = [2, 128], strides = [1, 1]} : vector<24x128xf32> to vector<2x128xf32>
    %cst_25 = arith.constant dense<0.000000e+00> : vector<2x128xf32>
    %97 = tpu.matmul %94, %6, %cst_25 {dimension_numbers = #tpu.dot_dimension_numbers<[1], [0], [0], [1], [0, 0, 1, 1], [], []>} : vector<2x32xf32>, vector<32x128xf32>, vector<2x128xf32> -> vector<2x128xf32>
    %98 = arith.addf %96, %97 : vector<2x128xf32>
    %99 = vector.extract_strided_slice %98 {offsets = [0, 0], sizes = [2, 32], strides = [1, 1]} : vector<2x128xf32> to vector<2x32xf32>
    %100 = arith.negf %99 : vector<2x32xf32>
    %101 = math.exp %100 : vector<2x32xf32>
    %cst_26 = arith.constant 1.000000e+00 : f32
    %102 = vector.broadcast %cst_26 : f32 to vector<2x32xf32>
    %103 = arith.addf %102, %101 : vector<2x32xf32>
    %104 = arith.divf %102, %103 : vector<2x32xf32>
    %105 = vector.extract_strided_slice %98 {offsets = [0, 32], sizes = [2, 32], strides = [1, 1]} : vector<2x128xf32> to vector<2x32xf32>
    %106 = arith.negf %105 : vector<2x32xf32>
    %107 = math.exp %106 : vector<2x32xf32>
    %cst_27 = arith.constant 1.000000e+00 : f32
    %108 = vector.broadcast %cst_27 : f32 to vector<2x32xf32>
    %109 = arith.addf %108, %107 : vector<2x32xf32>
    %110 = arith.divf %108, %109 : vector<2x32xf32>
    %111 = vector.extract_strided_slice %98 {offsets = [0, 64], sizes = [2, 32], strides = [1, 1]} : vector<2x128xf32> to vector<2x32xf32>
    %112 = math.tanh %111 : vector<2x32xf32>
    %113 = vector.extract_strided_slice %98 {offsets = [0, 96], sizes = [2, 32], strides = [1, 1]} : vector<2x128xf32> to vector<2x32xf32>
    %114 = arith.negf %113 : vector<2x32xf32>
    %115 = math.exp %114 : vector<2x32xf32>
    %cst_28 = arith.constant 1.000000e+00 : f32
    %116 = vector.broadcast %cst_28 : f32 to vector<2x32xf32>
    %117 = arith.addf %116, %115 : vector<2x32xf32>
    %118 = arith.divf %116, %117 : vector<2x32xf32>
    %119 = arith.mulf %110, %92 : vector<2x32xf32>
    %120 = arith.mulf %104, %112 : vector<2x32xf32>
    %121 = arith.addf %119, %120 : vector<2x32xf32>
    %122 = math.tanh %121 : vector<2x32xf32>
    %123 = arith.mulf %118, %122 : vector<2x32xf32>
    %c6 = arith.constant 6 : index
    %c0_29 = arith.constant 0 : index
    %124 = vector.load %arg15[%c6, %c0_29] : memref<24x32xf32, #tpu.memory_space<vmem>>, vector<2x32xf32>
    tpu.vector_store %arg15[%c6, %c0_29], %123 {strides = array<i32>} : memref<24x32xf32, #tpu.memory_space<vmem>>, vector<2x32xf32>,
    %125 = vector.extract_strided_slice %5 {offsets = [8, 0], sizes = [2, 128], strides = [1, 1]} : vector<24x128xf32> to vector<2x128xf32>
    %cst_30 = arith.constant dense<0.000000e+00> : vector<2x128xf32>
    %126 = tpu.matmul %123, %6, %cst_30 {dimension_numbers = #tpu.dot_dimension_numbers<[1], [0], [0], [1], [0, 0, 1, 1], [], []>} : vector<2x32xf32>, vector<32x128xf32>, vector<2x128xf32> -> vector<2x128xf32>
    %127 = arith.addf %125, %126 : vector<2x128xf32>
    %128 = vector.extract_strided_slice %127 {offsets = [0, 0], sizes = [2, 32], strides = [1, 1]} : vector<2x128xf32> to vector<2x32xf32>
    %129 = arith.negf %128 : vector<2x32xf32>
    %130 = math.exp %129 : vector<2x32xf32>
    %cst_31 = arith.constant 1.000000e+00 : f32
    %131 = vector.broadcast %cst_31 : f32 to vector<2x32xf32>
    %132 = arith.addf %131, %130 : vector<2x32xf32>
    %133 = arith.divf %131, %132 : vector<2x32xf32>
    %134 = vector.extract_strided_slice %127 {offsets = [0, 32], sizes = [2, 32], strides = [1, 1]} : vector<2x128xf32> to vector<2x32xf32>
    %135 = arith.negf %134 : vector<2x32xf32>
    %136 = math.exp %135 : vector<2x32xf32>
    %cst_32 = arith.constant 1.000000e+00 : f32
    %137 = vector.broadcast %cst_32 : f32 to vector<2x32xf32>
    %138 = arith.addf %137, %136 : vector<2x32xf32>
    %139 = arith.divf %137, %138 : vector<2x32xf32>
    %140 = vector.extract_strided_slice %127 {offsets = [0, 64], sizes = [2, 32], strides = [1, 1]} : vector<2x128xf32> to vector<2x32xf32>
    %141 = math.tanh %140 : vector<2x32xf32>
    %142 = vector.extract_strided_slice %127 {offsets = [0, 96], sizes = [2, 32], strides = [1, 1]} : vector<2x128xf32> to vector<2x32xf32>
    %143 = arith.negf %142 : vector<2x32xf32>
    %144 = math.exp %143 : vector<2x32xf32>
    %cst_33 = arith.constant 1.000000e+00 : f32
    %145 = vector.broadcast %cst_33 : f32 to vector<2x32xf32>
    %146 = arith.addf %145, %144 : vector<2x32xf32>
    %147 = arith.divf %145, %146 : vector<2x32xf32>
    %148 = arith.mulf %139, %121 : vector<2x32xf32>
    %149 = arith.mulf %133, %141 : vector<2x32xf32>
    %150 = arith.addf %148, %149 : vector<2x32xf32>
    %151 = math.tanh %150 : vector<2x32xf32>
    %152 = arith.mulf %147, %151 : vector<2x32xf32>
    %c8 = arith.constant 8 : index
    %c0_34 = arith.constant 0 : index
    %153 = vector.load %arg15[%c8, %c0_34] : memref<24x32xf32, #tpu.memory_space<vmem>>, vector<2x32xf32>
    tpu.vector_store %arg15[%c8, %c0_34], %152 {strides = array<i32>} : memref<24x32xf32, #tpu.memory_space<vmem>>, vector<2x32xf32>,
    %154 = vector.extract_strided_slice %5 {offsets = [10, 0], sizes = [2, 128], strides = [1, 1]} : vector<24x128xf32> to vector<2x128xf32>
    %cst_35 = arith.constant dense<0.000000e+00> : vector<2x128xf32>
    %155 = tpu.matmul %152, %6, %cst_35 {dimension_numbers = #tpu.dot_dimension_numbers<[1], [0], [0], [1], [0, 0, 1, 1], [], []>} : vector<2x32xf32>, vector<32x128xf32>, vector<2x128xf32> -> vector<2x128xf32>
    %156 = arith.addf %154, %155 : vector<2x128xf32>
    %157 = vector.extract_strided_slice %156 {offsets = [0, 0], sizes = [2, 32], strides = [1, 1]} : vector<2x128xf32> to vector<2x32xf32>
    %158 = arith.negf %157 : vector<2x32xf32>
    %159 = math.exp %158 : vector<2x32xf32>
    %cst_36 = arith.constant 1.000000e+00 : f32
    %160 = vector.broadcast %cst_36 : f32 to vector<2x32xf32>
    %161 = arith.addf %160, %159 : vector<2x32xf32>
    %162 = arith.divf %160, %161 : vector<2x32xf32>
    %163 = vector.extract_strided_slice %156 {offsets = [0, 32], sizes = [2, 32], strides = [1, 1]} : vector<2x128xf32> to vector<2x32xf32>
    %164 = arith.negf %163 : vector<2x32xf32>
    %165 = math.exp %164 : vector<2x32xf32>
    %cst_37 = arith.constant 1.000000e+00 : f32
    %166 = vector.broadcast %cst_37 : f32 to vector<2x32xf32>
    %167 = arith.addf %166, %165 : vector<2x32xf32>
    %168 = arith.divf %166, %167 : vector<2x32xf32>
    %169 = vector.extract_strided_slice %156 {offsets = [0, 64], sizes = [2, 32], strides = [1, 1]} : vector<2x128xf32> to vector<2x32xf32>
    %170 = math.tanh %169 : vector<2x32xf32>
    %171 = vector.extract_strided_slice %156 {offsets = [0, 96], sizes = [2, 32], strides = [1, 1]} : vector<2x128xf32> to vector<2x32xf32>
    %172 = arith.negf %171 : vector<2x32xf32>
    %173 = math.exp %172 : vector<2x32xf32>
    %cst_38 = arith.constant 1.000000e+00 : f32
    %174 = vector.broadcast %cst_38 : f32 to vector<2x32xf32>
    %175 = arith.addf %174, %173 : vector<2x32xf32>
    %176 = arith.divf %174, %175 : vector<2x32xf32>
    %177 = arith.mulf %168, %150 : vector<2x32xf32>
    %178 = arith.mulf %162, %170 : vector<2x32xf32>
    %179 = arith.addf %177, %178 : vector<2x32xf32>
    %180 = math.tanh %179 : vector<2x32xf32>
    %181 = arith.mulf %176, %180 : vector<2x32xf32>
    %c10 = arith.constant 10 : index
    %c0_39 = arith.constant 0 : index
    %182 = vector.load %arg15[%c10, %c0_39] : memref<24x32xf32, #tpu.memory_space<vmem>>, vector<2x32xf32>
    tpu.vector_store %arg15[%c10, %c0_39], %181 {strides = array<i32>} : memref<24x32xf32, #tpu.memory_space<vmem>>, vector<2x32xf32>,
    %183 = vector.extract_strided_slice %5 {offsets = [12, 0], sizes = [2, 128], strides = [1, 1]} : vector<24x128xf32> to vector<2x128xf32>
    %cst_40 = arith.constant dense<0.000000e+00> : vector<2x128xf32>
    %184 = tpu.matmul %181, %6, %cst_40 {dimension_numbers = #tpu.dot_dimension_numbers<[1], [0], [0], [1], [0, 0, 1, 1], [], []>} : vector<2x32xf32>, vector<32x128xf32>, vector<2x128xf32> -> vector<2x128xf32>
    %185 = arith.addf %183, %184 : vector<2x128xf32>
    %186 = vector.extract_strided_slice %185 {offsets = [0, 0], sizes = [2, 32], strides = [1, 1]} : vector<2x128xf32> to vector<2x32xf32>
    %187 = arith.negf %186 : vector<2x32xf32>
    %188 = math.exp %187 : vector<2x32xf32>
    %cst_41 = arith.constant 1.000000e+00 : f32
    %189 = vector.broadcast %cst_41 : f32 to vector<2x32xf32>
    %190 = arith.addf %189, %188 : vector<2x32xf32>
    %191 = arith.divf %189, %190 : vector<2x32xf32>
    %192 = vector.extract_strided_slice %185 {offsets = [0, 32], sizes = [2, 32], strides = [1, 1]} : vector<2x128xf32> to vector<2x32xf32>
    %193 = arith.negf %192 : vector<2x32xf32>
    %194 = math.exp %193 : vector<2x32xf32>
    %cst_42 = arith.constant 1.000000e+00 : f32
    %195 = vector.broadcast %cst_42 : f32 to vector<2x32xf32>
    %196 = arith.addf %195, %194 : vector<2x32xf32>
    %197 = arith.divf %195, %196 : vector<2x32xf32>
    %198 = vector.extract_strided_slice %185 {offsets = [0, 64], sizes = [2, 32], strides = [1, 1]} : vector<2x128xf32> to vector<2x32xf32>
    %199 = math.tanh %198 : vector<2x32xf32>
    %200 = vector.extract_strided_slice %185 {offsets = [0, 96], sizes = [2, 32], strides = [1, 1]} : vector<2x128xf32> to vector<2x32xf32>
    %201 = arith.negf %200 : vector<2x32xf32>
    %202 = math.exp %201 : vector<2x32xf32>
    %cst_43 = arith.constant 1.000000e+00 : f32
    %203 = vector.broadcast %cst_43 : f32 to vector<2x32xf32>
    %204 = arith.addf %203, %202 : vector<2x32xf32>
    %205 = arith.divf %203, %204 : vector<2x32xf32>
    %206 = arith.mulf %197, %179 : vector<2x32xf32>
    %207 = arith.mulf %191, %199 : vector<2x32xf32>
    %208 = arith.addf %206, %207 : vector<2x32xf32>
    %209 = math.tanh %208 : vector<2x32xf32>
    %210 = arith.mulf %205, %209 : vector<2x32xf32>
    %c12 = arith.constant 12 : index
    %c0_44 = arith.constant 0 : index
    %211 = vector.load %arg15[%c12, %c0_44] : memref<24x32xf32, #tpu.memory_space<vmem>>, vector<2x32xf32>
    tpu.vector_store %arg15[%c12, %c0_44], %210 {strides = array<i32>} : memref<24x32xf32, #tpu.memory_space<vmem>>, vector<2x32xf32>,
    %212 = vector.extract_strided_slice %5 {offsets = [14, 0], sizes = [2, 128], strides = [1, 1]} : vector<24x128xf32> to vector<2x128xf32>
    %cst_45 = arith.constant dense<0.000000e+00> : vector<2x128xf32>
    %213 = tpu.matmul %210, %6, %cst_45 {dimension_numbers = #tpu.dot_dimension_numbers<[1], [0], [0], [1], [0, 0, 1, 1], [], []>} : vector<2x32xf32>, vector<32x128xf32>, vector<2x128xf32> -> vector<2x128xf32>
    %214 = arith.addf %212, %213 : vector<2x128xf32>
    %215 = vector.extract_strided_slice %214 {offsets = [0, 0], sizes = [2, 32], strides = [1, 1]} : vector<2x128xf32> to vector<2x32xf32>
    %216 = arith.negf %215 : vector<2x32xf32>
    %217 = math.exp %216 : vector<2x32xf32>
    %cst_46 = arith.constant 1.000000e+00 : f32
    %218 = vector.broadcast %cst_46 : f32 to vector<2x32xf32>
    %219 = arith.addf %218, %217 : vector<2x32xf32>
    %220 = arith.divf %218, %219 : vector<2x32xf32>
    %221 = vector.extract_strided_slice %214 {offsets = [0, 32], sizes = [2, 32], strides = [1, 1]} : vector<2x128xf32> to vector<2x32xf32>
    %222 = arith.negf %221 : vector<2x32xf32>
    %223 = math.exp %222 : vector<2x32xf32>
    %cst_47 = arith.constant 1.000000e+00 : f32
    %224 = vector.broadcast %cst_47 : f32 to vector<2x32xf32>
    %225 = arith.addf %224, %223 : vector<2x32xf32>
    %226 = arith.divf %224, %225 : vector<2x32xf32>
    %227 = vector.extract_strided_slice %214 {offsets = [0, 64], sizes = [2, 32], strides = [1, 1]} : vector<2x128xf32> to vector<2x32xf32>
    %228 = math.tanh %227 : vector<2x32xf32>
    %229 = vector.extract_strided_slice %214 {offsets = [0, 96], sizes = [2, 32], strides = [1, 1]} : vector<2x128xf32> to vector<2x32xf32>
    %230 = arith.negf %229 : vector<2x32xf32>
    %231 = math.exp %230 : vector<2x32xf32>
    %cst_48 = arith.constant 1.000000e+00 : f32
    %232 = vector.broadcast %cst_48 : f32 to vector<2x32xf32>
    %233 = arith.addf %232, %231 : vector<2x32xf32>
    %234 = arith.divf %232, %233 : vector<2x32xf32>
    %235 = arith.mulf %226, %208 : vector<2x32xf32>
    %236 = arith.mulf %220, %228 : vector<2x32xf32>
    %237 = arith.addf %235, %236 : vector<2x32xf32>
    %238 = math.tanh %237 : vector<2x32xf32>
    %239 = arith.mulf %234, %238 : vector<2x32xf32>
    %c14 = arith.constant 14 : index
    %c0_49 = arith.constant 0 : index
    %240 = vector.load %arg15[%c14, %c0_49] : memref<24x32xf32, #tpu.memory_space<vmem>>, vector<2x32xf32>
    tpu.vector_store %arg15[%c14, %c0_49], %239 {strides = array<i32>} : memref<24x32xf32, #tpu.memory_space<vmem>>, vector<2x32xf32>,
    %241 = vector.extract_strided_slice %5 {offsets = [16, 0], sizes = [2, 128], strides = [1, 1]} : vector<24x128xf32> to vector<2x128xf32>
    %cst_50 = arith.constant dense<0.000000e+00> : vector<2x128xf32>
    %242 = tpu.matmul %239, %6, %cst_50 {dimension_numbers = #tpu.dot_dimension_numbers<[1], [0], [0], [1], [0, 0, 1, 1], [], []>} : vector<2x32xf32>, vector<32x128xf32>, vector<2x128xf32> -> vector<2x128xf32>
    %243 = arith.addf %241, %242 : vector<2x128xf32>
    %244 = vector.extract_strided_slice %243 {offsets = [0, 0], sizes = [2, 32], strides = [1, 1]} : vector<2x128xf32> to vector<2x32xf32>
    %245 = arith.negf %244 : vector<2x32xf32>
    %246 = math.exp %245 : vector<2x32xf32>
    %cst_51 = arith.constant 1.000000e+00 : f32
    %247 = vector.broadcast %cst_51 : f32 to vector<2x32xf32>
    %248 = arith.addf %247, %246 : vector<2x32xf32>
    %249 = arith.divf %247, %248 : vector<2x32xf32>
    %250 = vector.extract_strided_slice %243 {offsets = [0, 32], sizes = [2, 32], strides = [1, 1]} : vector<2x128xf32> to vector<2x32xf32>
    %251 = arith.negf %250 : vector<2x32xf32>
    %252 = math.exp %251 : vector<2x32xf32>
    %cst_52 = arith.constant 1.000000e+00 : f32
    %253 = vector.broadcast %cst_52 : f32 to vector<2x32xf32>
    %254 = arith.addf %253, %252 : vector<2x32xf32>
    %255 = arith.divf %253, %254 : vector<2x32xf32>
    %256 = vector.extract_strided_slice %243 {offsets = [0, 64], sizes = [2, 32], strides = [1, 1]} : vector<2x128xf32> to vector<2x32xf32>
    %257 = math.tanh %256 : vector<2x32xf32>
    %258 = vector.extract_strided_slice %243 {offsets = [0, 96], sizes = [2, 32], strides = [1, 1]} : vector<2x128xf32> to vector<2x32xf32>
    %259 = arith.negf %258 : vector<2x32xf32>
    %260 = math.exp %259 : vector<2x32xf32>
    %cst_53 = arith.constant 1.000000e+00 : f32
    %261 = vector.broadcast %cst_53 : f32 to vector<2x32xf32>
    %262 = arith.addf %261, %260 : vector<2x32xf32>
    %263 = arith.divf %261, %262 : vector<2x32xf32>
    %264 = arith.mulf %255, %237 : vector<2x32xf32>
    %265 = arith.mulf %249, %257 : vector<2x32xf32>
    %266 = arith.addf %264, %265 : vector<2x32xf32>
    %267 = math.tanh %266 : vector<2x32xf32>
    %268 = arith.mulf %263, %267 : vector<2x32xf32>
    %c16 = arith.constant 16 : index
    %c0_54 = arith.constant 0 : index
    %269 = vector.load %arg15[%c16, %c0_54] : memref<24x32xf32, #tpu.memory_space<vmem>>, vector<2x32xf32>
    tpu.vector_store %arg15[%c16, %c0_54], %268 {strides = array<i32>} : memref<24x32xf32, #tpu.memory_space<vmem>>, vector<2x32xf32>,
    %270 = vector.extract_strided_slice %5 {offsets = [18, 0], sizes = [2, 128], strides = [1, 1]} : vector<24x128xf32> to vector<2x128xf32>
    %cst_55 = arith.constant dense<0.000000e+00> : vector<2x128xf32>
    %271 = tpu.matmul %268, %6, %cst_55 {dimension_numbers = #tpu.dot_dimension_numbers<[1], [0], [0], [1], [0, 0, 1, 1], [], []>} : vector<2x32xf32>, vector<32x128xf32>, vector<2x128xf32> -> vector<2x128xf32>
    %272 = arith.addf %270, %271 : vector<2x128xf32>
    %273 = vector.extract_strided_slice %272 {offsets = [0, 0], sizes = [2, 32], strides = [1, 1]} : vector<2x128xf32> to vector<2x32xf32>
    %274 = arith.negf %273 : vector<2x32xf32>
    %275 = math.exp %274 : vector<2x32xf32>
    %cst_56 = arith.constant 1.000000e+00 : f32
    %276 = vector.broadcast %cst_56 : f32 to vector<2x32xf32>
    %277 = arith.addf %276, %275 : vector<2x32xf32>
    %278 = arith.divf %276, %277 : vector<2x32xf32>
    %279 = vector.extract_strided_slice %272 {offsets = [0, 32], sizes = [2, 32], strides = [1, 1]} : vector<2x128xf32> to vector<2x32xf32>
    %280 = arith.negf %279 : vector<2x32xf32>
    %281 = math.exp %280 : vector<2x32xf32>
    %cst_57 = arith.constant 1.000000e+00 : f32
    %282 = vector.broadcast %cst_57 : f32 to vector<2x32xf32>
    %283 = arith.addf %282, %281 : vector<2x32xf32>
    %284 = arith.divf %282, %283 : vector<2x32xf32>
    %285 = vector.extract_strided_slice %272 {offsets = [0, 64], sizes = [2, 32], strides = [1, 1]} : vector<2x128xf32> to vector<2x32xf32>
    %286 = math.tanh %285 : vector<2x32xf32>
    %287 = vector.extract_strided_slice %272 {offsets = [0, 96], sizes = [2, 32], strides = [1, 1]} : vector<2x128xf32> to vector<2x32xf32>
    %288 = arith.negf %287 : vector<2x32xf32>
    %289 = math.exp %288 : vector<2x32xf32>
    %cst_58 = arith.constant 1.000000e+00 : f32
    %290 = vector.broadcast %cst_58 : f32 to vector<2x32xf32>
    %291 = arith.addf %290, %289 : vector<2x32xf32>
    %292 = arith.divf %290, %291 : vector<2x32xf32>
    %293 = arith.mulf %284, %266 : vector<2x32xf32>
    %294 = arith.mulf %278, %286 : vector<2x32xf32>
    %295 = arith.addf %293, %294 : vector<2x32xf32>
    %296 = math.tanh %295 : vector<2x32xf32>
    %297 = arith.mulf %292, %296 : vector<2x32xf32>
    %c18 = arith.constant 18 : index
    %c0_59 = arith.constant 0 : index
    %298 = vector.load %arg15[%c18, %c0_59] : memref<24x32xf32, #tpu.memory_space<vmem>>, vector<2x32xf32>
    tpu.vector_store %arg15[%c18, %c0_59], %297 {strides = array<i32>} : memref<24x32xf32, #tpu.memory_space<vmem>>, vector<2x32xf32>,
    %299 = vector.extract_strided_slice %5 {offsets = [20, 0], sizes = [2, 128], strides = [1, 1]} : vector<24x128xf32> to vector<2x128xf32>
    %cst_60 = arith.constant dense<0.000000e+00> : vector<2x128xf32>
    %300 = tpu.matmul %297, %6, %cst_60 {dimension_numbers = #tpu.dot_dimension_numbers<[1], [0], [0], [1], [0, 0, 1, 1], [], []>} : vector<2x32xf32>, vector<32x128xf32>, vector<2x128xf32> -> vector<2x128xf32>
    %301 = arith.addf %299, %300 : vector<2x128xf32>
    %302 = vector.extract_strided_slice %301 {offsets = [0, 0], sizes = [2, 32], strides = [1, 1]} : vector<2x128xf32> to vector<2x32xf32>
    %303 = arith.negf %302 : vector<2x32xf32>
    %304 = math.exp %303 : vector<2x32xf32>
    %cst_61 = arith.constant 1.000000e+00 : f32
    %305 = vector.broadcast %cst_61 : f32 to vector<2x32xf32>
    %306 = arith.addf %305, %304 : vector<2x32xf32>
    %307 = arith.divf %305, %306 : vector<2x32xf32>
    %308 = vector.extract_strided_slice %301 {offsets = [0, 32], sizes = [2, 32], strides = [1, 1]} : vector<2x128xf32> to vector<2x32xf32>
    %309 = arith.negf %308 : vector<2x32xf32>
    %310 = math.exp %309 : vector<2x32xf32>
    %cst_62 = arith.constant 1.000000e+00 : f32
    %311 = vector.broadcast %cst_62 : f32 to vector<2x32xf32>
    %312 = arith.addf %311, %310 : vector<2x32xf32>
    %313 = arith.divf %311, %312 : vector<2x32xf32>
    %314 = vector.extract_strided_slice %301 {offsets = [0, 64], sizes = [2, 32], strides = [1, 1]} : vector<2x128xf32> to vector<2x32xf32>
    %315 = math.tanh %314 : vector<2x32xf32>
    %316 = vector.extract_strided_slice %301 {offsets = [0, 96], sizes = [2, 32], strides = [1, 1]} : vector<2x128xf32> to vector<2x32xf32>
    %317 = arith.negf %316 : vector<2x32xf32>
    %318 = math.exp %317 : vector<2x32xf32>
    %cst_63 = arith.constant 1.000000e+00 : f32
    %319 = vector.broadcast %cst_63 : f32 to vector<2x32xf32>
    %320 = arith.addf %319, %318 : vector<2x32xf32>
    %321 = arith.divf %319, %320 : vector<2x32xf32>
    %322 = arith.mulf %313, %295 : vector<2x32xf32>
    %323 = arith.mulf %307, %315 : vector<2x32xf32>
    %324 = arith.addf %322, %323 : vector<2x32xf32>
    %325 = math.tanh %324 : vector<2x32xf32>
    %326 = arith.mulf %321, %325 : vector<2x32xf32>
    %c20 = arith.constant 20 : index
    %c0_64 = arith.constant 0 : index
    %327 = vector.load %arg15[%c20, %c0_64] : memref<24x32xf32, #tpu.memory_space<vmem>>, vector<2x32xf32>
    tpu.vector_store %arg15[%c20, %c0_64], %326 {strides = array<i32>} : memref<24x32xf32, #tpu.memory_space<vmem>>, vector<2x32xf32>,
    %328 = vector.extract_strided_slice %5 {offsets = [22, 0], sizes = [2, 128], strides = [1, 1]} : vector<24x128xf32> to vector<2x128xf32>
    %cst_65 = arith.constant dense<0.000000e+00> : vector<2x128xf32>
    %329 = tpu.matmul %326, %6, %cst_65 {dimension_numbers = #tpu.dot_dimension_numbers<[1], [0], [0], [1], [0, 0, 1, 1], [], []>} : vector<2x32xf32>, vector<32x128xf32>, vector<2x128xf32> -> vector<2x128xf32>
    %330 = arith.addf %328, %329 : vector<2x128xf32>
    %331 = vector.extract_strided_slice %330 {offsets = [0, 0], sizes = [2, 32], strides = [1, 1]} : vector<2x128xf32> to vector<2x32xf32>
    %332 = arith.negf %331 : vector<2x32xf32>
    %333 = math.exp %332 : vector<2x32xf32>
    %cst_66 = arith.constant 1.000000e+00 : f32
    %334 = vector.broadcast %cst_66 : f32 to vector<2x32xf32>
    %335 = arith.addf %334, %333 : vector<2x32xf32>
    %336 = arith.divf %334, %335 : vector<2x32xf32>
    %337 = vector.extract_strided_slice %330 {offsets = [0, 32], sizes = [2, 32], strides = [1, 1]} : vector<2x128xf32> to vector<2x32xf32>
    %338 = arith.negf %337 : vector<2x32xf32>
    %339 = math.exp %338 : vector<2x32xf32>
    %cst_67 = arith.constant 1.000000e+00 : f32
    %340 = vector.broadcast %cst_67 : f32 to vector<2x32xf32>
    %341 = arith.addf %340, %339 : vector<2x32xf32>
    %342 = arith.divf %340, %341 : vector<2x32xf32>
    %343 = vector.extract_strided_slice %330 {offsets = [0, 64], sizes = [2, 32], strides = [1, 1]} : vector<2x128xf32> to vector<2x32xf32>
    %344 = math.tanh %343 : vector<2x32xf32>
    %345 = vector.extract_strided_slice %330 {offsets = [0, 96], sizes = [2, 32], strides = [1, 1]} : vector<2x128xf32> to vector<2x32xf32>
    %346 = arith.negf %345 : vector<2x32xf32>
    %347 = math.exp %346 : vector<2x32xf32>
    %cst_68 = arith.constant 1.000000e+00 : f32
    %348 = vector.broadcast %cst_68 : f32 to vector<2x32xf32>
    %349 = arith.addf %348, %347 : vector<2x32xf32>
    %350 = arith.divf %348, %349 : vector<2x32xf32>
    %351 = arith.mulf %342, %324 : vector<2x32xf32>
    %352 = arith.mulf %336, %344 : vector<2x32xf32>
    %353 = arith.addf %351, %352 : vector<2x32xf32>
    %354 = math.tanh %353 : vector<2x32xf32>
    %355 = arith.mulf %350, %354 : vector<2x32xf32>
    %c22 = arith.constant 22 : index
    %c0_69 = arith.constant 0 : index
    %356 = vector.load %arg15[%c22, %c0_69] : memref<24x32xf32, #tpu.memory_space<vmem>>, vector<2x32xf32>
    tpu.vector_store %arg15[%c22, %c0_69], %355 {strides = array<i32>} : memref<24x32xf32, #tpu.memory_space<vmem>>, vector<2x32xf32>,
    %c0_70 = arith.constant 0 : index
    %c0_71 = arith.constant 0 : index
    %357 = vector.load %arg15[%c0_70, %c0_71] : memref<24x32xf32, #tpu.memory_space<vmem>>, vector<24x32xf32>
    %358 = vector.extract_strided_slice %357 {offsets = [0, 0], sizes = [24, 29], strides = [1, 1]} : vector<24x32xf32> to vector<24x29xf32>
    %c0_72 = arith.constant 0 : index
    %c0_73 = arith.constant 0 : index
    %359 = vector.load %arg5[%c0_72, %c0_73] : memref<1x162xf32, #tpu.memory_space<vmem>>, vector<1x162xf32>
    %360 = vector.extract_strided_slice %358 {offsets = [0, 0], sizes = [20, 29], strides = [1, 1]} : vector<24x29xf32> to vector<20x29xf32>
    %c0_74 = arith.constant 0 : index
    %c0_75 = arith.constant 0 : index
    %c0_76 = arith.constant 0 : index
    %361 = vector.load %arg4[%c0_74, %c0_75, %c0_76] : memref<3x29x162xf32, #tpu.memory_space<vmem>>, vector<1x29x162xf32>
    %362 = vector.shape_cast %361 : vector<1x29x162xf32> to vector<29x162xf32>
    %cst_77 = arith.constant dense<0.000000e+00> : vector<20x162xf32>
    %363 = tpu.matmul %360, %362, %cst_77 {dimension_numbers = #tpu.dot_dimension_numbers<[1], [0], [0], [1], [0, 0, 1, 1], [], []>} : vector<20x29xf32>, vector<29x162xf32>, vector<20x162xf32> -> vector<20x162xf32>
    %364 = vector.broadcast %359 : vector<1x162xf32> to vector<20x162xf32>
    %365 = arith.addf %364, %363 : vector<20x162xf32>
    %366 = vector.extract_strided_slice %358 {offsets = [2, 0], sizes = [20, 29], strides = [1, 1]} : vector<24x29xf32> to vector<20x29xf32>
    %c1 = arith.constant 1 : index
    %c0_78 = arith.constant 0 : index
    %c0_79 = arith.constant 0 : index
    %367 = vector.load %arg4[%c1, %c0_78, %c0_79] : memref<3x29x162xf32, #tpu.memory_space<vmem>>, vector<1x29x162xf32>
    %368 = vector.shape_cast %367 : vector<1x29x162xf32> to vector<29x162xf32>
    %cst_80 = arith.constant dense<0.000000e+00> : vector<20x162xf32>
    %369 = tpu.matmul %366, %368, %cst_80 {dimension_numbers = #tpu.dot_dimension_numbers<[1], [0], [0], [1], [0, 0, 1, 1], [], []>} : vector<20x29xf32>, vector<29x162xf32>, vector<20x162xf32> -> vector<20x162xf32>
    %370 = arith.addf %365, %369 : vector<20x162xf32>
    %371 = vector.extract_strided_slice %358 {offsets = [4, 0], sizes = [20, 29], strides = [1, 1]} : vector<24x29xf32> to vector<20x29xf32>
    %c2_81 = arith.constant 2 : index
    %c0_82 = arith.constant 0 : index
    %c0_83 = arith.constant 0 : index
    %372 = vector.load %arg4[%c2_81, %c0_82, %c0_83] : memref<3x29x162xf32, #tpu.memory_space<vmem>>, vector<1x29x162xf32>
    %373 = vector.shape_cast %372 : vector<1x29x162xf32> to vector<29x162xf32>
    %cst_84 = arith.constant dense<0.000000e+00> : vector<20x162xf32>
    %374 = tpu.matmul %371, %373, %cst_84 {dimension_numbers = #tpu.dot_dimension_numbers<[1], [0], [0], [1], [0, 0, 1, 1], [], []>} : vector<20x29xf32>, vector<29x162xf32>, vector<20x162xf32> -> vector<20x162xf32>
    %375 = arith.addf %370, %374 : vector<20x162xf32>
    %cst_85 = arith.constant 0.000000e+00 : f32
    %376 = vector.broadcast %cst_85 : f32 to vector<20x162xf32>
    %377 = arith.maximumf %375, %376 : vector<20x162xf32>
    %378 = vector.extract_strided_slice %377 {offsets = [0, 0], sizes = [2, 162], strides = [1, 1]} : vector<20x162xf32> to vector<2x162xf32>
    %379 = vector.extract_strided_slice %377 {offsets = [2, 0], sizes = [2, 162], strides = [1, 1]} : vector<20x162xf32> to vector<2x162xf32>
    %380 = arith.maximumf %378, %379 : vector<2x162xf32>
    %381 = vector.extract_strided_slice %377 {offsets = [4, 0], sizes = [2, 162], strides = [1, 1]} : vector<20x162xf32> to vector<2x162xf32>
    %382 = vector.extract_strided_slice %377 {offsets = [6, 0], sizes = [2, 162], strides = [1, 1]} : vector<20x162xf32> to vector<2x162xf32>
    %383 = arith.maximumf %381, %382 : vector<2x162xf32>
    %384 = vector.extract_strided_slice %377 {offsets = [8, 0], sizes = [2, 162], strides = [1, 1]} : vector<20x162xf32> to vector<2x162xf32>
    %385 = vector.extract_strided_slice %377 {offsets = [10, 0], sizes = [2, 162], strides = [1, 1]} : vector<20x162xf32> to vector<2x162xf32>
    %386 = arith.maximumf %384, %385 : vector<2x162xf32>
    %387 = vector.extract_strided_slice %377 {offsets = [12, 0], sizes = [2, 162], strides = [1, 1]} : vector<20x162xf32> to vector<2x162xf32>
    %388 = vector.extract_strided_slice %377 {offsets = [14, 0], sizes = [2, 162], strides = [1, 1]} : vector<20x162xf32> to vector<2x162xf32>
    %389 = arith.maximumf %387, %388 : vector<2x162xf32>
    %390 = vector.extract_strided_slice %377 {offsets = [16, 0], sizes = [2, 162], strides = [1, 1]} : vector<20x162xf32> to vector<2x162xf32>
    %391 = vector.extract_strided_slice %377 {offsets = [18, 0], sizes = [2, 162], strides = [1, 1]} : vector<20x162xf32> to vector<2x162xf32>
    %392 = arith.maximumf %390, %391 : vector<2x162xf32>
    %393 = tpu.concatenate %380, %383, %386, %389, %392 in 0 : vector<2x162xf32>, vector<2x162xf32>, vector<2x162xf32>, vector<2x162xf32>, vector<2x162xf32> -> vector<10x162xf32>
    %394 = vector.extract_strided_slice %393 {offsets = [0, 0], sizes = [10, 6], strides = [1, 1]} : vector<10x162xf32> to vector<10x6xf32>
    %395 = vector.extract_strided_slice %393 {offsets = [0, 6], sizes = [10, 6], strides = [1, 1]} : vector<10x162xf32> to vector<10x6xf32>
    %396 = arith.maximumf %394, %395 : vector<10x6xf32>
    %397 = vector.extract_strided_slice %393 {offsets = [0, 12], sizes = [10, 6], strides = [1, 1]} : vector<10x162xf32> to vector<10x6xf32>
    %398 = vector.extract_strided_slice %393 {offsets = [0, 18], sizes = [10, 6], strides = [1, 1]} : vector<10x162xf32> to vector<10x6xf32>
    %399 = arith.maximumf %397, %398 : vector<10x6xf32>
    %400 = vector.extract_strided_slice %393 {offsets = [0, 24], sizes = [10, 6], strides = [1, 1]} : vector<10x162xf32> to vector<10x6xf32>
    %401 = vector.extract_strided_slice %393 {offsets = [0, 30], sizes = [10, 6], strides = [1, 1]} : vector<10x162xf32> to vector<10x6xf32>
    %402 = arith.maximumf %400, %401 : vector<10x6xf32>
    %403 = vector.extract_strided_slice %393 {offsets = [0, 36], sizes = [10, 6], strides = [1, 1]} : vector<10x162xf32> to vector<10x6xf32>
    %404 = vector.extract_strided_slice %393 {offsets = [0, 42], sizes = [10, 6], strides = [1, 1]} : vector<10x162xf32> to vector<10x6xf32>
    %405 = arith.maximumf %403, %404 : vector<10x6xf32>
    %406 = vector.extract_strided_slice %393 {offsets = [0, 48], sizes = [10, 6], strides = [1, 1]} : vector<10x162xf32> to vector<10x6xf32>
    %407 = vector.extract_strided_slice %393 {offsets = [0, 54], sizes = [10, 6], strides = [1, 1]} : vector<10x162xf32> to vector<10x6xf32>
    %408 = arith.maximumf %406, %407 : vector<10x6xf32>
    %409 = vector.extract_strided_slice %393 {offsets = [0, 60], sizes = [10, 6], strides = [1, 1]} : vector<10x162xf32> to vector<10x6xf32>
    %410 = vector.extract_strided_slice %393 {offsets = [0, 66], sizes = [10, 6], strides = [1, 1]} : vector<10x162xf32> to vector<10x6xf32>
    %411 = arith.maximumf %409, %410 : vector<10x6xf32>
    %412 = vector.extract_strided_slice %393 {offsets = [0, 72], sizes = [10, 6], strides = [1, 1]} : vector<10x162xf32> to vector<10x6xf32>
    %413 = vector.extract_strided_slice %393 {offsets = [0, 78], sizes = [10, 6], strides = [1, 1]} : vector<10x162xf32> to vector<10x6xf32>
    %414 = arith.maximumf %412, %413 : vector<10x6xf32>
    %415 = vector.extract_strided_slice %393 {offsets = [0, 84], sizes = [10, 6], strides = [1, 1]} : vector<10x162xf32> to vector<10x6xf32>
    %416 = vector.extract_strided_slice %393 {offsets = [0, 90], sizes = [10, 6], strides = [1, 1]} : vector<10x162xf32> to vector<10x6xf32>
    %417 = arith.maximumf %415, %416 : vector<10x6xf32>
    %418 = vector.extract_strided_slice %393 {offsets = [0, 96], sizes = [10, 6], strides = [1, 1]} : vector<10x162xf32> to vector<10x6xf32>
    %419 = vector.extract_strided_slice %393 {offsets = [0, 102], sizes = [10, 6], strides = [1, 1]} : vector<10x162xf32> to vector<10x6xf32>
    %420 = arith.maximumf %418, %419 : vector<10x6xf32>
    %421 = vector.extract_strided_slice %393 {offsets = [0, 108], sizes = [10, 6], strides = [1, 1]} : vector<10x162xf32> to vector<10x6xf32>
    %422 = vector.extract_strided_slice %393 {offsets = [0, 114], sizes = [10, 6], strides = [1, 1]} : vector<10x162xf32> to vector<10x6xf32>
    %423 = arith.maximumf %421, %422 : vector<10x6xf32>
    %424 = vector.extract_strided_slice %393 {offsets = [0, 120], sizes = [10, 6], strides = [1, 1]} : vector<10x162xf32> to vector<10x6xf32>
    %425 = vector.extract_strided_slice %393 {offsets = [0, 126], sizes = [10, 6], strides = [1, 1]} : vector<10x162xf32> to vector<10x6xf32>
    %426 = arith.maximumf %424, %425 : vector<10x6xf32>
    %427 = vector.extract_strided_slice %393 {offsets = [0, 132], sizes = [10, 6], strides = [1, 1]} : vector<10x162xf32> to vector<10x6xf32>
    %428 = vector.extract_strided_slice %393 {offsets = [0, 138], sizes = [10, 6], strides = [1, 1]} : vector<10x162xf32> to vector<10x6xf32>
    %429 = arith.maximumf %427, %428 : vector<10x6xf32>
    %430 = vector.extract_strided_slice %393 {offsets = [0, 144], sizes = [10, 6], strides = [1, 1]} : vector<10x162xf32> to vector<10x6xf32>
    %431 = vector.extract_strided_slice %393 {offsets = [0, 150], sizes = [10, 6], strides = [1, 1]} : vector<10x162xf32> to vector<10x6xf32>
    %432 = arith.maximumf %430, %431 : vector<10x6xf32>
    %433 = tpu.concatenate %396, %399, %402, %405, %408, %411, %414, %417, %420, %423, %426, %429, %432 in 1 : vector<10x6xf32>, vector<10x6xf32>, vector<10x6xf32>, vector<10x6xf32>, vector<10x6xf32>, vector<10x6xf32>, vector<10x6xf32>, vector<10x6xf32>, vector<10x6xf32>, vector<10x6xf32>, vector<10x6xf32>, vector<10x6xf32>, vector<10x6xf32> -> vector<10x78xf32>
    %c0_86 = arith.constant 0 : index
    %c0_87 = arith.constant 0 : index
    %434 = vector.load %arg7[%c0_86, %c0_87] : memref<1x198xf32, #tpu.memory_space<vmem>>, vector<1x198xf32>
    %435 = vector.extract_strided_slice %433 {offsets = [0, 0], sizes = [6, 78], strides = [1, 1]} : vector<10x78xf32> to vector<6x78xf32>
    %c0_88 = arith.constant 0 : index
    %c0_89 = arith.constant 0 : index
    %c0_90 = arith.constant 0 : index
    %436 = vector.load %arg6[%c0_88, %c0_89, %c0_90] : memref<3x78x198xf32, #tpu.memory_space<vmem>>, vector<1x78x198xf32>
    %437 = vector.shape_cast %436 : vector<1x78x198xf32> to vector<78x198xf32>
    %cst_91 = arith.constant dense<0.000000e+00> : vector<6x198xf32>
    %438 = tpu.matmul %435, %437, %cst_91 {dimension_numbers = #tpu.dot_dimension_numbers<[1], [0], [0], [1], [0, 0, 1, 1], [], []>} : vector<6x78xf32>, vector<78x198xf32>, vector<6x198xf32> -> vector<6x198xf32>
    %439 = vector.broadcast %434 : vector<1x198xf32> to vector<6x198xf32>
    %440 = arith.addf %439, %438 : vector<6x198xf32>
    %441 = vector.extract_strided_slice %433 {offsets = [2, 0], sizes = [6, 78], strides = [1, 1]} : vector<10x78xf32> to vector<6x78xf32>
    %c1_92 = arith.constant 1 : index
    %c0_93 = arith.constant 0 : index
    %c0_94 = arith.constant 0 : index
    %442 = vector.load %arg6[%c1_92, %c0_93, %c0_94] : memref<3x78x198xf32, #tpu.memory_space<vmem>>, vector<1x78x198xf32>
    %443 = vector.shape_cast %442 : vector<1x78x198xf32> to vector<78x198xf32>
    %cst_95 = arith.constant dense<0.000000e+00> : vector<6x198xf32>
    %444 = tpu.matmul %441, %443, %cst_95 {dimension_numbers = #tpu.dot_dimension_numbers<[1], [0], [0], [1], [0, 0, 1, 1], [], []>} : vector<6x78xf32>, vector<78x198xf32>, vector<6x198xf32> -> vector<6x198xf32>
    %445 = arith.addf %440, %444 : vector<6x198xf32>
    %446 = vector.extract_strided_slice %433 {offsets = [4, 0], sizes = [6, 78], strides = [1, 1]} : vector<10x78xf32> to vector<6x78xf32>
    %c2_96 = arith.constant 2 : index
    %c0_97 = arith.constant 0 : index
    %c0_98 = arith.constant 0 : index
    %447 = vector.load %arg6[%c2_96, %c0_97, %c0_98] : memref<3x78x198xf32, #tpu.memory_space<vmem>>, vector<1x78x198xf32>
    %448 = vector.shape_cast %447 : vector<1x78x198xf32> to vector<78x198xf32>
    %cst_99 = arith.constant dense<0.000000e+00> : vector<6x198xf32>
    %449 = tpu.matmul %446, %448, %cst_99 {dimension_numbers = #tpu.dot_dimension_numbers<[1], [0], [0], [1], [0, 0, 1, 1], [], []>} : vector<6x78xf32>, vector<78x198xf32>, vector<6x198xf32> -> vector<6x198xf32>
    %450 = arith.addf %445, %449 : vector<6x198xf32>
    %cst_100 = arith.constant 0.000000e+00 : f32
    %451 = vector.broadcast %cst_100 : f32 to vector<6x198xf32>
    %452 = arith.maximumf %450, %451 : vector<6x198xf32>
    %453 = vector.extract_strided_slice %452 {offsets = [0, 0], sizes = [2, 198], strides = [1, 1]} : vector<6x198xf32> to vector<2x198xf32>
    %454 = vector.extract_strided_slice %452 {offsets = [2, 0], sizes = [2, 198], strides = [1, 1]} : vector<6x198xf32> to vector<2x198xf32>
    %455 = arith.maximumf %453, %454 : vector<2x198xf32>
    %456 = vector.extract_strided_slice %455 {offsets = [0, 0], sizes = [2, 18], strides = [1, 1]} : vector<2x198xf32> to vector<2x18xf32>
    %457 = vector.extract_strided_slice %455 {offsets = [0, 18], sizes = [2, 18], strides = [1, 1]} : vector<2x198xf32> to vector<2x18xf32>
    %458 = arith.maximumf %456, %457 : vector<2x18xf32>
    %459 = vector.extract_strided_slice %455 {offsets = [0, 36], sizes = [2, 18], strides = [1, 1]} : vector<2x198xf32> to vector<2x18xf32>
    %460 = vector.extract_strided_slice %455 {offsets = [0, 54], sizes = [2, 18], strides = [1, 1]} : vector<2x198xf32> to vector<2x18xf32>
    %461 = arith.maximumf %459, %460 : vector<2x18xf32>
    %462 = vector.extract_strided_slice %455 {offsets = [0, 72], sizes = [2, 18], strides = [1, 1]} : vector<2x198xf32> to vector<2x18xf32>
    %463 = vector.extract_strided_slice %455 {offsets = [0, 90], sizes = [2, 18], strides = [1, 1]} : vector<2x198xf32> to vector<2x18xf32>
    %464 = arith.maximumf %462, %463 : vector<2x18xf32>
    %465 = vector.extract_strided_slice %455 {offsets = [0, 108], sizes = [2, 18], strides = [1, 1]} : vector<2x198xf32> to vector<2x18xf32>
    %466 = vector.extract_strided_slice %455 {offsets = [0, 126], sizes = [2, 18], strides = [1, 1]} : vector<2x198xf32> to vector<2x18xf32>
    %467 = arith.maximumf %465, %466 : vector<2x18xf32>
    %468 = vector.extract_strided_slice %455 {offsets = [0, 144], sizes = [2, 18], strides = [1, 1]} : vector<2x198xf32> to vector<2x18xf32>
    %469 = vector.extract_strided_slice %455 {offsets = [0, 162], sizes = [2, 18], strides = [1, 1]} : vector<2x198xf32> to vector<2x18xf32>
    %470 = arith.maximumf %468, %469 : vector<2x18xf32>
    %471 = tpu.concatenate %458, %461, %464, %467, %470 in 1 : vector<2x18xf32>, vector<2x18xf32>, vector<2x18xf32>, vector<2x18xf32>, vector<2x18xf32> -> vector<2x90xf32>
    %c0_101 = arith.constant 0 : index
    %c0_102 = arith.constant 0 : index
    %472 = vector.load %arg8[%c0_101, %c0_102] : memref<90x1000xbf16, #tpu.memory_space<vmem>>, vector<90x1000xbf16>
    %473 = arith.extf %472 : vector<90x1000xbf16> to vector<90x1000xf32>
    %cst_103 = arith.constant dense<0.000000e+00> : vector<2x1000xf32>
    %474 = tpu.matmul %471, %473, %cst_103 {dimension_numbers = #tpu.dot_dimension_numbers<[1], [0], [0], [1], [0, 0, 1, 1], [], []>} : vector<2x90xf32>, vector<90x1000xf32>, vector<2x1000xf32> -> vector<2x1000xf32>
    %c0_104 = arith.constant 0 : index
    %c0_105 = arith.constant 0 : index
    %475 = vector.load %arg9[%c0_104, %c0_105] : memref<1x1000xf32, #tpu.memory_space<vmem>>, vector<1x1000xf32>
    %476 = vector.broadcast %475 : vector<1x1000xf32> to vector<2x1000xf32>
    %477 = arith.addf %474, %476 : vector<2x1000xf32>
    %cst_106 = arith.constant 0.000000e+00 : f32
    %478 = vector.broadcast %cst_106 : f32 to vector<2x1000xf32>
    %479 = arith.maximumf %477, %478 : vector<2x1000xf32>
    %c0_107 = arith.constant 0 : index
    %c0_108 = arith.constant 0 : index
    %480 = vector.load %arg10[%c0_107, %c0_108] : memref<1000x100xbf16, #tpu.memory_space<vmem>>, vector<1000x100xbf16>
    %481 = arith.extf %480 : vector<1000x100xbf16> to vector<1000x100xf32>
    %cst_109 = arith.constant dense<0.000000e+00> : vector<2x100xf32>
    %482 = tpu.matmul %479, %481, %cst_109 {dimension_numbers = #tpu.dot_dimension_numbers<[1], [0], [0], [1], [0, 0, 1, 1], [], []>} : vector<2x1000xf32>, vector<1000x100xf32>, vector<2x100xf32> -> vector<2x100xf32>
    %c0_110 = arith.constant 0 : index
    %c0_111 = arith.constant 0 : index
    %483 = vector.load %arg11[%c0_110, %c0_111] : memref<1x100xf32, #tpu.memory_space<vmem>>, vector<1x100xf32>
    %484 = vector.broadcast %483 : vector<1x100xf32> to vector<2x100xf32>
    %485 = arith.addf %482, %484 : vector<2x100xf32>
    %cst_112 = arith.constant 0.000000e+00 : f32
    %486 = vector.broadcast %cst_112 : f32 to vector<2x100xf32>
    %487 = arith.maximumf %485, %486 : vector<2x100xf32>
    %c0_113 = arith.constant 0 : index
    %c0_114 = arith.constant 0 : index
    %488 = vector.load %arg12[%c0_113, %c0_114] : memref<100x1xf32, #tpu.memory_space<vmem>>, vector<100x1xf32>
    %cst_115 = arith.constant dense<0.000000e+00> : vector<2x1xf32>
    %489 = tpu.matmul %487, %488, %cst_115 {dimension_numbers = #tpu.dot_dimension_numbers<[1], [0], [0], [1], [0, 0, 1, 1], [], []>} : vector<2x100xf32>, vector<100x1xf32>, vector<2x1xf32> -> vector<2x1xf32>
    %c0_116 = arith.constant 0 : index
    %c0_117 = arith.constant 0 : index
    %490 = vector.load %arg13[%c0_116, %c0_117] : memref<1x1xf32, #tpu.memory_space<vmem>>, vector<1x1xf32>
    %491 = vector.broadcast %490 : vector<1x1xf32> to vector<2x1xf32>
    %492 = arith.addf %489, %491 : vector<2x1xf32>
    %493 = arith.negf %492 : vector<2x1xf32>
    %494 = math.exp %493 : vector<2x1xf32>
    %cst_118 = arith.constant 1.000000e+00 : f32
    %495 = vector.broadcast %cst_118 : f32 to vector<2x1xf32>
    %496 = arith.addf %495, %494 : vector<2x1xf32>
    %497 = arith.divf %495, %496 : vector<2x1xf32>
    %c0_119 = arith.constant 0 : index
    %c0_120 = arith.constant 0 : index
    %498 = vector.load %arg14[%c0_119, %c0_120] : memref<2x1xf32, #tpu.memory_space<vmem>>, vector<2x1xf32>
    tpu.vector_store %arg14[%c0_119, %c0_120], %497 {strides = array<i32>} : memref<2x1xf32, #tpu.memory_space<vmem>>, vector<2x1xf32>,
    return
  }
}

</mosaic_0001>

<bundles_post_ra>
// kernel: tpu_custom_call.1
= control target key start
LH: loop header
LB: loop body
LE: loop exit
PB: predicated region body
PF: predicated region fallthrough
CT: control target
= control target key end

     0   :  { %s4205_s0 = inlined_call_operand.vmem [shape: f32[24,29], index: 0, kind: input, shape index: {}]   ;;  %s4206_s1 = inlined_call_operand.vmem [shape: f32[29,128], index: 1, kind: input, shape index: {}]   ;;  %s4207_s2 = inlined_call_operand.vmem [shape: f32[32,128], index: 2, kind: input, shape index: {}]   ;;  %s4208_s3 = inlined_call_operand.vmem [shape: f32[1,128], index: 3, kind: input, shape index: {}]   ;;  %s4209_s4 = inlined_call_operand.hbm [shape: f32[3,29,162], index: 4, kind: input, shape index: {}]   ;;  %s4210_s5 = inlined_call_operand.vmem [shape: f32[1,162], index: 5, kind: input, shape index: {}]   ;;  %s4211_s6 = inlined_call_operand.vmem [shape: f32[3,78,198], index: 6, kind: input, shape index: {}]   ;;  %s4212_s7 = inlined_call_operand.vmem [shape: f32[1,198], index: 7, kind: input, shape index: {}]   ;;  %s4213_s8 = inlined_call_operand.vmem [shape: bf16[90,1000], index: 8, kind: input, shape index: {}]   ;;  %s4214_s9 = inlined_call_operand.vmem [shape: f32[1,1000], index: 9, kind: input, shape index: {}]   ;;  %s4215_s10 = inlined_call_operand.vmem [shape: bf16[1000,100], index: 10, kind: input, shape index: {}]   ;;  %s4216_s11 = inlined_call_operand.vmem [shape: f32[1,100], index: 11, kind: input, shape index: {}]   ;;  %s4217_s12 = inlined_call_operand.vmem [shape: f32[100,1], index: 12, kind: input, shape index: {}]   ;;  %s4218_s13 = inlined_call_operand.<no memory space> [shape: f32[1,1], index: 13, kind: input, shape index: {}]   ;;  %s4219_s14 = inlined_call_operand.vmem [shape: f32[2,1], index: 14, kind: output, shape index: {}]  }
   0x1   :  { %v19_v0 = vstv %s4218_s13 }
   0x2   :  { %20 = vst [vmem:[#allocation3] sm:$0x1] %v19_v0 }
   0x3   :  { %21 = vsyncpa [#allocation5], 0  ;;  %s34_s17 = sshll.u32 %s4209_s4, 4  ;;  %s3138_s18 = smov [#allocation4]   ;;  %s35_s17 = int_to_ptr.hbm [resolvable:$true] %s34_s17 }
   0x4   :  { %s36_s19 = sshll.u32 %s3138_s18, 4  ;;  %s3139_s20 = smov 256   ;;  %s37_s19 = int_to_ptr.vmem [resolvable:$true] %s36_s19 }
   0x5   :  { %s3140_s21 = smov 16  }
   0x6   :  { %42 = dma.hbm_to_vmem [thread:$0]  %s35_s17, 3072, %s37_s19, [#allocation5], %s3139_s20, %s3139_s20, %s3140_s21  }
   0x7   :  { %3136 = dma.done.wait [#allocation5], 3072  }
   0x8   :  { %3137 = vsyncadd [#allocation5], 4294964224  ;;  %vm86_vm0 = vcmask 1044480   ;;  %v71_v1 = vld [vmem:[%s4206_s1 + $0x18] sm:$0x1f]  ;;  %v70_v2 = vld [vmem:[%s4206_s1 + $0x10] sm:$0xff] }
   0x9   :  { %v3246_v3 = vld [vmem:[%s4207_s2 + $0x18] sm:$0xff]  ;;  %2559 = vmatpush.msk.msra.mxu0 %vm86_vm0, %v71_v1  ;;  %v3253_v4 = vld [vmem:[%s4207_s2 + $0x10] sm:$0xff]  ;;  %v69_v5 = vld [vmem:[%s4206_s1 + $0x8] sm:$0xff]  ;;  %vm76_vm1 = vcmask 236544   ;;  %v3141_v10 = vmov 0.0   ;;  %s3142_s22 = smov 64  }
   0xa   :  { %136 = vmatpush.msra.mxu1 %v3246_v3  ;;  %v3261_v6 = vld [vmem:[%s4207_s2 + $0x8] sm:$0xff]  ;;  %202 = vmatpush.msra.mxu2 %v3246_v3  ;;  %v68_v7 = vld [vmem:[%s4206_s1] sm:$0xff]  ;;  %vm186_vm6 = vcmask 254976   ;;  %vm120_vm7 = vcmask 261120   ;;  %v67_v0 = vld [vmem:[%s4205_s0 + $0x10] sm:$0xff]  ;;  %s3145_s26 = smov 110  }
   0xb   :  { %717 = vmatpush.msra.mxu3 %v3246_v3  ;;  %103 = vmatpush.msra.mxu0 %v70_v2  ;;  %v3272_v8 = vld [vmem:[%s4207_s2] sm:$0xff]  ;;  %v66_v63 = vld [vmem:[%s4205_s0 + $0x8] sm:$0xff]  ;;  %s3146_s27 = smov 86   ;;  %s3147_s28 = smov 62  }
   0xc   :  { %137 = vmatpush.msra.mxu1 %v3253_v4  ;;  %203 = vmatpush.msra.mxu2 %v3253_v4  ;;  %v65_v9 = vld [vmem:[%s4205_s0] sm:$0xff]  ;;  %s3148_s29 = smov 56   ;;  %s3149_s30 = smov 68  }
   0xd   :  { %718 = vmatpush.msra.mxu3 %v3253_v4  ;;  %104 = vmatpush.msra.mxu0 %v69_v5  ;;  %v3309_v11 = vld [vmem:[%s4208_s3] ss:$0 sm:$0xff]  ;;  %s3143_s3 = smov 32   ;;  %s3150_s15 = smov 116  }
   0xe   :  { %138 = vmatpush.msra.mxu1 %v3261_v6  ;;  %204 = vmatpush.msra.mxu2 %v3261_v6  ;;  %s3151_s16 = smov 98   ;;  %s3152_s17 = smov 104  }
   0xf   :  { %719 = vmatpush.msra.mxu3 %v3261_v6  ;;  %105 = vmatpush.msra.mxu0 %v68_v7  ;;  %s3153_s18 = smov 80   ;;  %s3154_s19 = smov 92  }
  0x10   :  { %139 = vmatpush.msra.mxu1 %v3272_v8  ;;  %2560 = vmatmul.msk.f32.vlgmr.msra.gmra.mxu0 %vm76_vm1, %v65_v9  ;;  %s3155_s20 = smov 74  }
  0x11   :  { %140 = vmatmul.f32.vlgmr.msra.gmra.mxu1 %v3141_v10  ;;  %205 = vmatpush.msra.mxu2 %v3272_v8 }
  0x12   :  { %277 = vmatpush.msrb.mxu0 %v3246_v3  ;;  %352 = vmatpush.msrb.mxu1 %v3246_v3 }
  0x13   :  { %427 = vmatpush.msrb.mxu2 %v3246_v3  ;;  %720 = vmatpush.msra.mxu3 %v3272_v8 }
  0x14   :  { %278 = vmatpush.msrb.mxu0 %v3253_v4  ;;  %353 = vmatpush.msrb.mxu1 %v3253_v4 }
  0x15   :  { %428 = vmatpush.msrb.mxu2 %v3253_v4 }
  0x16   :  { %279 = vmatpush.msrb.mxu0 %v3261_v6  ;;  %354 = vmatpush.msrb.mxu1 %v3261_v6 }
  0x17   :  { %429 = vmatpush.msrb.mxu2 %v3261_v6 }
  0x18   :  { %280 = vmatpush.msrb.mxu0 %v3272_v8  ;;  %355 = vmatpush.msrb.mxu1 %v3272_v8 }
  0x19   :  { %430 = vmatpush.msrb.mxu2 %v3272_v8  ;;  %2561 = vmatmul.msk.f32.gmra.mxu0 %vm76_vm1, %v66_v63 }
  0x1a   :  { %495 = vmatpush.msra.mxu1 %v3246_v3  ;;  %785 = vmatpush.msra.mxu0 %v3246_v3 }
  0x1c   :  { %496 = vmatpush.msra.mxu1 %v3253_v4  ;;  %786 = vmatpush.msra.mxu0 %v3253_v4 }
  0x1e   :  { %497 = vmatpush.msra.mxu1 %v3261_v6  ;;  %787 = vmatpush.msra.mxu0 %v3261_v6 }
  0x20   :  { %498 = vmatpush.msra.mxu1 %v3272_v8  ;;  %788 = vmatpush.msra.mxu0 %v3272_v8 }
  0x21   :  { %2562 = vmatmul.msk.f32.gmra.mxu0 %vm76_vm1, %v67_v0 }
  0x8d   :  { %v107_v12 = vpop.f32.mrf.mxu0 }
  0x8e   :  { %v141_v13 = vpop.f32.mrf.mxu1  ;;  %v3312_v14 = vadd.f32 %v3309_v11, %v107_v12 }
  0x90   :  { %v144_v15 = vadd.f32 %v141_v13, %v3312_v14 }
  0x92   :  { %3012 = vtanh.f32 %v144_v15  ;;  %v2563_v17 = vmul.f32 -1.442695, %v144_v15 }
  0x94   :  { %3014 = vpow2.f32 %v2563_v17 }
  0x96   :  { %v3342_v9 = vpop.f32.mrf.mxu0 }
  0x98   :  { %v3013_v16 = vpop.eup %3012 }
  0x99   :  { %167 = vrot.lane.b32.xlu0 %v3013_v16, %s3142_s22 }
  0x9a   :  { %v3015_v18 = vpop.eup %3014 }
  0x9b   :  { %v148_v19 = vadd.f32 1.0, %v3015_v18 }
  0x9d   :  { %3016 = vrcp.f32 %v148_v19  ;;  %v160_v25 = vand.u32 2147483648, %v148_v19  ;;  %vm154_vm3 = vweird.f32 %v148_v19  ;;  %v158_v26 = vand.u32 2147483647, %v148_v19 }
  0x9e   :  { %v3344_v10 = vpop.f32.mrf.mxu0 }
  0x9f   :  { %v161_v28 = vor.u32 1.1754944e-38, %v160_v25  ;;  %vm159_vm5 = vcmp.eq.f32.partialorder %v158_v26, 8.507059e+37 }
  0xa3   :  { %v3017_v20 = vpop.eup %3016 }
  0xa4   :  { %v150_v21 = vmul.f32 %v3017_v20, %v148_v19  ;;  %vm155_vm2 = vweird.f32 %v3017_v20 }
  0xa5   :  { %vm156_vm4 = vmor %vm154_vm3, %vm155_vm2 }
  0xa6   :  { %v151_v22 = vsub.f32 1.0, %v150_v21 }
  0xa8   :  { %v152_v23 = vmul.f32 %v3017_v20, %v151_v22 }
  0xaa   :  { %v153_v24 = vadd.f32 %v3017_v20, %v152_v23 }
  0xac   :  { %v157_v27 = vsel %vm156_vm4, %v3017_v20, %v153_v24 }
  0xad   :  { %v162_v30 = vsel %vm159_vm5, %v161_v28, %v157_v27 }
  0xae   :  { %v165_v32 = vmul.f32 0.0, %v162_v30 }
 0x10b   :  { %v168_v29 = vpop.permute.xlu0 %167 }
 0x10c   :  { %v170_v31 = vmul.f32 %v168_v29, %v162_v30 }
 0x10e   :  { %172 = vrot.lane.b32.xlu0 %v170_v31, %s3143_s3 }
 0x180   :  { %v173_v33 = vpop.permute.xlu0 %172 }
 0x181   :  { %v175_v34 = vadd.f32 %v173_v33, %v165_v32 }
 0x183   :  { %3018 = vtanh.f32 %v175_v34  ;;  %v235_v58 = vrot.slane %v175_v34, 6 }
 0x189   :  { %v3019_v35 = vpop.eup %3018 }
 0x18a   :  { %178 = vrot.lane.b32.xlu1 %v3019_v35, %s3142_s22 }
 0x1fc   :  { %v179_v36 = vpop.permute.xlu1 %178 }
 0x1fd   :  { %v181_v37 = vmul.f32 %v179_v36, %v162_v30 }
 0x1ff   :  { %183 = vrot.lane.b32.xlu1 %v181_v37, %s3143_s3 }
 0x271   :  { %v184_v38 = vpop.permute.xlu1 %183 }
 0x272   :  { %187 = vst.msk [vmem:[#allocation2] sm:$0x3] %vm186_vm6, %v184_v38  ;;  %2564 = vmatmul.msk.f32.vlgmr.msra.gmra.mxu2 %vm120_vm7, %v184_v38 }
 0x273   :  { %643 = vmatpush.msra.mxu2 %v3246_v3 }
 0x275   :  { %644 = vmatpush.msra.mxu2 %v3253_v4 }
 0x277   :  { %645 = vmatpush.msra.mxu2 %v3261_v6 }
 0x279   :  { %646 = vmatpush.msra.mxu2 %v3272_v8 }
 0x2f5   :  { %v207_v39 = vpop.f32.mrf.mxu2 }
 0x2f6   :  { %v211_v40 = vrot.slane %v207_v39, 6 }
 0x2f8   :  { %v213_v41 = vadd.f32 %v211_v40, %v3312_v14 }
 0x2fa   :  { %3020 = vtanh.f32 %v213_v41  ;;  %v2565_v43 = vmul.f32 -1.442695, %v213_v41 }
 0x2fc   :  { %3022 = vpow2.f32 %v2565_v43 }
 0x300   :  { %v3021_v42 = vpop.eup %3020 }
 0x301   :  { %239 = vrot.lane.b32.xlu2 %v3021_v42, %s3142_s22 }
 0x302   :  { %v3023_v44 = vpop.eup %3022 }
 0x303   :  { %v217_v45 = vadd.f32 1.0, %v3023_v44 }
 0x305   :  { %3024 = vrcp.f32 %v217_v45  ;;  %v229_v51 = vand.u32 2147483648, %v217_v45  ;;  %vm223_vm9 = vweird.f32 %v217_v45  ;;  %v227_v52 = vand.u32 2147483647, %v217_v45 }
 0x307   :  { %v230_v54 = vor.u32 1.1754944e-38, %v229_v51  ;;  %vm228_vm11 = vcmp.eq.f32.partialorder %v227_v52, 8.507059e+37 }
 0x30b   :  { %v3025_v46 = vpop.eup %3024 }
 0x30c   :  { %v219_v47 = vmul.f32 %v3025_v46, %v217_v45  ;;  %vm224_vm8 = vweird.f32 %v3025_v46 }
 0x30d   :  { %vm225_vm10 = vmor %vm223_vm9, %vm224_vm8 }
 0x30e   :  { %v220_v48 = vsub.f32 1.0, %v219_v47 }
 0x310   :  { %v221_v49 = vmul.f32 %v3025_v46, %v220_v48 }
 0x312   :  { %v222_v50 = vadd.f32 %v3025_v46, %v221_v49 }
 0x314   :  { %v226_v53 = vsel %vm225_vm10, %v3025_v46, %v222_v50 }
 0x315   :  { %v231_v56 = vsel %vm228_vm11, %v230_v54, %v226_v53 }
 0x316   :  { %v237_v59 = vmul.f32 %v235_v58, %v231_v56 }
 0x35b   :  { %v240_v55 = vpop.permute.xlu2 %239 }
 0x35c   :  { %v242_v57 = vmul.f32 %v240_v55, %v231_v56 }
 0x35e   :  { %244 = vrot.lane.b32.xlu2 %v242_v57, %s3143_s3 }
 0x3b8   :  { %v245_v60 = vpop.permute.xlu2 %244 }
 0x3b9   :  { %v247_v61 = vadd.f32 %v245_v60, %v237_v59 }
 0x3bb   :  { %3026 = vtanh.f32 %v247_v61  ;;  %v310_v32 = vrot.slane %v247_v61, 6 }
 0x3c1   :  { %v3027_v62 = vpop.eup %3026 }
 0x3c2   :  { %250 = vrot.lane.b32.xlu0 %v3027_v62, %s3142_s22 }
 0x434   :  { %v251_v1 = vpop.permute.xlu0 %250 }
 0x435   :  { %v3337_v2 = vmul.f32 %v251_v1, %v231_v56 }
 0x437   :  { %v260_v5 = vrot.slane %v3337_v2, 2 }
 0x439   :  { %261 = vrot.lane.b32.xlu1 %v260_v5, %s3143_s3 }
 0x4ab   :  { %v262_v7 = vpop.permute.xlu1 %261 }
 0x4ac   :  { %2566 = vmatmul.msk.f32.vlgmr.msrb.gmra.mxu0 %vm120_vm7, %v262_v7 }
 0x529   :  { %v282_v12 = vpop.f32.mrf.mxu0 }
 0x52a   :  { %v286_v13 = vrot.slane %v282_v12, 4  ;;  %v3374_v12 = vadd.f32 %v3309_v11, %v3342_v9 }
 0x52c   :  { %v288_v15 = vadd.f32 %v286_v13, %v3312_v14 }
 0x52e   :  { %3028 = vtanh.f32 %v288_v15  ;;  %v2567_v17 = vmul.f32 -1.442695, %v288_v15 }
 0x530   :  { %3030 = vpow2.f32 %v2567_v17 }
 0x534   :  { %v3029_v16 = vpop.eup %3028 }
 0x535   :  { %314 = vrot.lane.b32.xlu2 %v3029_v16, %s3142_s22 }
 0x536   :  { %v3031_v18 = vpop.eup %3030 }
 0x537   :  { %v292_v19 = vadd.f32 1.0, %v3031_v18 }
 0x539   :  { %3032 = vrcp.f32 %v292_v19  ;;  %v304_v25 = vand.u32 2147483648, %v292_v19  ;;  %vm298_vm13 = vweird.f32 %v292_v19  ;;  %v302_v26 = vand.u32 2147483647, %v292_v19 }
 0x53b   :  { %v305_v28 = vor.u32 1.1754944e-38, %v304_v25  ;;  %vm303_vm15 = vcmp.eq.f32.partialorder %v302_v26, 8.507059e+37 }
 0x53f   :  { %v3033_v20 = vpop.eup %3032 }
 0x540   :  { %v294_v21 = vmul.f32 %v3033_v20, %v292_v19  ;;  %vm299_vm12 = vweird.f32 %v3033_v20 }
 0x541   :  { %vm300_vm14 = vmor %vm298_vm13, %vm299_vm12 }
 0x542   :  { %v295_v22 = vsub.f32 1.0, %v294_v21 }
 0x544   :  { %v296_v23 = vmul.f32 %v3033_v20, %v295_v22 }
 0x546   :  { %v297_v24 = vadd.f32 %v3033_v20, %v296_v23 }
 0x548   :  { %v301_v27 = vsel %vm300_vm14, %v3033_v20, %v297_v24 }
 0x549   :  { %v306_v30 = vsel %vm303_vm15, %v305_v28, %v301_v27 }
 0x54a   :  { %v312_v33 = vmul.f32 %v310_v32, %v306_v30 }
 0x58f   :  { %v315_v29 = vpop.permute.xlu2 %314 }
 0x590   :  { %v317_v31 = vmul.f32 %v315_v29, %v306_v30 }
 0x592   :  { %319 = vrot.lane.b32.xlu0 %v317_v31, %s3143_s3 }
 0x604   :  { %v320_v34 = vpop.permute.xlu0 %319 }
 0x605   :  { %v322_v35 = vadd.f32 %v320_v34, %v312_v33 }
 0x607   :  { %3034 = vtanh.f32 %v322_v35  ;;  %v385_v59 = vrot.slane %v322_v35, 6 }
 0x60d   :  { %v3035_v36 = vpop.eup %3034 }
 0x60e   :  { %325 = vrot.lane.b32.xlu1 %v3035_v36, %s3142_s22 }
 0x680   :  { %v326_v37 = vpop.permute.xlu1 %325 }
 0x681   :  { %v3350_v38 = vmul.f32 %v326_v37, %v306_v30 }
 0x683   :  { %v335_v39 = vrot.slane %v3350_v38, 4 }
 0x685   :  { %336 = vrot.lane.b32.xlu2 %v335_v39, %s3143_s3 }
 0x6df   :  { %v337_v40 = vpop.permute.xlu2 %336 }
 0x6e0   :  { %2568 = vmatmul.msk.f32.vlgmr.msrb.gmra.mxu1 %vm120_vm7, %v337_v40 }
 0x6e1   :  { %569 = vmatpush.msrb.mxu1 %v3246_v3 }
 0x6e3   :  { %570 = vmatpush.msrb.mxu1 %v3253_v4 }
 0x6e5   :  { %571 = vmatpush.msrb.mxu1 %v3261_v6 }
 0x6e7   :  { %572 = vmatpush.msrb.mxu1 %v3272_v8 }
 0x75d   :  { %v357_v41 = vpop.f32.mrf.mxu1 }
 0x75e   :  { %v361_v42 = vrot.slane %v357_v41, 2 }
 0x760   :  { %v363_v43 = vadd.f32 %v361_v42, %v3312_v14 }
 0x762   :  { %3036 = vtanh.f32 %v363_v43  ;;  %v2569_v45 = vmul.f32 -1.442695, %v363_v43 }
 0x764   :  { %3038 = vpow2.f32 %v2569_v45 }
 0x768   :  { %v3037_v44 = vpop.eup %3036 }
 0x769   :  { %389 = vrot.lane.b32.xlu0 %v3037_v44, %s3142_s22 }
 0x76a   :  { %v3039_v46 = vpop.eup %3038 }
 0x76b   :  { %v367_v47 = vadd.f32 1.0, %v3039_v46 }
 0x76d   :  { %3040 = vrcp.f32 %v367_v47  ;;  %v379_v53 = vand.u32 2147483648, %v367_v47  ;;  %vm373_vm3 = vweird.f32 %v367_v47  ;;  %v377_v54 = vand.u32 2147483647, %v367_v47 }
 0x76f   :  { %v380_v55 = vor.u32 1.1754944e-38, %v379_v53  ;;  %vm378_vm5 = vcmp.eq.f32.partialorder %v377_v54, 8.507059e+37 }
 0x773   :  { %v3041_v48 = vpop.eup %3040 }
 0x774   :  { %v369_v49 = vmul.f32 %v3041_v48, %v367_v47  ;;  %vm374_vm2 = vweird.f32 %v3041_v48 }
 0x775   :  { %vm375_vm4 = vmor %vm373_vm3, %vm374_vm2 }
 0x776   :  { %v370_v50 = vsub.f32 1.0, %v369_v49 }
 0x778   :  { %v371_v51 = vmul.f32 %v3041_v48, %v370_v50 }
 0x77a   :  { %v372_v52 = vadd.f32 %v3041_v48, %v371_v51 }
 0x77c   :  { %v376_v14 = vsel %vm375_vm4, %v3041_v48, %v372_v52 }
 0x77d   :  { %v381_v57 = vsel %vm378_vm5, %v380_v55, %v376_v14 }
 0x77e   :  { %v387_v60 = vmul.f32 %v385_v59, %v381_v57 }
 0x7db   :  { %v390_v56 = vpop.permute.xlu0 %389 }
 0x7dc   :  { %v392_v58 = vmul.f32 %v390_v56, %v381_v57 }
 0x7de   :  { %394 = vrot.lane.b32.xlu1 %v392_v58, %s3143_s3 }
 0x850   :  { %v395_v61 = vpop.permute.xlu1 %394 }
 0x851   :  { %v397_v62 = vadd.f32 %v395_v61, %v387_v60 }
 0x853   :  { %3042 = vtanh.f32 %v397_v62  ;;  %v457_v31 = vrot.slane %v397_v62, 6 }
 0x859   :  { %v3043_v63 = vpop.eup %3042 }
 0x85a   :  { %400 = vrot.lane.b32.xlu2 %v3043_v63, %s3142_s22 }
 0x8b4   :  { %v401_v0 = vpop.permute.xlu2 %400 }
 0x8b5   :  { %v3363_v1 = vmul.f32 %v401_v0, %v381_v57 }
 0x8b7   :  { %v410_v5 = vrot.slane %v3363_v1, 6 }
 0x8b9   :  { %411 = vrot.lane.b32.xlu0 %v410_v5, %s3143_s3 }
 0x92b   :  { %v412_v7 = vpop.permute.xlu0 %411 }
 0x92c   :  { %2570 = vmatmul.msk.f32.vlgmr.msrb.gmra.mxu2 %vm120_vm7, %v412_v7 }
 0x92d   :  { %933 = vmatpush.msrb.mxu2 %v3246_v3 }
 0x92f   :  { %934 = vmatpush.msrb.mxu2 %v3253_v4 }
 0x931   :  { %935 = vmatpush.msrb.mxu2 %v3261_v6 }
 0x933   :  { %936 = vmatpush.msrb.mxu2 %v3272_v8 }
 0x9af   :  { %v432_v13 = vpop.f32.mrf.mxu2 }
 0x9b0   :  { %v435_v15 = vadd.f32 %v432_v13, %v3374_v12 }
 0x9b2   :  { %3044 = vtanh.f32 %v435_v15  ;;  %v2571_v17 = vmul.f32 -1.442695, %v435_v15 }
 0x9b4   :  { %3046 = vpow2.f32 %v2571_v17 }
 0x9b8   :  { %v3045_v16 = vpop.eup %3044 }
 0x9b9   :  { %461 = vrot.lane.b32.xlu1 %v3045_v16, %s3142_s22 }
 0x9ba   :  { %v3047_v18 = vpop.eup %3046 }
 0x9bb   :  { %v439_v19 = vadd.f32 1.0, %v3047_v18 }
 0x9bd   :  { %3048 = vrcp.f32 %v439_v19  ;;  %v451_v9 = vand.u32 2147483648, %v439_v19  ;;  %vm445_vm9 = vweird.f32 %v439_v19  ;;  %v449_v25 = vand.u32 2147483647, %v439_v19 }
 0x9bf   :  { %v452_v27 = vor.u32 1.1754944e-38, %v451_v9  ;;  %vm450_vm11 = vcmp.eq.f32.partialorder %v449_v25, 8.507059e+37 }
 0x9c3   :  { %v3049_v20 = vpop.eup %3048 }
 0x9c4   :  { %v441_v21 = vmul.f32 %v3049_v20, %v439_v19  ;;  %vm446_vm8 = vweird.f32 %v3049_v20 }
 0x9c5   :  { %vm447_vm10 = vmor %vm445_vm9, %vm446_vm8 }
 0x9c6   :  { %v442_v22 = vsub.f32 1.0, %v441_v21 }
 0x9c8   :  { %v443_v23 = vmul.f32 %v3049_v20, %v442_v22 }
 0x9ca   :  { %v444_v24 = vadd.f32 %v3049_v20, %v443_v23 }
 0x9cc   :  { %v448_v26 = vsel %vm447_vm10, %v3049_v20, %v444_v24 }
 0x9cd   :  { %v453_v29 = vsel %vm450_vm11, %v452_v27, %v448_v26 }
 0x9ce   :  { %v459_v32 = vmul.f32 %v457_v31, %v453_v29 }
 0xa2b   :  { %v462_v28 = vpop.permute.xlu1 %461 }
 0xa2c   :  { %v464_v30 = vmul.f32 %v462_v28, %v453_v29 }
 0xa2e   :  { %466 = vrot.lane.b32.xlu2 %v464_v30, %s3143_s3 }
 0xa88   :  { %v467_v33 = vpop.permute.xlu2 %466 }
 0xa89   :  { %v469_v34 = vadd.f32 %v467_v33, %v459_v32 }
 0xa8b   :  { %3050 = vtanh.f32 %v469_v34  ;;  %v528_v14 = vrot.slane %v469_v34, 6 }
 0xa91   :  { %v3051_v35 = vpop.eup %3050 }
 0xa92   :  { %472 = vrot.lane.b32.xlu0 %v3051_v35, %s3142_s22 }
 0xb04   :  { %v473_v36 = vpop.permute.xlu0 %472 }
 0xb05   :  { %v475_v37 = vmul.f32 %v473_v36, %v453_v29 }
 0xb07   :  { %477 = vrot.lane.b32.xlu1 %v475_v37, %s3143_s3 }
 0xb79   :  { %v478_v39 = vpop.permute.xlu1 %477 }
 0xb7a   :  { %480 = vst.msk [vmem:[#allocation2 + $0x8] sm:$0x3] %vm186_vm6, %v478_v39  ;;  %2572 = vmatmul.msk.f32.vlgmr.msra.gmra.mxu1 %vm120_vm7, %v478_v39 }
 0xb7b   :  { %859 = vmatpush.msra.mxu1 %v3246_v3 }
 0xb7d   :  { %860 = vmatpush.msra.mxu1 %v3253_v4 }
 0xb7f   :  { %861 = vmatpush.msra.mxu1 %v3261_v6 }
 0xb81   :  { %862 = vmatpush.msra.mxu1 %v3272_v8 }
 0xbf7   :  { %v500_v40 = vpop.f32.mrf.mxu1 }
 0xbf8   :  { %v504_v41 = vrot.slane %v500_v40, 6 }
 0xbfa   :  { %v506_v42 = vadd.f32 %v504_v41, %v3374_v12 }
 0xbfc   :  { %3052 = vtanh.f32 %v506_v42  ;;  %v2573_v44 = vmul.f32 -1.442695, %v506_v42 }
 0xbfe   :  { %3054 = vpow2.f32 %v2573_v44 }
 0xc02   :  { %v3053_v43 = vpop.eup %3052 }
 0xc03   :  { %532 = vrot.lane.b32.xlu2 %v3053_v43, %s3142_s22 }
 0xc04   :  { %v3055_v45 = vpop.eup %3054 }
 0xc05   :  { %v510_v46 = vadd.f32 1.0, %v3055_v45 }
 0xc07   :  { %3056 = vrcp.f32 %v510_v46  ;;  %v522_v8 = vand.u32 2147483648, %v510_v46  ;;  %vm516_vm13 = vweird.f32 %v510_v46  ;;  %v520_v49 = vand.u32 2147483647, %v510_v46 }
 0xc09   :  { %v523_v51 = vor.u32 1.1754944e-38, %v522_v8  ;;  %vm521_vm15 = vcmp.eq.f32.partialorder %v520_v49, 8.507059e+37 }
 0xc0d   :  { %v3057_v3 = vpop.eup %3056 }
 0xc0e   :  { %v512_v47 = vmul.f32 %v3057_v3, %v510_v46  ;;  %vm517_vm12 = vweird.f32 %v3057_v3 }
 0xc0f   :  { %vm518_vm14 = vmor %vm516_vm13, %vm517_vm12 }
 0xc10   :  { %v513_v4 = vsub.f32 1.0, %v512_v47 }
 0xc12   :  { %v514_v48 = vmul.f32 %v3057_v3, %v513_v4 }
 0xc14   :  { %v515_v6 = vadd.f32 %v3057_v3, %v514_v48 }
 0xc16   :  { %v519_v50 = vsel %vm518_vm14, %v3057_v3, %v515_v6 }
 0xc17   :  { %v524_v53 = vsel %vm521_vm15, %v523_v51, %v519_v50 }
 0xc18   :  { %v530_v55 = vmul.f32 %v528_v14, %v524_v53 }
 0xc5d   :  { %v533_v52 = vpop.permute.xlu2 %532 }
 0xc5e   :  { %v535_v54 = vmul.f32 %v533_v52, %v524_v53 }
 0xc60   :  { %537 = vrot.lane.b32.xlu0 %v535_v54, %s3143_s3 }
 0xcd2   :  { %v538_v56 = vpop.permute.xlu0 %537 }
 0xcd3   :  { %v540_v57 = vadd.f32 %v538_v56, %v530_v55 }
 0xcd5   :  { %3058 = vtanh.f32 %v540_v57  ;;  %v602_v28 = vrot.slane %v540_v57, 6 }
 0xcdb   :  { %v3059_v58 = vpop.eup %3058 }
 0xcdc   :  { %543 = vrot.lane.b32.xlu1 %v3059_v58, %s3142_s22 }
 0xd4e   :  { %v544_v59 = vpop.permute.xlu1 %543 }
 0xd4f   :  { %v3391_v60 = vmul.f32 %v544_v59, %v524_v53 }
 0xd51   :  { %v552_v61 = vrot.slane %v3391_v60, 2 }
 0xd53   :  { %553 = vrot.lane.b32.xlu2 %v552_v61, %s3143_s3  ;;  %v3416_v61 = vadd.f32 %v3309_v11, %v3344_v10 }
 0xdad   :  { %v554_v62 = vpop.permute.xlu2 %553 }
 0xdae   :  { %2574 = vmatmul.msk.f32.vlgmr.msrb.gmra.mxu1 %vm120_vm7, %v554_v62 }
 0xe2b   :  { %v574_v63 = vpop.f32.mrf.mxu1 }
 0xe2c   :  { %v578_v0 = vrot.slane %v574_v63, 4 }
 0xe2e   :  { %v580_v5 = vadd.f32 %v578_v0, %v3374_v12 }
 0xe30   :  { %3060 = vtanh.f32 %v580_v5  ;;  %v2575_v13 = vmul.f32 -1.442695, %v580_v5 }
 0xe32   :  { %3062 = vpow2.f32 %v2575_v13 }
 0xe36   :  { %v3061_v7 = vpop.eup %3060 }
 0xe37   :  { %606 = vrot.lane.b32.xlu0 %v3061_v7, %s3142_s22 }
 0xe38   :  { %v3063_v15 = vpop.eup %3062 }
 0xe39   :  { %v584_v16 = vadd.f32 1.0, %v3063_v15 }
 0xe3b   :  { %3064 = vrcp.f32 %v584_v16  ;;  %v596_v22 = vand.u32 2147483648, %v584_v16  ;;  %vm590_vm3 = vweird.f32 %v584_v16  ;;  %v594_v23 = vand.u32 2147483647, %v584_v16 }
 0xe3d   :  { %v597_v9 = vor.u32 1.1754944e-38, %v596_v22  ;;  %vm595_vm5 = vcmp.eq.f32.partialorder %v594_v23, 8.507059e+37 }
 0xe41   :  { %v3065_v17 = vpop.eup %3064 }
 0xe42   :  { %v586_v18 = vmul.f32 %v3065_v17, %v584_v16  ;;  %vm591_vm2 = vweird.f32 %v3065_v17 }
 0xe43   :  { %vm592_vm4 = vmor %vm590_vm3, %vm591_vm2 }
 0xe44   :  { %v587_v19 = vsub.f32 1.0, %v586_v18 }
 0xe46   :  { %v588_v20 = vmul.f32 %v3065_v17, %v587_v19 }
 0xe48   :  { %v589_v21 = vadd.f32 %v3065_v17, %v588_v20 }
 0xe4a   :  { %v593_v24 = vsel %vm592_vm4, %v3065_v17, %v589_v21 }
 0xe4b   :  { %v598_v26 = vsel %vm595_vm5, %v597_v9, %v593_v24 }
 0xe4c   :  { %v604_v29 = vmul.f32 %v602_v28, %v598_v26 }
 0xea9   :  { %v607_v25 = vpop.permute.xlu0 %606 }
 0xeaa   :  { %v609_v27 = vmul.f32 %v607_v25, %v598_v26 }
 0xeac   :  { %611 = vrot.lane.b32.xlu1 %v609_v27, %s3143_s3 }
 0xf1e   :  { %v612_v30 = vpop.permute.xlu1 %611 }
 0xf1f   :  { %v614_v31 = vadd.f32 %v612_v30, %v604_v29 }
 0xf21   :  { %3066 = vtanh.f32 %v614_v31  ;;  %v676_v52 = vrot.slane %v614_v31, 6 }
 0xf27   :  { %v3067_v32 = vpop.eup %3066 }
 0xf28   :  { %617 = vrot.lane.b32.xlu2 %v3067_v32, %s3142_s22 }
 0xf82   :  { %v618_v33 = vpop.permute.xlu2 %617 }
 0xf83   :  { %v3400_v34 = vmul.f32 %v618_v33, %v598_v26 }
 0xf85   :  { %v626_v35 = vrot.slane %v3400_v34, 4 }
 0xf87   :  { %627 = vrot.lane.b32.xlu0 %v626_v35, %s3143_s3 }
 0xff9   :  { %v628_v36 = vpop.permute.xlu0 %627 }
 0xffa   :  { %2576 = vmatmul.msk.f32.vlgmr.msra.gmra.mxu2 %vm120_vm7, %v628_v36 }
0x107d   :  { %v648_v37 = vpop.f32.mrf.mxu2 }
0x107e   :  { %v652_v39 = vrot.slane %v648_v37, 2 }
0x1080   :  { %v654_v40 = vadd.f32 %v652_v39, %v3374_v12 }
0x1082   :  { %3068 = vtanh.f32 %v654_v40  ;;  %v2577_v42 = vmul.f32 -1.442695, %v654_v40 }
0x1084   :  { %3070 = vpow2.f32 %v2577_v42 }
0x1088   :  { %v3069_v41 = vpop.eup %3068 }
0x1089   :  { %680 = vrot.lane.b32.xlu1 %v3069_v41, %s3142_s22 }
0x108a   :  { %v3071_v43 = vpop.eup %3070 }
0x108b   :  { %v658_v44 = vadd.f32 1.0, %v3071_v43 }
0x108d   :  { %3072 = vrcp.f32 %v658_v44  ;;  %v670_v48 = vand.u32 2147483648, %v658_v44  ;;  %vm664_vm9 = vweird.f32 %v658_v44  ;;  %v668_v6 = vand.u32 2147483647, %v658_v44 }
0x108f   :  { %v671_v8 = vor.u32 1.1754944e-38, %v670_v48  ;;  %vm669_vm11 = vcmp.eq.f32.partialorder %v668_v6, 8.507059e+37 }
0x1093   :  { %v3073_v45 = vpop.eup %3072 }
0x1094   :  { %v660_v46 = vmul.f32 %v3073_v45, %v658_v44  ;;  %vm665_vm8 = vweird.f32 %v3073_v45 }
0x1095   :  { %vm666_vm10 = vmor %vm664_vm9, %vm665_vm8 }
0x1096   :  { %v661_v3 = vsub.f32 1.0, %v660_v46 }
0x1098   :  { %v662_v47 = vmul.f32 %v3073_v45, %v661_v3 }
0x109a   :  { %v663_v4 = vadd.f32 %v3073_v45, %v662_v47 }
0x109c   :  { %v667_v12 = vsel %vm666_vm10, %v3073_v45, %v663_v4 }
0x109d   :  { %v672_v50 = vsel %vm669_vm11, %v671_v8, %v667_v12 }
0x109e   :  { %v678_v53 = vmul.f32 %v676_v52, %v672_v50 }
0x10fb   :  { %v681_v49 = vpop.permute.xlu1 %680 }
0x10fc   :  { %v683_v51 = vmul.f32 %v681_v49, %v672_v50 }
0x10fe   :  { %685 = vrot.lane.b32.xlu2 %v683_v51, %s3143_s3 }
0x1158   :  { %v686_v54 = vpop.permute.xlu2 %685 }
0x1159   :  { %v688_v14 = vadd.f32 %v686_v54, %v678_v53 }
0x115b   :  { %3074 = vtanh.f32 %v688_v14  ;;  %v747_v9 = vrot.slane %v688_v14, 6 }
0x1161   :  { %v3075_v55 = vpop.eup %3074 }
0x1162   :  { %691 = vrot.lane.b32.xlu0 %v3075_v55, %s3142_s22 }
0x11d4   :  { %v692_v56 = vpop.permute.xlu0 %691 }
0x11d5   :  { %v3409_v57 = vmul.f32 %v692_v56, %v672_v50 }
0x11d7   :  { %v700_v58 = vrot.slane %v3409_v57, 6 }
0x11d9   :  { %701 = vrot.lane.b32.xlu1 %v700_v58, %s3143_s3 }
0x124b   :  { %v702_v59 = vpop.permute.xlu1 %701 }
0x124c   :  { %2578 = vmatmul.msk.f32.vlgmr.msra.gmra.mxu3 %vm120_vm7, %v702_v59 }
0x12cf   :  { %v722_v62 = vpop.f32.mrf.mxu3 }
0x12d0   :  { %v725_v63 = vadd.f32 %v722_v62, %v3416_v61 }
0x12d2   :  { %3076 = vtanh.f32 %v725_v63  ;;  %v2579_v5 = vmul.f32 -1.442695, %v725_v63 }
0x12d4   :  { %3078 = vpow2.f32 %v2579_v5 }
0x12d8   :  { %v3077_v0 = vpop.eup %3076 }
0x12d9   :  { %751 = vrot.lane.b32.xlu2 %v3077_v0, %s3142_s22 }
0x12da   :  { %v3079_v7 = vpop.eup %3078 }
0x12db   :  { %v729_v13 = vadd.f32 1.0, %v3079_v7 }
0x12dd   :  { %3080 = vrcp.f32 %v729_v13  ;;  %v741_v11 = vand.u32 2147483648, %v729_v13  ;;  %vm735_vm13 = vweird.f32 %v729_v13  ;;  %v739_v10 = vand.u32 2147483647, %v729_v13 }
0x12df   :  { %v742_v21 = vor.u32 1.1754944e-38, %v741_v11  ;;  %vm740_vm15 = vcmp.eq.f32.partialorder %v739_v10, 8.507059e+37 }
0x12e3   :  { %v3081_v15 = vpop.eup %3080 }
0x12e4   :  { %v731_v16 = vmul.f32 %v3081_v15, %v729_v13  ;;  %vm736_vm12 = vweird.f32 %v3081_v15 }
0x12e5   :  { %vm737_vm14 = vmor %vm735_vm13, %vm736_vm12 }
0x12e6   :  { %v732_v17 = vsub.f32 1.0, %v731_v16 }
0x12e8   :  { %v733_v18 = vmul.f32 %v3081_v15, %v732_v17 }
0x12ea   :  { %v734_v19 = vadd.f32 %v3081_v15, %v733_v18 }
0x12ec   :  { %v738_v20 = vsel %vm737_vm14, %v3081_v15, %v734_v19  ;;  %vm258_vm14 = vcmask 257026  }
0x12ed   :  { %v743_v23 = vsel %vm740_vm15, %v742_v21, %v738_v20  ;;  %vm333_vm15 = vcmask 259076  }
0x12ee   :  { %v749_v25 = vmul.f32 %v747_v9, %v743_v23 }
0x1333   :  { %v752_v22 = vpop.permute.xlu2 %751 }
0x1334   :  { %v754_v24 = vmul.f32 %v752_v22, %v743_v23 }
0x1336   :  { %756 = vrot.lane.b32.xlu0 %v754_v24, %s3143_s3 }
0x13a8   :  { %v757_v26 = vpop.permute.xlu0 %756 }
0x13a9   :  { %v759_v27 = vadd.f32 %v757_v26, %v749_v25 }
0x13ab   :  { %3082 = vtanh.f32 %v759_v27  ;;  %v818_v8 = vrot.slane %v759_v27, 6 }
0x13b1   :  { %v3083_v28 = vpop.eup %3082 }
0x13b2   :  { %762 = vrot.lane.b32.xlu1 %v3083_v28, %s3142_s22 }
0x1424   :  { %v763_v29 = vpop.permute.xlu1 %762 }
0x1425   :  { %v765_v30 = vmul.f32 %v763_v29, %v743_v23 }
0x1427   :  { %767 = vrot.lane.b32.xlu2 %v765_v30, %s3143_s3 }
0x1481   :  { %v768_v31 = vpop.permute.xlu2 %767 }
0x1482   :  { %770 = vst.msk [vmem:[#allocation2 + $0x10] sm:$0x3] %vm186_vm6, %v768_v31  ;;  %2580 = vmatmul.msk.f32.vlgmr.msra.gmra.mxu0 %vm120_vm7, %v768_v31 }
0x14ff   :  { %v790_v32 = vpop.f32.mrf.mxu0 }
0x1500   :  { %v794_v33 = vrot.slane %v790_v32, 6 }
0x1502   :  { %v796_v35 = vadd.f32 %v794_v33, %v3416_v61 }
0x1504   :  { %3084 = vtanh.f32 %v796_v35  ;;  %v2581_v37 = vmul.f32 -1.442695, %v796_v35 }
0x1506   :  { %3086 = vpow2.f32 %v2581_v37 }
0x150a   :  { %v3085_v36 = vpop.eup %3084 }
0x150b   :  { %822 = vrot.lane.b32.xlu0 %v3085_v36, %s3142_s22 }
0x150c   :  { %v3087_v39 = vpop.eup %3086 }
0x150d   :  { %v800_v40 = vadd.f32 1.0, %v3087_v39 }
0x150f   :  { %3088 = vrcp.f32 %v800_v40  ;;  %v812_v46 = vand.u32 2147483648, %v800_v40  ;;  %vm806_vm2 = vweird.f32 %v800_v40  ;;  %v810_v3 = vand.u32 2147483647, %v800_v40 }
0x1511   :  { %v813_v4 = vor.u32 1.1754944e-38, %v812_v46  ;;  %vm811_vm4 = vcmp.eq.f32.partialorder %v810_v3, 8.507059e+37 }
0x1515   :  { %v3089_v41 = vpop.eup %3088 }
0x1516   :  { %v802_v42 = vmul.f32 %v3089_v41, %v800_v40  ;;  %vm807_vm6 = vweird.f32 %v3089_v41 }
0x1517   :  { %vm808_vm3 = vmor %vm806_vm2, %vm807_vm6  ;;  %vm408_vm6 = vcmask 261126   ;;  %vm1089_vm2 = vcmask 1045504  }
0x1518   :  { %v803_v43 = vsub.f32 1.0, %v802_v42 }
0x151a   :  { %v804_v44 = vmul.f32 %v3089_v41, %v803_v43 }
0x151c   :  { %v805_v45 = vadd.f32 %v3089_v41, %v804_v44 }
0x151e   :  { %v809_v47 = vsel %vm808_vm3, %v3089_v41, %v805_v45  ;;  %vm1174_vm3 = vcmask 1043456  }
0x151f   :  { %v814_v6 = vsel %vm811_vm4, %v813_v4, %v809_v47  ;;  %vm1408_vm4 = vcmask 48128  }
0x1520   :  { %v820_v49 = vmul.f32 %v818_v8, %v814_v6 }
0x157d   :  { %v823_v48 = vpop.permute.xlu0 %822 }
0x157e   :  { %v825_v12 = vmul.f32 %v823_v48, %v814_v6 }
0x1580   :  { %827 = vrot.lane.b32.xlu1 %v825_v12, %s3143_s3 }
0x15f2   :  { %v828_v50 = vpop.permute.xlu1 %827 }
0x15f3   :  { %v830_v51 = vadd.f32 %v828_v50, %v820_v49 }
0x15f5   :  { %3090 = vtanh.f32 %v830_v51  ;;  %v892_v23 = vrot.slane %v830_v51, 6 }
0x15fb   :  { %v3091_v52 = vpop.eup %3090 }
0x15fc   :  { %833 = vrot.lane.b32.xlu2 %v3091_v52, %s3142_s22 }
0x1656   :  { %v834_v53 = vpop.permute.xlu2 %833 }
0x1657   :  { %v836_v54 = vmul.f32 %v834_v53, %v814_v6  ;;  %v1000_v53 = vld [vmem:[#allocation4 + $0x30] sm:$0x1f] }
0x1658   :  { %2586 = vmatpush.msk.msrb.mxu3 %vm86_vm0, %v1000_v53 }
0x1659   :  { %v842_v14 = vrot.slane %v836_v54, 2 }
0x165b   :  { %843 = vrot.lane.b32.xlu0 %v842_v14, %s3143_s3  ;;  %v998_v14 = vld [vmem:[#allocation4 + $0x20] sm:$0xff] }
0x165c   :  { %1030 = vmatpush.msrb.mxu3 %v998_v14 }
0x16cd   :  { %v844_v55 = vpop.permute.xlu0 %843 }
0x16ce   :  { %2582 = vmatmul.msk.f32.vlgmr.msra.gmra.mxu1 %vm120_vm7, %v844_v55  ;;  %v999_v55 = vld [vmem:[#allocation4 + $0x28] sm:$0xff] }
0x174b   :  { %v864_v56 = vpop.f32.mrf.mxu1 }
0x174c   :  { %v868_v58 = vrot.slane %v864_v56, 4  ;;  %v996_v56 = vld [vmem:[#allocation4 + $0x10] sm:$0xff] }
0x174d   :  { %1031 = vmatpush.msrb.mxu3 %v996_v56 }
0x174e   :  { %v870_v59 = vadd.f32 %v868_v58, %v3416_v61  ;;  %v997_v58 = vld [vmem:[#allocation4 + $0x18] sm:$0xff] }
0x1750   :  { %3092 = vtanh.f32 %v870_v59  ;;  %v2583_v63 = vmul.f32 -1.442695, %v870_v59  ;;  %v994_v59 = vld [vmem:[#allocation4] sm:$0xff] }
0x1751   :  { %1032 = vmatpush.msrb.mxu3 %v994_v59 }
0x1752   :  { %3094 = vpow2.f32 %v2583_v63  ;;  %v1085_v63 = vld [vmem:[#allocation4 + $0x60] sm:$0xff] }
0x1756   :  { %v3093_v62 = vpop.eup %3092 }
0x1757   :  { %896 = vrot.lane.b32.xlu1 %v3093_v62, %s3142_s22  ;;  %v995_v62 = vld [vmem:[#allocation4 + $0x8] sm:$0xff] }
0x1758   :  { %v3095_v0 = vpop.eup %3094 }
0x1759   :  { %v874_v5 = vadd.f32 1.0, %v3095_v0  ;;  %v1086_v0 = vld [vmem:[#allocation4 + $0x68] sm:$0xff] }
0x175b   :  { %3096 = vrcp.f32 %v874_v5  ;;  %v886_v18 = vand.u32 2147483648, %v874_v5  ;;  %vm880_vm8 = vweird.f32 %v874_v5  ;;  %v884_v19 = vand.u32 2147483647, %v874_v5 }
0x175d   :  { %v887_v10 = vor.u32 1.1754944e-38, %v886_v18  ;;  %vm885_vm10 = vcmp.eq.f32.partialorder %v884_v19, 8.507059e+37 }
0x1761   :  { %v3097_v7 = vpop.eup %3096 }
0x1762   :  { %v876_v13 = vmul.f32 %v3097_v7, %v874_v5  ;;  %vm881_vm5 = vweird.f32 %v3097_v7  ;;  %v1083_v5 = vld [vmem:[#allocation4 + $0x50] sm:$0xff] }
0x1763   :  { %vm882_vm9 = vmor %vm880_vm8, %vm881_vm5  ;;  %vm1411_vm5 = vcmask 97280   ;;  %vm1414_vm8 = vcmask 146432  }
0x1764   :  { %v877_v15 = vsub.f32 1.0, %v876_v13  ;;  %v1081_v13 = vld [vmem:[#allocation4 + $0x40] sm:$0xff] }
0x1766   :  { %v878_v16 = vmul.f32 %v3097_v7, %v877_v15  ;;  %v1082_v15 = vld [vmem:[#allocation4 + $0x48] sm:$0xff] }
0x1768   :  { %v879_v17 = vadd.f32 %v3097_v7, %v878_v16  ;;  %v1173_v16 = vld [vmem:[#allocation4 + $0xb8] sm:$0x1f] }
0x176a   :  { %v883_v11 = vsel %vm882_vm9, %v3097_v7, %v879_v17  ;;  %v1084_v7 = vld [vmem:[#allocation4 + $0x58] sm:$0xff]  ;;  %v1171_v17 = vld [vmem:[#allocation4 + $0xa8] sm:$0xff]  ;;  %vm1417_vm9 = vcmask 195584  }
0x176b   :  { %v888_v21 = vsel %vm885_vm10, %v887_v10, %v883_v11  ;;  %vm1420_vm10 = vcmask 244736  }
0x176c   :  { %v894_v24 = vmul.f32 %v892_v23, %v888_v21 }
0x17c9   :  { %v897_v20 = vpop.permute.xlu1 %896 }
0x17ca   :  { %v899_v22 = vmul.f32 %v897_v20, %v888_v21 }
0x17cc   :  { %901 = vrot.lane.b32.xlu2 %v899_v22, %s3143_s3 }
0x1826   :  { %v902_v9 = vpop.permute.xlu2 %901 }
0x1827   :  { %v904_v25 = vadd.f32 %v902_v9, %v894_v24 }
0x1829   :  { %3098 = vtanh.f32 %v904_v25  ;;  %v966_v12 = vrot.slane %v904_v25, 6 }
0x182f   :  { %v3099_v26 = vpop.eup %3098 }
0x1830   :  { %907 = vrot.lane.b32.xlu0 %v3099_v26, %s3142_s22 }
0x18a2   :  { %v908_v27 = vpop.permute.xlu0 %907 }
0x18a3   :  { %v910_v28 = vmul.f32 %v908_v27, %v888_v21  ;;  %v1169_v27 = vld [vmem:[#allocation4 + $0x98] sm:$0xff] }
0x18a5   :  { %v916_v29 = vrot.slane %v910_v28, 4 }
0x18a7   :  { %917 = vrot.lane.b32.xlu1 %v916_v29, %s3143_s3  ;;  %v1167_v29 = vld [vmem:[#allocation4 + $0x88] sm:$0xff] }
0x1919   :  { %v918_v30 = vpop.permute.xlu1 %917 }
0x191a   :  { %2584 = vmatmul.msk.f32.vlgmr.msrb.gmra.mxu2 %vm120_vm7, %v918_v30  ;;  %v1170_v30 = vld [vmem:[#allocation4 + $0xa0] sm:$0xff] }
0x199d   :  { %v938_v31 = vpop.f32.mrf.mxu2 }
0x199e   :  { %v942_v32 = vrot.slane %v938_v31, 2  ;;  %v1168_v31 = vld [vmem:[#allocation4 + $0x90] sm:$0xff] }
0x19a0   :  { %v944_v33 = vadd.f32 %v942_v32, %v3416_v61  ;;  %v1166_v32 = vld [vmem:[#allocation4 + $0x80] sm:$0xff] }
0x19a2   :  { %3100 = vtanh.f32 %v944_v33  ;;  %v2585_v36 = vmul.f32 -1.442695, %v944_v33 }
0x19a4   :  { %3102 = vpow2.f32 %v2585_v36 }
0x19a8   :  { %v3101_v35 = vpop.eup %3100 }
0x19a9   :  { %970 = vrot.lane.b32.xlu2 %v3101_v35, %s3142_s22 }
0x19aa   :  { %v3103_v37 = vpop.eup %3102 }
0x19ab   :  { %v948_v39 = vadd.f32 1.0, %v3103_v37 }
0x19ad   :  { %3104 = vrcp.f32 %v948_v39  ;;  %v960_v44 = vand.u32 2147483648, %v948_v39  ;;  %vm954_vm11 = vweird.f32 %v948_v39  ;;  %v958_v45 = vand.u32 2147483647, %v948_v39 }
0x19af   :  { %v961_v46 = vor.u32 1.1754944e-38, %v960_v44  ;;  %vm959_vm13 = vcmp.eq.f32.partialorder %v958_v45, 8.507059e+37 }
0x19b1   :  { %255 = vrot.lane.b32.xlu2 %v3337_v2, %s3143_s3 }
0x19b3   :  { %v3105_v40 = vpop.eup %3104 }
0x19b4   :  { %v950_v41 = vmul.f32 %v3105_v40, %v948_v39  ;;  %vm955_vm7 = vweird.f32 %v3105_v40 }
0x19b5   :  { %vm956_vm12 = vmor %vm954_vm11, %vm955_vm7  ;;  %vm1423_vm7 = vcmask 293888   ;;  %vm1426_vm11 = vcmask 343040  }
0x19b6   :  { %v951_v61 = vsub.f32 1.0, %v950_v41 }
0x19b8   :  { %v952_v42 = vmul.f32 %v3105_v40, %v951_v61 }
0x19b9   :  { %548 = vrot.lane.b32.xlu2 %v3391_v60, %s3143_s3 }
0x19ba   :  { %v953_v43 = vadd.f32 %v3105_v40, %v952_v42 }
0x19bc   :  { %v957_v2 = vsel %vm956_vm12, %v3105_v40, %v953_v43  ;;  %v993_v43 = vld [vmem:[%s4210_s5] sm:$0x3]  ;;  %s3144_s5 = smov 122   ;;  %vm1429_vm12 = vcmask 392192  }
0x19bd   :  { %v3444_v3 = vsel %vm959_vm13, %v961_v46, %v957_v2  ;;  %v1071_v2 = vperm.slane %v993_v43, 1  ;;  %vm1432_vm13 = vcmask 441344  }
0x19be   :  { %v968_v8 = vmul.f32 %v966_v12, %v3444_v3 }
0x19c1   :  { %838 = vrot.lane.b32.xlu2 %v836_v54, %s3143_s3  ;;  %v1001_v54 = vld [vmem:[#allocation4 + $0x38] sm:$0x1f] }
0x19c2   :  { %2590 = vmatpush.msk.msrb.mxu0 %vm86_vm0, %v1001_v54 }
0x19c4   :  { %1056 = vmatpush.msrb.mxu0 %v999_v55 }
0x19c6   :  { %1057 = vmatpush.msrb.mxu0 %v997_v58 }
0x19c8   :  { %1058 = vmatpush.msrb.mxu0 %v995_v62 }
0x19ca   :  { %2606 = vmatpush.msk.msra.mxu0 %vm86_vm0, %v1173_v16 }
0x19cc   :  { %1231 = vmatpush.msra.mxu0 %v1171_v17 }
0x19ce   :  { %1232 = vmatpush.msra.mxu0 %v1169_v27 }
0x19d0   :  { %1233 = vmatpush.msra.mxu0 %v1167_v29 }
0x1a03   :  { %v971_v60 = vpop.permute.xlu2 %970 }
0x1a04   :  { %v973_v47 = vmul.f32 %v971_v60, %v3444_v3 }
0x1a06   :  { %975 = vrot.lane.b32.xlu0 %v973_v47, %s3143_s3 }
0x1a0b   :  { %v256_v4 = vpop.permute.xlu2 %255 }
0x1a0c   :  { %259 = vst.msk [vmem:[#allocation2] sm:$0xc] %vm258_vm14, %v256_v4  ;;  %v1070_v4 = vperm.slane %v993_v43, 0 }
0x1a0e   :  { %330 = vrot.lane.b32.xlu0 %v3350_v38, %s3143_s3 }
0x1a13   :  { %v549_v48 = vpop.permute.xlu2 %548 }
0x1a14   :  { %551 = vst.msk [vmem:[#allocation2 + $0x8] sm:$0xc] %vm258_vm14, %v549_v48 }
0x1a16   :  { %622 = vrot.lane.b32.xlu0 %v3400_v34, %s3143_s3 }
0x1a1b   :  { %v839_v6 = vpop.permute.xlu2 %838 }
0x1a1c   :  { %841 = vst.msk [vmem:[#allocation2 + $0x10] sm:$0xc] %vm258_vm14, %v839_v6  ;;  %vm1435_vm14 = vcmask 490496  }
0x1a1e   :  { %912 = vrot.lane.b32.xlu0 %v910_v28, %s3143_s3  ;;  %v1172_v28 = vld [vmem:[#allocation4 + $0xb0] sm:$0x1f] }
0x1a1f   :  { %2602 = vmatpush.msk.msra.mxu3 %vm86_vm0, %v1172_v28 }
0x1a21   :  { %1205 = vmatpush.msra.mxu3 %v1170_v30 }
0x1a23   :  { %1206 = vmatpush.msra.mxu3 %v1168_v31 }
0x1a25   :  { %1207 = vmatpush.msra.mxu3 %v1166_v32 }
0x1a78   :  { %v976_v49 = vpop.permute.xlu0 %975 }
0x1a79   :  { %v978_v50 = vadd.f32 %v976_v49, %v968_v8 }
0x1a7b   :  { %3106 = vtanh.f32 %v978_v50 }
0x1a80   :  { %v331_v51 = vpop.permute.xlu0 %330 }
0x1a81   :  { %v3107_v52 = vpop.eup %3106  ;;  %334 = vst.msk [vmem:[#allocation2] sm:$0x30] %vm333_vm15, %v331_v51 }
0x1a82   :  { %981 = vrot.lane.b32.xlu1 %v3107_v52, %s3142_s22 }
0x1a88   :  { %v623_v38 = vpop.permute.xlu0 %622 }
0x1a89   :  { %625 = vst.msk [vmem:[#allocation2 + $0x8] sm:$0x30] %vm333_vm15, %v623_v38 }
0x1a8a   :  { %405 = vrot.lane.b32.xlu1 %v3363_v1, %s3143_s3  ;;  %v1087_v1 = vld [vmem:[#allocation4 + $0x70] sm:$0x1f] }
0x1a8b   :  { %2594 = vmatpush.msk.msrb.mxu1 %vm86_vm0, %v1087_v1 }
0x1a8d   :  { %1120 = vmatpush.msrb.mxu1 %v1085_v63 }
0x1a8f   :  { %1121 = vmatpush.msrb.mxu1 %v1083_v5 }
0x1a90   :  { %v913_v34 = vpop.permute.xlu0 %912 }
0x1a91   :  { %915 = vst.msk [vmem:[#allocation2 + $0x10] sm:$0x30] %vm333_vm15, %v913_v34  ;;  %1122 = vmatpush.msrb.mxu1 %v1081_v13  ;;  %vm1438_vm15 = vcmask 539648  }
0x1a92   :  { %696 = vrot.lane.b32.xlu1 %v3409_v57, %s3143_s3  ;;  %v1088_v57 = vld [vmem:[#allocation4 + $0x78] sm:$0x1f] }
0x1a93   :  { %2598 = vmatpush.msk.msra.mxu2 %vm86_vm0, %v1088_v57  ;;  %vm1296_vm0 = vcmask 1041408  }
0x1a95   :  { %1146 = vmatpush.msra.mxu2 %v1086_v0 }
0x1a97   :  { %1147 = vmatpush.msra.mxu2 %v1084_v7 }
0x1a99   :  { %1148 = vmatpush.msra.mxu2 %v1082_v15 }
0x1af4   :  { %v982_v18 = vpop.permute.xlu1 %981 }
0x1af5   :  { %v984_v19 = vmul.f32 %v982_v18, %v3444_v3 }
0x1af7   :  { %986 = vrot.lane.b32.xlu1 %v984_v19, %s3143_s3 }
0x1afc   :  { %v406_v11 = vpop.permute.xlu1 %405 }
0x1afd   :  { %409 = vst.msk [vmem:[#allocation2] sm:$0xc0] %vm408_vm6, %v406_v11 }
0x1b04   :  { %v697_v10 = vpop.permute.xlu1 %696  ;;  %v990_v20 = vld [vmem:[#allocation2] sm:$0xff] }
0x1b05   :  { %699 = vst.msk [vmem:[#allocation2 + $0x8] sm:$0xc0] %vm408_vm6, %v697_v10  ;;  %2587 = vmatmul.msk.f32.vlgmr.msrb.gmra.mxu3 %vm76_vm1, %v990_v20  ;;  %2591 = vmatmul.msk.f32.vlgmr.msrb.gmra.mxu0 %vm76_vm1, %v990_v20  ;;  %v1090_v22 = vrot.slane %v990_v20, 2  ;;  %v1175_v23 = vrot.slane %v990_v20, 4 }
0x1b0c   :  { %v991_v21 = vld [vmem:[#allocation2 + $0x8] sm:$0xff] }
0x1b0d   :  { %2588 = vmatmul.msk.f32.gmra.mxu3 %vm76_vm1, %v991_v21  ;;  %v1091_v24 = vrot.slane %v991_v21, 2  ;;  %v1176_v9 = vrot.slane %v991_v21, 4  ;;  %2592 = vmatmul.msk.f32.gmra.mxu0 %vm76_vm1, %v991_v21 }
0x1b0f   :  { %v1092_v25 = vsel %vm1089_vm2, %v1090_v22, %v1091_v24  ;;  %v1177_v26 = vsel %vm1174_vm3, %v1175_v23, %v1176_v9 }
0x1b10   :  { %2595 = vmatmul.msk.f32.vlgmr.msrb.gmra.mxu1 %vm76_vm1, %v1092_v25  ;;  %2599 = vmatmul.msk.f32.vlgmr.msra.gmra.mxu2 %vm76_vm1, %v1092_v25 }
0x1b69   :  { %v987_v33 = vpop.permute.xlu1 %986 }
0x1b6a   :  { %989 = vst.msk [vmem:[#allocation2 + $0x10] sm:$0xc0] %vm408_vm6, %v987_v33  ;;  %vm1441_vm6 = vcmask 588800  }
0x1b71   :  { %v992_v35 = vld [vmem:[#allocation2 + $0x10] sm:$0xff] }
0x1b72   :  { %2589 = vmatmul.msk.f32.gmra.mxu3 %vm76_vm1, %v992_v35  ;;  %2593 = vmatmul.msk.f32.gmra.mxu0 %vm76_vm1, %v992_v35  ;;  %v1093_v36 = vrot.slane %v992_v35, 2  ;;  %v1178_v39 = vrot.slane %v992_v35, 4 }
0x1b74   :  { %v1094_v37 = vsel %vm1089_vm2, %v1091_v24, %v1093_v36  ;;  %v1179_v40 = vsel %vm1174_vm3, %v1176_v9, %v1178_v39 }
0x1b75   :  { %2596 = vmatmul.msk.f32.gmra.mxu1 %vm76_vm1, %v1094_v37  ;;  %2600 = vmatmul.msk.f32.gmra.mxu2 %vm76_vm1, %v1094_v37 }
0x1b7a   :  { %2603 = vmatmul.msk.f32.vlgmr.msra.gmra.mxu3 %vm76_vm1, %v1177_v26  ;;  %2607 = vmatmul.msk.f32.vlgmr.msra.gmra.mxu0 %vm76_vm1, %v1177_v26 }
0x1b7d   :  { %2597 = vmatmul.msk.f32.gmra.mxu1 %vm76_vm1, %v1093_v36  ;;  %2601 = vmatmul.msk.f32.gmra.mxu2 %vm76_vm1, %v1093_v36 }
0x1b82   :  { %2604 = vmatmul.msk.f32.gmra.mxu3 %vm76_vm1, %v1179_v40  ;;  %2608 = vmatmul.msk.f32.gmra.mxu0 %vm76_vm1, %v1179_v40  ;;  %v1060_v41 = vpop.f32.mrf.mxu0 }
0x1b83   :  { %v1075_v60 = vadd.f32 %v1071_v2, %v1060_v41 }
0x1b88   :  { %v1034_v61 = vpop.f32.mrf.mxu3 }
0x1b89   :  { %v1074_v50 = vadd.f32 %v1070_v4, %v1034_v61 }
0x1b8a   :  { %2605 = vmatmul.msk.f32.gmra.mxu3 %vm76_vm1, %v1178_v39  ;;  %2609 = vmatmul.msk.f32.gmra.mxu0 %vm76_vm1, %v1178_v39  ;;  %v1063_v42 = vpop.f32.mrf.mxu0  ;;  %vm1319_vm1 = vcmask 998400  }
0x1b8b   :  { %v1077_v51 = vadd.f32 %v1071_v2, %v1063_v42 }
0x1b8d   :  { %v1124_v48 = vpop.f32.mrf.mxu1 }
0x1b8e   :  { %v1159_v52 = vadd.f32 %v1124_v48, %v1074_v50  ;;  %v1463_v50 = vld [vmem:[%s4211_s6 + $0x90] sm:$0x3f] }
0x1b8f   :  { %2610 = vmatpush.msk.msra.mxu1 %vm1089_vm2, %v1463_v50  ;;  %v2647_v50 = vld [vmem:[%s4211_s6 + $0x188] sm:$0xff] }
0x1b90   :  { %v1037_v44 = vpop.f32.mrf.mxu3 }
0x1b91   :  { %v1076_v59 = vadd.f32 %v1070_v4, %v1037_v44 }
0x1b93   :  { %v1150_v46 = vpop.f32.mrf.mxu2 }
0x1b94   :  { %v1160_v47 = vadd.f32 %v1150_v46, %v1075_v60 }
0x1bef   :  { %v1066_v45 = vpop.f32.mrf.mxu0 }
0x1bf0   :  { %v1079_v63 = vadd.f32 %v1071_v2, %v1066_v45 }
0x1bf2   :  { %v1127_v54 = vpop.f32.mrf.mxu1 }
0x1bf3   :  { %v1161_v0 = vadd.f32 %v1127_v54, %v1076_v59  ;;  %v1464_v54 = vld [vmem:[%s4211_s6 + $0x98] sm:$0x3f]  ;;  %v1449_v59 = vld [vmem:[%s4211_s6 + $0x20] sm:$0xff] }
0x1bf4   :  { %2612 = vmatpush.msk.msrb.mxu2 %vm1089_vm2, %v1464_v54 }
0x1bf5   :  { %v1040_v3 = vpop.f32.mrf.mxu3 }
0x1bf6   :  { %v1078_v24 = vadd.f32 %v1070_v4, %v1040_v3 }
0x1bf7   :  { %v1235_v6 = vpop.f32.mrf.mxu0 }
0x1bf8   :  { %v1245_v12 = vadd.f32 %v1235_v6, %v1160_v47  ;;  %v1153_v8 = vpop.f32.mrf.mxu2 }
0x1bf9   :  { %v1162_v53 = vadd.f32 %v1153_v8, %v1077_v51  ;;  %v1461_v51 = vld [vmem:[%s4211_s6 + $0x80] sm:$0xff] }
0x1bfa   :  { %v1251_v49 = vmax.f32 %v1245_v12, 0.0  ;;  %v1130_v22 = vpop.f32.mrf.mxu1  ;;  %1482 = vmatpush.msra.mxu1 %v1461_v51 }
0x1bfb   :  { %v1163_v29 = vadd.f32 %v1130_v22, %v1078_v24  ;;  %v2620_v22 = vld [vmem:[%s4211_s6 + $0xd0] sm:$0xff] }
0x1bfc   :  { %v1259_v38 = vrot.slane %v1251_v49, 2 }
0x1bfd   :  { %v1209_v34 = vpop.f32.mrf.mxu3 }
0x1bfe   :  { %v1244_v14 = vadd.f32 %v1209_v34, %v1159_v52  ;;  %v1263_v58 = vmax.f32 %v1251_v49, %v1259_v38  ;;  %v1459_v52 = vld [vmem:[%s4211_s6 + $0x70] sm:$0xff]  ;;  %v1457_v38 = vld [vmem:[%s4211_s6 + $0x60] sm:$0xff] }
0x1bff   :  { %v1238_v55 = vpop.f32.mrf.mxu0  ;;  %1483 = vmatpush.msra.mxu1 %v1459_v52  ;;  %v1455_v34 = vld [vmem:[%s4211_s6 + $0x50] sm:$0xff] }
0x1c00   :  { %v1247_v56 = vadd.f32 %v1238_v55, %v1162_v53  ;;  %v1250_v1 = vmax.f32 %v1244_v14, 0.0  ;;  %v1156_v57 = vpop.f32.mrf.mxu2  ;;  %v1283_v7 = vrot.slane %v1263_v58, 2  ;;  %v1453_v53 = vld [vmem:[%s4211_s6 + $0x40] sm:$0xff]  ;;  %v1451_v14 = vld [vmem:[%s4211_s6 + $0x30] sm:$0xff]  ;;  %v1462_v55 = vld [vmem:[%s4211_s6 + $0x88] sm:$0xff] }
0x1c01   :  { %v1164_v16 = vadd.f32 %v1156_v57, %v1079_v63  ;;  %1484 = vmatpush.msra.mxu1 %v1457_v38  ;;  %1502 = vmatpush.msrb.mxu2 %v1462_v55  ;;  %v1447_v57 = vld [vmem:[%s4211_s6 + $0x10] sm:$0xff]  ;;  %v1458_v63 = vld [vmem:[%s4211_s6 + $0x68] sm:$0xff] }
0x1c02   :  { %v1253_v62 = vmax.f32 %v1247_v56, 0.0  ;;  %v1258_v18 = vrot.slane %v1250_v1, 2  ;;  %v1298_v23 = vsel %vm1296_vm0, %v1263_v58, %v1283_v7  ;;  %v2632_v56 = vld [vmem:[%s4211_s6 + $0x130] sm:$0x3f]  ;;  %v1456_v7 = vld [vmem:[%s4211_s6 + $0x58] sm:$0xff] }
0x1c03   :  { %1485 = vmatpush.msra.mxu1 %v1455_v34  ;;  %2634 = vmatpush.msk.msrb.mxu3 %vm1089_vm2, %v2632_v56  ;;  %v2644_v38 = vld [vmem:[%s4211_s6 + $0x170] sm:$0xff]  ;;  %v2645_v34 = vld [vmem:[%s4211_s6 + $0x178] sm:$0xff]  ;;  %v2642_v56 = vld [vmem:[%s4211_s6 + $0x160] sm:$0xff] }
0x1c04   :  { %v1267_v5 = vrot.slane %v1253_v62, 2  ;;  %v1262_v27 = vmax.f32 %v1250_v1, %v1258_v18  ;;  %v2630_v1 = vld [vmem:[%s4211_s6 + $0x120] sm:$0xff]  ;;  %v2631_v18 = vld [vmem:[%s4211_s6 + $0x128] sm:$0xff] }
0x1c05   :  { %v1212_v13 = vpop.f32.mrf.mxu3  ;;  %1486 = vmatpush.msra.mxu1 %v1453_v53  ;;  %1559 = vmatpush.msrb.mxu3 %v2630_v1  ;;  %v2641_v1 = vld [vmem:[%s4211_s6 + $0x158] sm:$0xff] }
0x1c06   :  { %v1271_v15 = vmax.f32 %v1253_v62, %v1267_v5  ;;  %v1246_v17 = vadd.f32 %v1212_v13, %v1161_v0  ;;  %v1282_v36 = vrot.slane %v1262_v27, 2  ;;  %v1460_v62 = vld [vmem:[%s4211_s6 + $0x78] sm:$0xff]  ;;  %v2628_v0 = vld [vmem:[%s4211_s6 + $0x110] sm:$0xff]  ;;  %v1445_v5 = vld [vmem:[%s4211_s6] sm:$0xff] }
0x1c07   :  { %v1241_v19 = vpop.f32.mrf.mxu0  ;;  %1487 = vmatpush.msra.mxu1 %v1451_v14  ;;  %1503 = vmatpush.msrb.mxu2 %v1460_v62  ;;  %v2626_v13 = vld [vmem:[%s4211_s6 + $0x100] sm:$0xff]  ;;  %v2640_v62 = vld [vmem:[%s4211_s6 + $0x150] sm:$0xff] }
0x1c08   :  { %v1289_v11 = vrot.slane %v1271_v15, 4  ;;  %v1293_v10 = vrot.slane %v1271_v15, 6  ;;  %v1252_v20 = vmax.f32 %v1246_v17, 0.0  ;;  %v1249_v21 = vadd.f32 %v1241_v19, %v1164_v16  ;;  %1560 = vmatpush.msrb.mxu3 %v2628_v0  ;;  %v2633_v15 = vld [vmem:[%s4211_s6 + $0x138] sm:$0x3f]  ;;  %v1454_v16 = vld [vmem:[%s4211_s6 + $0x48] sm:$0xff] }
0x1c09   :  { %v1297_v61 = vsel %vm1296_vm0, %v1262_v27, %v1282_v36  ;;  %1488 = vmatpush.msra.mxu1 %v1449_v59  ;;  %1504 = vmatpush.msrb.mxu2 %v1458_v63  ;;  %v2624_v17 = vld [vmem:[%s4211_s6 + $0xf0] sm:$0xff]  ;;  %v1452_v19 = vld [vmem:[%s4211_s6 + $0x38] sm:$0xff]  ;;  %v2639_v0 = vld [vmem:[%s4211_s6 + $0x148] sm:$0xff] }
0x1c0a   :  { %v1266_v9 = vrot.slane %v1252_v20, 2  ;;  %v1255_v25 = vmax.f32 %v1249_v21, 0.0  ;;  %v1300_v26 = vsel %vm1174_vm3, %v1298_v23, %v1289_v11  ;;  %1561 = vmatpush.msrb.mxu3 %v2626_v13  ;;  %v2622_v11 = vld [vmem:[%s4211_s6 + $0xe0] sm:$0xff]  ;;  %v1450_v21 = vld [vmem:[%s4211_s6 + $0x28] sm:$0xff]  ;;  %v2625_v27 = vld [vmem:[%s4211_s6 + $0xf8] sm:$0xff] }
0x1c0b   :  { %v1302_v28 = vsel %vm1089_vm2, %v1300_v26, %v1293_v10  ;;  %1489 = vmatpush.msra.mxu1 %v1447_v57  ;;  %1505 = vmatpush.msrb.mxu2 %v1456_v7  ;;  %v2627_v23 = vld [vmem:[%s4211_s6 + $0x108] sm:$0xff]  ;;  %v2618_v26 = vld [vmem:[%s4211_s6 + $0xc0] sm:$0xff] }
0x1c0c   :  { %v1270_v30 = vmax.f32 %v1252_v20, %v1266_v9  ;;  %v1275_v31 = vrot.slane %v1255_v25, 2  ;;  %1315 = vrot.lane.b32.xlu1 %v1302_v28, %s3144_s5  ;;  %1562 = vmatpush.msrb.mxu3 %v2624_v17  ;;  %v2629_v20 = vld [vmem:[%s4211_s6 + $0x118] sm:$0xff]  ;;  %v2638_v57 = vld [vmem:[%s4211_s6 + $0x140] sm:$0xff] }
0x1c0d   :  { %v1215_v32 = vpop.f32.mrf.mxu3  ;;  %1490 = vmatpush.msra.mxu1 %v1445_v5  ;;  %1506 = vmatpush.msrb.mxu2 %v1454_v16 }
0x1c0e   :  { %v1279_v33 = vmax.f32 %v1255_v25, %v1275_v31  ;;  %v1248_v35 = vadd.f32 %v1215_v32, %v1163_v29  ;;  %v1288_v37 = vrot.slane %v1270_v30, 4  ;;  %v1292_v41 = vrot.slane %v1270_v30, 6  ;;  %1563 = vmatpush.msrb.mxu3 %v2622_v11  ;;  %v1448_v25 = vld [vmem:[%s4211_s6 + $0x18] sm:$0xff]  ;;  %v2616_v29 = vld [vmem:[%s4211_s6 + $0xb0] sm:$0xff]  ;;  %v2623_v30 = vld [vmem:[%s4211_s6 + $0xe8] sm:$0xff] }
0x1c0f   :  { %2636 = vmatpush.msk.msrb.mxu1 %vm1089_vm2, %v2633_v15  ;;  %1507 = vmatpush.msrb.mxu2 %v1452_v19  ;;  %v2614_v31 = vld [vmem:[%s4211_s6 + $0xa0] sm:$0xff]  ;;  %v2621_v32 = vld [vmem:[%s4211_s6 + $0xd8] sm:$0xff] }
0x1c10   :  { %v1254_v39 = vmax.f32 %v1248_v35, 0.0  ;;  %1317 = vrot.lane.b32.xlu2 %v1279_v33, %s3144_s5  ;;  %v1299_v43 = vsel %vm1174_vm3, %v1297_v61, %v1288_v37  ;;  %1564 = vmatpush.msrb.mxu3 %v2620_v22  ;;  %v2619_v35 = vld [vmem:[%s4211_s6 + $0xc8] sm:$0xff]  ;;  %v2657_v61 = vld [vmem:[%s4211_s6 + $0x1d8] sm:$0x3f] }
0x1c11   :  { %v1301_v44 = vsel %vm1089_vm2, %v1299_v43, %v1292_v41  ;;  %1579 = vmatpush.msrb.mxu1 %v2631_v18  ;;  %1508 = vmatpush.msrb.mxu2 %v1450_v21  ;;  %v2615_v41 = vld [vmem:[%s4211_s6 + $0xa8] sm:$0xff] }
0x1c12   :  { %v1274_v40 = vrot.slane %v1254_v39, 2  ;;  %1565 = vmatpush.msrb.mxu3 %v2618_v26  ;;  %2660 = vmatpush.msk.msrb.mxu0 %vm1089_vm2, %v2657_v61  ;;  %v2655_v43 = vld [vmem:[%s4211_s6 + $0x1c8] sm:$0xff] }
0x1c13   :  { %1580 = vmatpush.msrb.mxu1 %v2629_v20  ;;  %1509 = vmatpush.msrb.mxu2 %v1448_v25 }
0x1c14   :  { %v1278_v42 = vmax.f32 %v1254_v39, %v1274_v40  ;;  %1566 = vmatpush.msrb.mxu3 %v2616_v29  ;;  %v2617_v39 = vld [vmem:[%s4211_s6 + $0xb8] sm:$0xff]  ;;  %v2656_v40 = vld [vmem:[%s4211_s6 + $0x1d0] sm:$0x3f]  ;;  %1654 = vmatpush.msrb.mxu0 %v2655_v43 }
0x1c15   :  { %1581 = vmatpush.msrb.mxu1 %v2627_v23 }
0x1c16   :  { %1307 = vrot.lane.b32.xlu0 %v1278_v42, %s3144_s5  ;;  %1567 = vmatpush.msrb.mxu3 %v2614_v31 }
0x1c17   :  { %1582 = vmatpush.msrb.mxu1 %v2625_v27 }
0x1c18   :  { %1305 = vrot.lane.b32.xlu2 %v1301_v44, %s3144_s5 }
0x1c19   :  { %1583 = vmatpush.msrb.mxu1 %v2623_v30 }
0x1c1b   :  { %1584 = vmatpush.msrb.mxu1 %v2621_v32 }
0x1c1d   :  { %1585 = vmatpush.msrb.mxu1 %v2619_v35 }
0x1c1f   :  { %1586 = vmatpush.msrb.mxu1 %v2617_v39 }
0x1c21   :  { %1587 = vmatpush.msrb.mxu1 %v2615_v41 }
0x1c6a   :  { %v1318_v45 = vpop.permute.xlu2 %1317 }
0x1c6b   :  { %v1329_v12 = vmax.f32 %v1279_v33, %v1318_v45 }
0x1c72   :  { %v1306_v2 = vpop.permute.xlu2 %1305 }
0x1c73   :  { %v3505_v46 = vmax.f32 %v1301_v44, %v1306_v2 }
0x1c75   :  { %1344 = vrot.lane.b32.xlu2 %v3505_v46, %s3145_s26 }
0x1c7d   :  { %1368 = vrot.lane.b32.xlu2 %v3505_v46, %s3146_s27 }
0x1c7e   :  { %v1316_v60 = vpop.permute.xlu1 %1315 }
0x1c7f   :  { %v1328_v3 = vmax.f32 %v1302_v28, %v1316_v60  ;;  %v1320_v47 = vsel %vm1319_vm1, %v1306_v2, %v1316_v60  ;;  %v1446_v28 = vld [vmem:[%s4211_s6 + $0x8] sm:$0xff] }
0x1c80   :  { %v1324_v4 = vmax.f32 %v1301_v44, %v1320_v47  ;;  %1510 = vmatpush.msrb.mxu2 %v1446_v28  ;;  %v2652_v44 = vld [vmem:[%s4211_s6 + $0x1b0] sm:$0xff] }
0x1c81   :  { %1396 = vrot.lane.b32.xlu1 %v1328_v3, %s3147_s28  ;;  %1402 = vrot.lane.b32.xlu0 %v1328_v3, %s3148_s29 }
0x1c82   :  { %2658 = vmatpush.msk.msra.mxu2 %vm1089_vm2, %v2656_v40  ;;  %vm1465_vm2 = vcmask 637952  }
0x1c85   :  { %1388 = vrot.lane.b32.xlu2 %v1324_v4, %s3149_s30 }
0x1c88   :  { %v1308_v48 = vpop.permute.xlu0 %1307 }
0x1c89   :  { %1338 = vrot.lane.b32.xlu1 %v3505_v46, %s3150_s15  ;;  %1332 = vrot.lane.b32.xlu0 %v3505_v46, %s3144_s5  ;;  %v3517_v6 = vmax.f32 %v1278_v42, %v1308_v48  ;;  %v1321_v8 = vsel %vm1319_vm1, %v1308_v48, %v1318_v45  ;;  %v2653_v45 = vld [vmem:[%s4211_s6 + $0x1b8] sm:$0xff]  ;;  %v2650_v48 = vld [vmem:[%s4211_s6 + $0x1a0] sm:$0xff]  ;;  %vm1687_vm1 = vcmask 900096  }
0x1c8a   :  { %v1325_v49 = vmax.f32 %v1278_v42, %v1321_v8  ;;  %v2654_v42 = vld [vmem:[%s4211_s6 + $0x1c0] sm:$0xff]  ;;  %1655 = vmatpush.msrb.mxu0 %v2653_v45  ;;  %v2649_v8 = vld [vmem:[%s4211_s6 + $0x198] sm:$0xff] }
0x1c8b   :  { %1634 = vmatpush.msra.mxu2 %v2654_v42  ;;  %v1444_v42 = vld [vmem:[%s4212_s7] sm:$0x3] }
0x1c8c   :  { %v1517_v43 = vperm.slane %v1444_v42, 1 }
0x1c8d   :  { %1334 = vrot.lane.b32.xlu2 %v3517_v6, %s3144_s5  ;;  %1635 = vmatpush.msra.mxu2 %v2652_v44 }
0x1c8f   :  { %1636 = vmatpush.msra.mxu2 %v2650_v48 }
0x1c91   :  { %1356 = vrot.lane.b32.xlu1 %v3505_v46, %s3151_s16  ;;  %1350 = vrot.lane.b32.xlu0 %v3505_v46, %s3152_s17 }
0x1c95   :  { %1352 = vrot.lane.b32.xlu2 %v3517_v6, %s3152_s17 }
0x1c99   :  { %1374 = vrot.lane.b32.xlu1 %v3505_v46, %s3153_s18  ;;  %1362 = vrot.lane.b32.xlu0 %v3505_v46, %s3154_s19 }
0x1c9d   :  { %1370 = vrot.lane.b32.xlu2 %v3517_v6, %s3146_s27 }
0x1ca1   :  { %1380 = vrot.lane.b32.xlu0 %v3505_v46, %s3155_s20  ;;  %1340 = vrot.lane.b32.xlu1 %v3517_v6, %s3150_s15 }
0x1ca5   :  { %1382 = vrot.lane.b32.xlu2 %v3517_v6, %s3155_s20 }
0x1ca9   :  { %1346 = vrot.lane.b32.xlu0 %v3517_v6, %s3145_s26  ;;  %1358 = vrot.lane.b32.xlu1 %v3517_v6, %s3151_s16 }
0x1cad   :  { %1404 = vrot.lane.b32.xlu2 %v1329_v12, %s3148_s29 }
0x1cb1   :  { %1364 = vrot.lane.b32.xlu0 %v3517_v6, %s3154_s19  ;;  %1376 = vrot.lane.b32.xlu1 %v3517_v6, %s3153_s18 }
0x1cb9   :  { %1398 = vrot.lane.b32.xlu1 %v1329_v12, %s3147_s28  ;;  %1390 = vrot.lane.b32.xlu0 %v1325_v49, %s3149_s30  ;;  %v2651_v12 = vld [vmem:[%s4211_s6 + $0x1a8] sm:$0xff]  ;;  %v2646_v49 = vld [vmem:[%s4211_s6 + $0x180] sm:$0xff] }
0x1cba   :  { %1656 = vmatpush.msrb.mxu0 %v2651_v12 }
0x1cbc   :  { %1657 = vmatpush.msrb.mxu0 %v2649_v8 }
0x1cbe   :  { %1658 = vmatpush.msrb.mxu0 %v2647_v50 }
0x1cc0   :  { %1659 = vmatpush.msrb.mxu0 %v2645_v34 }
0x1ccf   :  { %v3575_v58 = vpop.permute.xlu2 %1344 }
0x1cd7   :  { %v3624_v10 = vpop.permute.xlu2 %1368 }
0x1cdf   :  { %v3666_v33 = vpop.permute.xlu2 %1388 }
0x1ce7   :  { %v3699_v47 = vpop.permute.xlu2 %1334 }
0x1cef   :  { %v1353_v59 = vpop.permute.xlu2 %1352 }
0x1cf3   :  { %v3638_v24 = vpop.permute.xlu1 %1396  ;;  %v3640_v9 = vpop.permute.xlu0 %1402 }
0x1cf7   :  { %v1371_v19 = vpop.permute.xlu2 %1370 }
0x1cfb   :  { %v1339_v36 = vpop.permute.xlu1 %1338  ;;  %v1333_v37 = vpop.permute.xlu0 %1332 }
0x1cfc   :  { %v1409_v2 = vsel %vm1408_vm4, %v3505_v46, %v1333_v37  ;;  %v2648_v46 = vld [vmem:[%s4211_s6 + $0x190] sm:$0xff] }
0x1cfd   :  { %v1412_v4 = vsel %vm1411_vm5, %v1409_v2, %v1339_v36  ;;  %1637 = vmatpush.msra.mxu2 %v2648_v46 }
0x1cfe   :  { %v1415_v51 = vsel %vm1414_vm8, %v1412_v4, %v3575_v58  ;;  %v2643_v58 = vld [vmem:[%s4211_s6 + $0x168] sm:$0xff] }
0x1cff   :  { %1638 = vmatpush.msra.mxu2 %v2646_v49  ;;  %1660 = vmatpush.msrb.mxu0 %v2643_v58 }
0x1d01   :  { %1639 = vmatpush.msra.mxu2 %v2644_v38  ;;  %1661 = vmatpush.msrb.mxu0 %v2641_v1  ;;  %v1753_v1 = vld [vmem:[%s4213_s8 + $0x148] sm:$0xff] }
0x1d03   :  { %v1357_v60 = vpop.permute.xlu1 %1356  ;;  %v1351_v3 = vpop.permute.xlu0 %1350  ;;  %1640 = vmatpush.msra.mxu2 %v2642_v56  ;;  %1662 = vmatpush.msrb.mxu0 %v2639_v0 }
0x1d04   :  { %v1418_v52 = vsel %vm1417_vm9, %v1415_v51, %v1351_v3 }
0x1d05   :  { %v1421_v14 = vsel %vm1420_vm10, %v1418_v52, %v1357_v60  ;;  %1641 = vmatpush.msra.mxu2 %v2640_v62  ;;  %v1516_v60 = vperm.slane %v1444_v42, 0 }
0x1d07   :  { %1642 = vmatpush.msra.mxu2 %v2638_v57  ;;  %v1748_v57 = vld [vmem:[%s4213_s8 + $0x120] sm:$0xff] }
0x1d0b   :  { %v1375_v53 = vpop.permute.xlu1 %1374  ;;  %v1363_v54 = vpop.permute.xlu0 %1362 }
0x1d0c   :  { %v1424_v55 = vsel %vm1423_vm7, %v1421_v14, %v1363_v54  ;;  %v1756_v54 = vld [vmem:[%s4213_s8 + $0x160] sm:$0x11]  ;;  %v1757_v14 = vld [vmem:[%s4213_s8 + $0x168] sm:$0x11] }
0x1d0d   :  { %v1427_v63 = vsel %vm1426_vm11, %v1424_v55, %v3624_v10  ;;  %v1410_v10 = vsel %vm1408_vm4, %v3517_v6, %v3699_v47  ;;  %v1752_v55 = vld [vmem:[%s4213_s8 + $0x140] sm:$0xff]  ;;  %v1848_v56 = vunpack.c.l.bf16 %v1756_v54  ;;  %v1849_v58 = vunpack.c.h.bf16 %v1756_v54 }
0x1d0e   :  { %v1430_v7 = vsel %vm1429_vm12, %v1427_v63, %v1375_v53  ;;  %v1851_v62 = vunpack.c.h.bf16 %v1757_v14  ;;  %v1749_v63 = vld [vmem:[%s4213_s8 + $0x128] sm:$0xff]  ;;  %v1840_v0 = vunpack.c.l.bf16 %v1752_v55  ;;  %vm2324_vm4 = vcmask 850944  }
0x1d0f   :  { %2662 = vmatpush.msk.msra.mxu3 %vm1296_vm0, %v1848_v56  ;;  %v1717_v56 = vld [vmem:[%s4213_s8 + $0x28] sm:$0xff] }
0x1d10   :  { %2668 = vmatpush.msk.msra.mxu0 %vm1296_vm0, %v1851_v62 }
0x1d11   :  { %1907 = vmatpush.msra.mxu3 %v1840_v0  ;;  %v1758_v0 = vld [vmem:[%s4213_s8 + $0x170] sm:$0x11] }
0x1d13   :  { %v1341_v5 = vpop.permute.xlu1 %1340  ;;  %v1381_v13 = vpop.permute.xlu0 %1380 }
0x1d14   :  { %v1433_v15 = vsel %vm1432_vm13, %v1430_v7, %v1381_v13  ;;  %v1413_v22 = vsel %vm1411_vm5, %v1410_v10, %v1341_v5  ;;  %v1841_v5 = vunpack.c.h.bf16 %v1752_v55  ;;  %v1842_v7 = vunpack.c.l.bf16 %v1753_v1  ;;  %v1740_v10 = vld [vmem:[%s4213_s8 + $0xe0] sm:$0xff] }
0x1d15   :  { %v1436_v16 = vsel %vm1435_vm14, %v1433_v15, %v3666_v33  ;;  %v1843_v13 = vunpack.c.h.bf16 %v1753_v1  ;;  %v1744_v15 = vld [vmem:[%s4213_s8 + $0x100] sm:$0xff]  ;;  %v1770_v1 = vunpack.c.l.bf16 %v1717_v56 }
0x1d16   :  { %v1439_v17 = vsel %vm1438_vm15, %v1436_v16, %v3638_v24  ;;  %v1832_v16 = vunpack.c.l.bf16 %v1748_v57  ;;  %v1716_v55 = vld [vmem:[%s4213_s8 + $0x20] sm:$0xff] }
0x1d17   :  { %v1442_v18 = vsel %vm1441_vm6, %v1439_v17, %v3640_v9  ;;  %v1383_v9 = vpop.permute.xlu2 %1382  ;;  %v1833_v17 = vunpack.c.h.bf16 %v1748_v57  ;;  %1967 = vmatpush.msra.mxu0 %v1843_v13  ;;  %v1769_v62 = vunpack.c.h.bf16 %v1716_v55  ;;  %v1771_v57 = vunpack.c.h.bf16 %v1717_v56 }
0x1d18   :  { %2611 = vmatmul.msk.f32.vlgmr.msra.gmra.mxu1 %vm1465_vm2, %v1442_v18  ;;  %v1543_v11 = vrot.slane %v1442_v18, 2  ;;  %2613 = vmatmul.msk.f32.vlgmr.msrb.gmra.mxu2 %vm1465_vm2, %v1442_v18  ;;  %v1616_v39 = vrot.slane %v1442_v18, 4  ;;  %v1745_v18 = vld [vmem:[%s4213_s8 + $0x108] sm:$0xff] }
0x1d19   :  { %2664 = vmatpush.msk.msra.mxu1 %vm1296_vm0, %v1849_v58  ;;  %1908 = vmatpush.msra.mxu3 %v1832_v16  ;;  %v1712_v58 = vld [vmem:[%s4213_s8] sm:$0xff] }
0x1d1a   :  { %2635 = vmatmul.msk.f32.vlgmr.msrb.gmra.mxu3 %vm1465_vm2, %v1543_v11  ;;  %v1761_v13 = vunpack.c.h.bf16 %v1712_v58 }
0x1d1b   :  { %v1359_v20 = vpop.permute.xlu1 %1358  ;;  %v1347_v21 = vpop.permute.xlu0 %1346  ;;  %1927 = vmatpush.msra.mxu1 %v1841_v5  ;;  %v1759_v5 = vld [vmem:[%s4213_s8 + $0x178] sm:$0x11] }
0x1d1c   :  { %v1416_v23 = vsel %vm1414_vm8, %v1413_v22, %v1347_v21  ;;  %v1825_v21 = vunpack.c.h.bf16 %v1744_v15  ;;  %v1741_v22 = vld [vmem:[%s4213_s8 + $0xe8] sm:$0xff] }
0x1d1d   :  { %v1419_v24 = vsel %vm1417_vm9, %v1416_v23, %v1353_v59  ;;  %v1850_v59 = vunpack.c.l.bf16 %v1757_v14  ;;  %v1826_v23 = vunpack.c.l.bf16 %v1745_v18  ;;  %1928 = vmatpush.msra.mxu1 %v1833_v17  ;;  %v1754_v17 = vld [vmem:[%s4213_s8 + $0x150] sm:$0xff] }
0x1d1e   :  { %v1422_v26 = vsel %vm1420_vm10, %v1419_v24, %v1359_v20  ;;  %v1824_v20 = vunpack.c.l.bf16 %v1744_v15  ;;  %v1827_v24 = vunpack.c.h.bf16 %v1745_v18  ;;  %v1852_v18 = vunpack.c.l.bf16 %v1758_v0 }
0x1d1f   :  { %v1405_v35 = vpop.permute.xlu2 %1404  ;;  %2666 = vmatpush.msk.msrb.mxu2 %vm1296_vm0, %v1850_v59  ;;  %1929 = vmatpush.msra.mxu1 %v1825_v21  ;;  %v1768_v59 = vunpack.c.l.bf16 %v1716_v55  ;;  %v1750_v21 = vld [vmem:[%s4213_s8 + $0x130] sm:$0xff]  ;;  %vm2552_vm10 = vcmask 1024  }
0x1d20   :  { %2637 = vmatmul.msk.f32.vlgmr.msrb.gmra.mxu1 %vm1465_vm2, %v1543_v11  ;;  %v1835_v11 = vunpack.c.h.bf16 %v1749_v63  ;;  %1909 = vmatpush.msra.mxu3 %v1824_v20  ;;  %v1855_v20 = vunpack.c.h.bf16 %v1759_v5 }
0x1d21   :  { %1947 = vmatpush.msrb.mxu2 %v1842_v7  ;;  %v1760_v7 = vunpack.c.l.bf16 %v1712_v58 }
0x1d22   :  { %1968 = vmatpush.msra.mxu0 %v1835_v11  ;;  %v1755_v11 = vld [vmem:[%s4213_s8 + $0x158] sm:$0xff] }
0x1d23   :  { %v1377_v25 = vpop.permute.xlu1 %1376  ;;  %v1365_v27 = vpop.permute.xlu0 %1364 }
0x1d24   :  { %v1425_v28 = vsel %vm1423_vm7, %v1422_v26, %v1365_v27  ;;  %v1817_v26 = vunpack.c.h.bf16 %v1740_v10  ;;  %v1737_v27 = vld [vmem:[%s4213_s8 + $0xc8] sm:$0xff]  ;;  %1969 = vmatpush.msra.mxu0 %v1827_v24  ;;  %v1751_v24 = vld [vmem:[%s4213_s8 + $0x138] sm:$0xff] }
0x1d25   :  { %v1428_v29 = vsel %vm1426_vm11, %v1425_v28, %v1371_v19  ;;  %v1834_v19 = vunpack.c.l.bf16 %v1749_v63  ;;  %v1818_v28 = vunpack.c.l.bf16 %v1741_v22  ;;  %v1713_v63 = vld [vmem:[%s4213_s8 + $0x8] sm:$0xff] }
0x1d26   :  { %v1431_v6 = vsel %vm1429_vm12, %v1428_v29, %v1377_v25  ;;  %v1816_v25 = vunpack.c.l.bf16 %v1740_v10  ;;  %v1819_v29 = vunpack.c.h.bf16 %v1741_v22  ;;  %1930 = vmatpush.msra.mxu1 %v1817_v26  ;;  %v1762_v15 = vunpack.c.l.bf16 %v1713_v63  ;;  %v1746_v26 = vld [vmem:[%s4213_s8 + $0x110] sm:$0xff] }
0x1d27   :  { %v1434_v31 = vsel %vm1432_vm13, %v1431_v6, %v1383_v9  ;;  %v1736_v9 = vld [vmem:[%s4213_s8 + $0xc0] sm:$0xff]  ;;  %1948 = vmatpush.msrb.mxu2 %v1834_v19  ;;  %v1763_v16 = vunpack.c.h.bf16 %v1713_v63  ;;  %v1853_v19 = vunpack.c.h.bf16 %v1758_v0  ;;  %v1854_v10 = vunpack.c.l.bf16 %v1759_v5 }
0x1d28   :  { %v1808_v6 = vunpack.c.l.bf16 %v1736_v9  ;;  %1910 = vmatpush.msra.mxu3 %v1816_v25  ;;  %1970 = vmatpush.msra.mxu0 %v1819_v29  ;;  %v1844_v22 = vunpack.c.l.bf16 %v1754_v17  ;;  %v1847_v25 = vunpack.c.h.bf16 %v1755_v11  ;;  %v1747_v29 = vld [vmem:[%s4213_s8 + $0x118] sm:$0xff] }
0x1d29   :  { %1949 = vmatpush.msrb.mxu2 %v1826_v23  ;;  %v1845_v23 = vunpack.c.h.bf16 %v1754_v17  ;;  %v1715_v17 = vld [vmem:[%s4213_s8 + $0x18] sm:$0xff] }
0x1d2a   :  { %1911 = vmatpush.msra.mxu3 %v1808_v6  ;;  %v1838_v6 = vunpack.c.l.bf16 %v1751_v24 }
0x1d2b   :  { %v1399_v30 = vpop.permute.xlu1 %1398  ;;  %v1391_v32 = vpop.permute.xlu0 %1390  ;;  %1950 = vmatpush.msrb.mxu2 %v1818_v28  ;;  %v1837_v28 = vunpack.c.h.bf16 %v1750_v21 }
0x1d2c   :  { %v1437_v33 = vsel %vm1435_vm14, %v1434_v31, %v1391_v32  ;;  %v1810_v31 = vunpack.c.l.bf16 %v1737_v27  ;;  %v1811_v32 = vunpack.c.h.bf16 %v1737_v27  ;;  %v1836_v27 = vunpack.c.l.bf16 %v1750_v21 }
0x1d2d   :  { %v1440_v36 = vsel %vm1438_vm15, %v1437_v33, %v1399_v30  ;;  %v1809_v30 = vunpack.c.h.bf16 %v1736_v9  ;;  %v1846_v9 = vunpack.c.l.bf16 %v1755_v11  ;;  %v1767_v21 = vunpack.c.h.bf16 %v1715_v17 }
0x1d2e   :  { %v1443_v37 = vsel %vm1441_vm6, %v1440_v36, %v1405_v35  ;;  %1951 = vmatpush.msrb.mxu2 %v1810_v31  ;;  %1971 = vmatpush.msra.mxu0 %v1811_v32  ;;  %v1742_v31 = vld [vmem:[%s4213_s8 + $0xf0] sm:$0xff]  ;;  %v1828_v32 = vunpack.c.l.bf16 %v1746_v26 }
0x1d2f   :  { %v1617_v40 = vrot.slane %v1443_v37, 4  ;;  %1931 = vmatpush.msra.mxu1 %v1809_v30  ;;  %v1839_v30 = vunpack.c.h.bf16 %v1751_v24  ;;  %v2936_v24 = vld [vmem:[%s4215_s10 + $0x38] sm:$0xff]  }
0x1d31   :  { %v1618_v41 = vsel %vm1174_vm3, %v1616_v39, %v1617_v40 }
0x1d32   :  { %2659 = vmatmul.msk.f32.vlgmr.msra.gmra.mxu2 %vm1465_vm2, %v1618_v41  ;;  %2661 = vmatmul.msk.f32.vlgmr.msrb.gmra.mxu0 %vm1465_vm2, %v1618_v41  ;;  %v1732_v41 = vld [vmem:[%s4213_s8 + $0xa0] sm:$0xff] }
0x1d33   :  { %v1800_v42 = vunpack.c.l.bf16 %v1732_v41 }
0x1d35   :  { %1912 = vmatpush.msra.mxu3 %v1800_v42  ;;  %v1739_v42 = vld [vmem:[%s4213_s8 + $0xd8] sm:$0xff] }
0x1d95   :  { %v1492_v61 = vpop.f32.mrf.mxu1 }
0x1d96   :  { %v1520_v12 = vadd.f32 %v1516_v60, %v1492_v61  ;;  %v1733_v61 = vld [vmem:[%s4213_s8 + $0xa8] sm:$0xff] }
0x1d97   :  { %v1729_v60 = vld [vmem:[%s4213_s8 + $0x88] sm:$0xff] }
0x1d9b   :  { %v1512_v44 = vpop.f32.mrf.mxu2 }
0x1d9c   :  { %v1521_v45 = vadd.f32 %v1517_v43, %v1512_v44  ;;  %v1801_v43 = vunpack.c.h.bf16 %v1732_v41  ;;  %v1802_v44 = vunpack.c.l.bf16 %v1733_v61  ;;  %v1820_v41 = vunpack.c.l.bf16 %v1742_v31 }
0x1d9d   :  { %v1589_v2 = vpop.f32.mrf.mxu1  ;;  %v1569_v48 = vpop.f32.mrf.mxu3 }
0x1d9e   :  { %v1593_v3 = vadd.f32 %v1589_v2, %v1521_v45  ;;  %v1592_v8 = vadd.f32 %v1569_v48, %v1520_v12  ;;  %v1803_v45 = vunpack.c.h.bf16 %v1733_v61  ;;  %v1728_v2 = vld [vmem:[%s4213_s8 + $0x80] sm:$0xff]  ;;  %v1794_v48 = vunpack.c.l.bf16 %v1729_v60  ;;  %1932 = vmatpush.msra.mxu1 %v1801_v43  ;;  %1952 = vmatpush.msrb.mxu2 %v1802_v44 }
0x1d9f   :  { %v1795_v12 = vunpack.c.h.bf16 %v1729_v60  ;;  %v1821_v61 = vunpack.c.h.bf16 %v1742_v31  ;;  %v1814_v60 = vunpack.c.l.bf16 %v1739_v42 }
0x1da0   :  { %1972 = vmatpush.msra.mxu0 %v1803_v45  ;;  %1953 = vmatpush.msrb.mxu2 %v1794_v48 }
0x1da2   :  { %1973 = vmatpush.msra.mxu0 %v1795_v12 }
0x1daf   :  { %v1664_v47 = vpop.f32.mrf.mxu0 }
0x1db0   :  { %v1668_v4 = vadd.f32 %v1664_v47, %v1593_v3  ;;  %v1724_v3 = vld [vmem:[%s4213_s8 + $0x60] sm:$0xff]  ;;  %v1792_v47 = vunpack.c.l.bf16 %v1728_v2 }
0x1db2   :  { %v1670_v46 = vmax.f32 %v1668_v4, 0.0  ;;  %v1793_v4 = vunpack.c.h.bf16 %v1728_v2  ;;  %1913 = vmatpush.msra.mxu3 %v1792_v47  ;;  %v1734_v47 = vld [vmem:[%s4213_s8 + $0xb0] sm:$0xff] }
0x1db3   :  { %v1804_v48 = vunpack.c.l.bf16 %v1734_v47  ;;  %v1805_v12 = vunpack.c.h.bf16 %v1734_v47  ;;  %v2942_v47 = vld [vmem:[%s4215_s10 + $0x68] sm:$0xff]  }
0x1db4   :  { %v1674_v49 = vrot.slane %v1670_v46, 2  ;;  %1933 = vmatpush.msra.mxu1 %v1793_v4  ;;  %v1735_v4 = vld [vmem:[%s4213_s8 + $0xb8] sm:$0xff] }
0x1db5   :  { %v1644_v50 = vpop.f32.mrf.mxu2 }
0x1db6   :  { %v3783_v51 = vmax.f32 %v1670_v46, %v1674_v49  ;;  %v1667_v52 = vadd.f32 %v1644_v50, %v1592_v8  ;;  %v1725_v46 = vld [vmem:[%s4213_s8 + $0x68] sm:$0xff]  ;;  %v1720_v8 = vld [vmem:[%s4213_s8 + $0x40] sm:$0xff]  ;;  %v1784_v49 = vunpack.c.l.bf16 %v1724_v3  ;;  %v1785_v50 = vunpack.c.h.bf16 %v1724_v3 }
0x1db7   :  { %v1815_v3 = vunpack.c.h.bf16 %v1739_v42  ;;  %v2959_v42 = vld [vmem:[%s4215_s10 + $0xf0] sm:$0xff]  }
0x1db8   :  { %v1669_v38 = vmax.f32 %v1667_v52, 0.0  ;;  %1685 = vrot.lane.b32.xlu1 %v3783_v51, %s3145_s26  ;;  %v1786_v52 = vunpack.c.l.bf16 %v1725_v46  ;;  %1914 = vmatpush.msra.mxu3 %v1784_v49  ;;  %v1730_v49 = vld [vmem:[%s4213_s8 + $0x90] sm:$0xff] }
0x1db9   :  { %1934 = vmatpush.msra.mxu1 %v1785_v50  ;;  %v1731_v50 = vld [vmem:[%s4213_s8 + $0x98] sm:$0xff] }
0x1dba   :  { %v1673_v34 = vrot.slane %v1669_v38, 2  ;;  %1954 = vmatpush.msrb.mxu2 %v1786_v52  ;;  %v1797_v52 = vunpack.c.h.bf16 %v1730_v49 }
0x1dbc   :  { %v3787_v53 = vmax.f32 %v1669_v38, %v1673_v34  ;;  %v1787_v38 = vunpack.c.h.bf16 %v1725_v46  ;;  %v1776_v34 = vunpack.c.l.bf16 %v1720_v8  ;;  %v1806_v46 = vunpack.c.l.bf16 %v1735_v4 }
0x1dbe   :  { %1680 = vrot.lane.b32.xlu0 %v3787_v53, %s3145_s26  ;;  %1974 = vmatpush.msra.mxu0 %v1787_v38  ;;  %v1798_v38 = vunpack.c.l.bf16 %v1731_v50 }
0x1dbf   :  { %1915 = vmatpush.msra.mxu3 %v1776_v34  ;;  %v1799_v34 = vunpack.c.h.bf16 %v1731_v50  ;;  %v2804_v50 = vunpack.c.l.bf16 %v2959_v42 }
0x1dc1   :  { %1916 = vmatpush.msra.mxu3 %v1768_v59  ;;  %v1722_v59 = vld [vmem:[%s4213_s8 + $0x50] sm:$0xff] }
0x1dc2   :  { %v1781_v63 = vunpack.c.h.bf16 %v1722_v59 }
0x1dc3   :  { %1917 = vmatpush.msra.mxu3 %v1760_v7  ;;  %v1719_v7 = vld [vmem:[%s4213_s8 + $0x38] sm:$0xff] }
0x1dc5   :  { %2670 = vmatpush.msk.msrb.mxu3 %vm1296_vm0, %v1852_v18  ;;  %v1774_v18 = vunpack.c.l.bf16 %v1719_v7 }
0x1dc7   :  { %1987 = vmatpush.msrb.mxu3 %v1844_v22 }
0x1dc9   :  { %1988 = vmatpush.msrb.mxu3 %v1836_v27  ;;  %v2960_v27 = vld [vmem:[%s4215_s10 + $0xf8] sm:$0xff]  }
0x1dcb   :  { %1989 = vmatpush.msrb.mxu3 %v1828_v32  ;;  %v2713_v32 = vunpack.c.h.bf16 %v2936_v24 }
0x1dcd   :  { %1990 = vmatpush.msrb.mxu3 %v1820_v41  ;;  %v2712_v41 = vunpack.c.l.bf16 %v2936_v24 }
0x1e2a   :  { %v1686_v33 = vpop.permute.xlu1 %1685 }
0x1e2b   :  { %v1692_v40 = vmax.f32 %v3783_v51, %v1686_v33  ;;  %v1721_v51 = vld [vmem:[%s4213_s8 + $0x48] sm:$0xff] }
0x1e2c   :  { %v1778_v54 = vunpack.c.l.bf16 %v1721_v51  ;;  %v1779_v14 = vunpack.c.h.bf16 %v1721_v51  ;;  %v1796_v51 = vunpack.c.l.bf16 %v1730_v49 }
0x1e2e   :  { %1955 = vmatpush.msrb.mxu2 %v1778_v54  ;;  %1975 = vmatpush.msra.mxu0 %v1779_v14  ;;  %v1727_v54 = vld [vmem:[%s4213_s8 + $0x78] sm:$0xff] }
0x1e2f   :  { %v1790_v56 = vunpack.c.l.bf16 %v1727_v54  ;;  %v1791_v58 = vunpack.c.h.bf16 %v1727_v54  ;;  %v2933_v54 = vld [vmem:[%s4215_s10 + $0x20] sm:$0xff]  }
0x1e30   :  { %v1681_v35 = vpop.permute.xlu0 %1680  ;;  %1956 = vmatpush.msrb.mxu2 %v1770_v1  ;;  %1976 = vmatpush.msra.mxu0 %v1771_v57  ;;  %v1718_v1 = vld [vmem:[%s4213_s8 + $0x30] sm:$0xff]  ;;  %v1780_v57 = vunpack.c.l.bf16 %v1722_v59 }
0x1e31   :  { %v3832_v36 = vmax.f32 %v3787_v53, %v1681_v35  ;;  %v1688_v37 = vsel %vm1687_vm1, %v1681_v35, %v1686_v33  ;;  %v1829_v33 = vunpack.c.h.bf16 %v1746_v26  ;;  %v1743_v35 = vld [vmem:[%s4213_s8 + $0xf8] sm:$0xff] }
0x1e32   :  { %v1690_v39 = vmax.f32 %v3787_v53, %v1688_v37  ;;  %v1777_v53 = vunpack.c.h.bf16 %v1720_v8  ;;  %1957 = vmatpush.msrb.mxu2 %v1762_v15  ;;  %1977 = vmatpush.msra.mxu0 %v1763_v16  ;;  %v1830_v37 = vunpack.c.l.bf16 %v1747_v29  ;;  %v1822_v43 = vunpack.c.l.bf16 %v1743_v35  ;;  %v2952_v26 = vld [vmem:[%s4215_s10 + $0xb8] sm:$0xff]  }
0x1e33   :  { %1697 = vrot.lane.b32.xlu0 %v3832_v36, %s3154_s19  ;;  %1694 = vrot.lane.b32.xlu2 %v3832_v36, %s3145_s26  ;;  %v1823_v44 = vunpack.c.h.bf16 %v1743_v35  ;;  %v1807_v8 = vunpack.c.h.bf16 %v1735_v4  ;;  %v1772_v15 = vunpack.c.l.bf16 %v1718_v1  ;;  %v1773_v16 = vunpack.c.h.bf16 %v1718_v1  ;;  %v2934_v4 = vld [vmem:[%s4215_s10 + $0x28] sm:$0xff]  }
0x1e34   :  { %1701 = vrot.lane.b32.xlu1 %v1690_v39, %s3155_s20  ;;  %1935 = vmatpush.msra.mxu1 %v1777_v53  ;;  %v1831_v39 = vunpack.c.h.bf16 %v1747_v29  ;;  %v1726_v53 = vld [vmem:[%s4213_s8 + $0x70] sm:$0xff]  ;;  %v2777_v35 = vunpack.c.h.bf16 %v2952_v26 }
0x1e35   :  { %2674 = vmatpush.msk.msra.mxu2 %vm1296_vm0, %v1854_v10  ;;  %2676 = vmatpush.msk.msrb.mxu0 %vm1296_vm0, %v1855_v20  ;;  %v1788_v14 = vunpack.c.l.bf16 %v1726_v53  ;;  %v1789_v55 = vunpack.c.h.bf16 %v1726_v53  ;;  %v1766_v20 = vunpack.c.l.bf16 %v1715_v17  ;;  %v2956_v17 = vld [vmem:[%s4215_s10 + $0xd8] sm:$0xff]  }
0x1e36   :  { %1936 = vmatpush.msra.mxu1 %v1769_v62  ;;  %v1723_v62 = vld [vmem:[%s4213_s8 + $0x58] sm:$0xff] }
0x1e37   :  { %2027 = vmatpush.msra.mxu2 %v1846_v9  ;;  %2047 = vmatpush.msrb.mxu0 %v1847_v25  ;;  %v1782_v0 = vunpack.c.l.bf16 %v1723_v62  ;;  %v1783_v5 = vunpack.c.h.bf16 %v1723_v62 }
0x1e38   :  { %1937 = vmatpush.msra.mxu1 %v1761_v13  ;;  %v1714_v13 = vld [vmem:[%s4213_s8 + $0x10] sm:$0xff] }
0x1e39   :  { %2028 = vmatpush.msra.mxu2 %v1838_v6  ;;  %2048 = vmatpush.msrb.mxu0 %v1839_v30  ;;  %v1764_v11 = vunpack.c.l.bf16 %v1714_v13  ;;  %v1765_v10 = vunpack.c.h.bf16 %v1714_v13 }
0x1e3a   :  { %2672 = vmatpush.msk.msrb.mxu1 %vm1296_vm0, %v1853_v19  ;;  %v1775_v19 = vunpack.c.h.bf16 %v1719_v7  ;;  %vm1874_vm0 = vcmask 736256   ;;  %v2932_v7 = vld [vmem:[%s4215_s10 + $0x18] sm:$0xff]  }
0x1e3b   :  { %1705 = vrot.lane.b32.xlu2 %v1692_v40, %s3148_s29  ;;  %v1738_v40 = vld [vmem:[%s4213_s8 + $0xd0] sm:$0xff]  ;;  %2029 = vmatpush.msra.mxu2 %v1830_v37  ;;  %v2809_v37 = vunpack.c.h.bf16 %v2960_v27 }
0x1e3c   :  { %2007 = vmatpush.msrb.mxu1 %v1845_v23  ;;  %v1812_v45 = vunpack.c.l.bf16 %v1738_v40  ;;  %v1813_v2 = vunpack.c.h.bf16 %v1738_v40  ;;  %2049 = vmatpush.msrb.mxu0 %v1831_v39  ;;  %v2944_v23 = vld [vmem:[%s4215_s10 + $0x78] sm:$0xff]   ;;  %v2935_v39 = vld [vmem:[%s4215_s10 + $0x30] sm:$0xff]  }
0x1e3d   :  { %2030 = vmatpush.msra.mxu2 %v1822_v43  ;;  %v2745_v31 = vunpack.c.h.bf16 %v2944_v23  ;;  %v2744_v40 = vunpack.c.l.bf16 %v2944_v23  ;;  %v2776_v43 = vunpack.c.l.bf16 %v2952_v26  ;;  %v2931_v23 = vld [vmem:[%s4215_s10 + $0x10] sm:$0xff]  }
0x1e3e   :  { %2008 = vmatpush.msrb.mxu1 %v1837_v28  ;;  %2050 = vmatpush.msrb.mxu0 %v1823_v44  ;;  %v2808_v44 = vunpack.c.l.bf16 %v2960_v27  ;;  %v2955_v26 = vld [vmem:[%s4215_s10 + $0xd0] sm:$0xff]  }
0x1e3f   :  { %1991 = vmatpush.msrb.mxu3 %v1812_v45  ;;  %2031 = vmatpush.msra.mxu2 %v1814_v60 }
0x1e40   :  { %2009 = vmatpush.msrb.mxu1 %v1829_v33  ;;  %2051 = vmatpush.msrb.mxu0 %v1815_v3  ;;  %v2943_v33 = vld [vmem:[%s4215_s10 + $0x70] sm:$0xff]   ;;  %v2805_v3 = vunpack.c.h.bf16 %v2959_v42 }
0x1e41   :  { %1992 = vmatpush.msrb.mxu3 %v1804_v48  ;;  %2032 = vmatpush.msra.mxu2 %v1806_v46  ;;  %v2741_v45 = vunpack.c.h.bf16 %v2943_v33  ;;  %v2740_v48 = vunpack.c.l.bf16 %v2943_v33  ;;  %v2950_v46 = vld [vmem:[%s4215_s10 + $0xa8] sm:$0xff]  }
0x1e42   :  { %2010 = vmatpush.msrb.mxu1 %v1821_v61  ;;  %2052 = vmatpush.msrb.mxu0 %v1807_v8  ;;  %v2951_v61 = vld [vmem:[%s4215_s10 + $0xb0] sm:$0xff]   ;;  %v2958_v8 = vld [vmem:[%s4215_s10 + $0xe8] sm:$0xff]   ;;  %v2768_v59 = vunpack.c.l.bf16 %v2950_v46 }
0x1e43   :  { %1993 = vmatpush.msrb.mxu3 %v1796_v51  ;;  %2033 = vmatpush.msra.mxu2 %v1798_v38  ;;  %v2773_v60 = vunpack.c.h.bf16 %v2951_v61  ;;  %v2772_v49 = vunpack.c.l.bf16 %v2951_v61  ;;  %v2737_v51 = vunpack.c.h.bf16 %v2942_v47  ;;  %v2941_v38 = vld [vmem:[%s4215_s10 + $0x60] sm:$0xff]   ;;  %v2801_v53 = vunpack.c.h.bf16 %v2958_v8 }
0x1e44   :  { %2011 = vmatpush.msrb.mxu1 %v1813_v2  ;;  %2053 = vmatpush.msrb.mxu0 %v1799_v34  ;;  %v2709_v2 = vunpack.c.h.bf16 %v2935_v39  ;;  %v2769_v34 = vunpack.c.h.bf16 %v2950_v46  ;;  %v2800_v62 = vunpack.c.l.bf16 %v2958_v8  ;;  %v2733_v1 = vunpack.c.h.bf16 %v2941_v38  ;;  %v2976_v8 = vld [vmem:[%s4215_s10 + $0x178] sm:$0xff]  }
0x1e45   :  { %1994 = vmatpush.msrb.mxu3 %v1788_v14  ;;  %2034 = vmatpush.msra.mxu2 %v1790_v56  ;;  %v2736_v14 = vunpack.c.l.bf16 %v2942_v47  ;;  %v2949_v56 = vld [vmem:[%s4215_s10 + $0xa0] sm:$0xff]   ;;  %v2732_v13 = vunpack.c.l.bf16 %v2941_v38 }
0x1e46   :  { %2012 = vmatpush.msrb.mxu1 %v1805_v12  ;;  %2054 = vmatpush.msrb.mxu0 %v1791_v58  ;;  %v2708_v12 = vunpack.c.l.bf16 %v2935_v39  ;;  %v2957_v58 = vld [vmem:[%s4215_s10 + $0xe0] sm:$0xff]   ;;  %v2954_v39 = vld [vmem:[%s4215_s10 + $0xc8] sm:$0xff]  }
0x1e47   :  { %1995 = vmatpush.msrb.mxu3 %v1780_v57  ;;  %2035 = vmatpush.msra.mxu2 %v1782_v0  ;;  %v2701_v57 = vunpack.c.h.bf16 %v2933_v54  ;;  %v2765_v0 = vunpack.c.h.bf16 %v2949_v56  ;;  %v2945_v47 = vld [vmem:[%s4215_s10 + $0x80] sm:$0xff]  }
0x1e48   :  { %2013 = vmatpush.msrb.mxu1 %v1797_v52  ;;  %2055 = vmatpush.msrb.mxu0 %v1783_v5  ;;  %v2705_v52 = vunpack.c.h.bf16 %v2934_v4  ;;  %v2797_v5 = vunpack.c.h.bf16 %v2957_v58 }
0x1e49   :  { %1996 = vmatpush.msrb.mxu3 %v1772_v15  ;;  %2036 = vmatpush.msra.mxu2 %v1774_v18  ;;  %v2700_v15 = vunpack.c.l.bf16 %v2933_v54  ;;  %v2764_v18 = vunpack.c.l.bf16 %v2949_v56  ;;  %v2873_v54 = vunpack.c.h.bf16 %v2976_v8  ;;  %v2975_v56 = vld [vmem:[%s4215_s10 + $0x170] sm:$0xff]  }
0x1e4a   :  { %2014 = vmatpush.msrb.mxu1 %v1789_v55  ;;  %2056 = vmatpush.msrb.mxu0 %v1775_v19  ;;  %v2704_v55 = vunpack.c.l.bf16 %v2934_v4  ;;  %v2796_v19 = vunpack.c.l.bf16 %v2957_v58  ;;  %v2953_v4 = vld [vmem:[%s4215_s10 + $0xc0] sm:$0xff]  }
0x1e4b   :  { %1997 = vmatpush.msrb.mxu3 %v1764_v11  ;;  %2037 = vmatpush.msra.mxu2 %v1766_v20  ;;  %v2939_v20 = vld [vmem:[%s4215_s10 + $0x50] sm:$0xff]   ;;  %v2780_v58 = vunpack.c.l.bf16 %v2953_v4 }
0x1e4c   :  { %2015 = vmatpush.msrb.mxu1 %v1781_v63  ;;  %2057 = vmatpush.msrb.mxu0 %v1767_v21  ;;  %v2940_v63 = vld [vmem:[%s4215_s10 + $0x58] sm:$0xff]   ;;  %v2724_v33 = vunpack.c.l.bf16 %v2939_v20 }
0x1e4d   :  { %v2729_v11 = vunpack.c.h.bf16 %v2940_v63  ;;  %v2728_v24 = vunpack.c.l.bf16 %v2940_v63  ;;  %v2967_v63 = vld [vmem:[%s4215_s10 + $0x130] sm:$0xff]  }
0x1e4e   :  { %2016 = vmatpush.msrb.mxu1 %v1773_v16  ;;  %v2948_v16 = vld [vmem:[%s4215_s10 + $0x98] sm:$0xff]  }
0x1e4f   :  { %v2761_v21 = vunpack.c.h.bf16 %v2948_v16  ;;  %v2760_v27 = vunpack.c.l.bf16 %v2948_v16  ;;  %v2974_v16 = vld [vmem:[%s4215_s10 + $0x168] sm:$0xff]  }
0x1e50   :  { %2017 = vmatpush.msrb.mxu1 %v1765_v10  ;;  %v2697_v10 = vunpack.c.h.bf16 %v2932_v7 }
0x1e8d   :  { %v1695_v22 = vpop.permute.xlu2 %1694 }
0x1e8e   :  { %v1708_v9 = vsel %vm1414_vm8, %v3832_v36, %v1695_v22  ;;  %v2793_v22 = vunpack.c.h.bf16 %v2956_v17 }
0x1e95   :  { %v1706_v6 = vpop.permute.xlu2 %1705 }
0x1ea5   :  { %v1698_v25 = vpop.permute.xlu0 %1697 }
0x1ea6   :  { %v1709_v28 = vsel %vm1423_vm7, %v1708_v9, %v1698_v25  ;;  %v1702_v29 = vpop.permute.xlu1 %1701  ;;  %v2696_v9 = vunpack.c.l.bf16 %v2932_v7  ;;  %v2947_v25 = vld [vmem:[%s4215_s10 + $0x90] sm:$0xff]  }
0x1ea7   :  { %v1710_v30 = vsel %vm1432_vm13, %v1709_v28, %v1702_v29  ;;  %v2792_v28 = vunpack.c.l.bf16 %v2956_v17  ;;  %v2725_v29 = vunpack.c.h.bf16 %v2939_v20  ;;  %v2983_v7 = vld [vmem:[%s4215_s10 + $0x1b0] sm:$0xff]   ;;  %v2966_v20 = vld [vmem:[%s4215_s10 + $0x128] sm:$0xff]  }
0x1ea8   :  { %v1711_v36 = vsel %vm1441_vm6, %v1710_v30, %v1706_v6  ;;  %v2693_v6 = vunpack.c.h.bf16 %v2931_v23  ;;  %v2938_v30 = vld [vmem:[%s4215_s10 + $0x48] sm:$0xff]  }
0x1ea9   :  { %2663 = vmatmul.msk.f32.vlgmr.msra.gmra.mxu3 %vm1874_vm0, %v1711_v36  ;;  %2665 = vmatmul.msk.f32.vlgmr.msra.gmra.mxu1 %vm1874_vm0, %v1711_v36  ;;  %v2721_v61 = vunpack.c.h.bf16 %v2938_v30 }
0x1eaa   :  { %2667 = vmatmul.msk.f32.vlgmr.msrb.gmra.mxu2 %vm1874_vm0, %v1711_v36  ;;  %2669 = vmatmul.msk.f32.vlgmr.msra.gmra.mxu0 %vm1874_vm0, %v1711_v36 }
0x1eab   :  { %2348 = vmatpush.msra.mxu1 %v2745_v31  ;;  %2328 = vmatpush.msra.mxu3 %v2713_v32  ;;  %v2757_v31 = vunpack.c.h.bf16 %v2947_v25  ;;  %v2789_v32 = vunpack.c.h.bf16 %v2955_v26 }
0x1eac   :  { %2368 = vmatpush.msrb.mxu2 %v2777_v35  ;;  %2388 = vmatpush.msra.mxu0 %v2809_v37  ;;  %v2692_v35 = vunpack.c.l.bf16 %v2931_v23  ;;  %v2946_v37 = vld [vmem:[%s4215_s10 + $0x88] sm:$0xff]  }
0x1ead   :  { %2349 = vmatpush.msra.mxu1 %v2744_v40  ;;  %2329 = vmatpush.msra.mxu3 %v2712_v41  ;;  %v2756_v40 = vunpack.c.l.bf16 %v2947_v25  ;;  %v2788_v41 = vunpack.c.l.bf16 %v2955_v26  ;;  %v2982_v23 = vld [vmem:[%s4215_s10 + $0x1a8] sm:$0xff]   ;;  %v2973_v25 = vld [vmem:[%s4215_s10 + $0x160] sm:$0xff]  }
0x1eae   :  { %2369 = vmatpush.msrb.mxu2 %v2776_v43  ;;  %2389 = vmatpush.msra.mxu0 %v2808_v44  ;;  %v2937_v43 = vld [vmem:[%s4215_s10 + $0x40] sm:$0xff]   ;;  %v2753_v44 = vunpack.c.h.bf16 %v2946_v37 }
0x1eaf   :  { %2350 = vmatpush.msra.mxu1 %v2741_v45  ;;  %2330 = vmatpush.msra.mxu3 %v2709_v2  ;;  %v2785_v45 = vunpack.c.h.bf16 %v2954_v39  ;;  %v2683_v2 = vld [vmem:[%s4215_s10] sm:$0xff]   ;;  %v2717_v46 = vunpack.c.h.bf16 %v2937_v43  ;;  %v2716_v38 = vunpack.c.l.bf16 %v2937_v43 }
0x1eb0   :  { %2370 = vmatpush.msrb.mxu2 %v2773_v60  ;;  %2390 = vmatpush.msra.mxu0 %v2805_v3  ;;  %v2720_v60 = vunpack.c.l.bf16 %v2938_v30 }
0x1eb1   :  { %2671 = vmatmul.msk.f32.vlgmr.msrb.gmra.mxu3 %vm1874_vm0, %v1711_v36  ;;  %2673 = vmatmul.msk.f32.vlgmr.msrb.gmra.mxu1 %vm1874_vm0, %v1711_v36 }
0x1eb2   :  { %2675 = vmatmul.msk.f32.vlgmr.msra.gmra.mxu2 %vm1874_vm0, %v1711_v36  ;;  %2677 = vmatmul.msk.f32.vlgmr.msrb.gmra.mxu0 %vm1874_vm0, %v1711_v36  ;;  %v2930_v36 = vld [vmem:[%s4215_s10 + $0x8] sm:$0xff]  }
0x1eb3   :  { %2351 = vmatpush.msra.mxu1 %v2740_v48  ;;  %2331 = vmatpush.msra.mxu3 %v2708_v12  ;;  %v2689_v42 = vunpack.c.h.bf16 %v2930_v36  ;;  %v2688_v3 = vunpack.c.l.bf16 %v2930_v36  ;;  %v2752_v48 = vunpack.c.l.bf16 %v2946_v37  ;;  %v2784_v12 = vunpack.c.l.bf16 %v2954_v39 }
0x1eb4   :  { %2371 = vmatpush.msrb.mxu2 %v2772_v49  ;;  %2391 = vmatpush.msra.mxu0 %v2804_v50  ;;  %v2685_v49 = vunpack.c.h.bf16 %v2683_v2  ;;  %v2749_v50 = vunpack.c.h.bf16 %v2945_v47  ;;  %v2896_v36 = vunpack.c.l.bf16 %v2982_v23  ;;  %v2860_v37 = vunpack.c.l.bf16 %v2973_v25 }
0x1eb5   :  { %2352 = vmatpush.msra.mxu1 %v2737_v51  ;;  %2332 = vmatpush.msra.mxu3 %v2705_v52  ;;  %v2781_v51 = vunpack.c.h.bf16 %v2953_v4  ;;  %v2968_v52 = vld [vmem:[%s4215_s10 + $0x138] sm:$0xff]  }
0x1eb6   :  { %2372 = vmatpush.msrb.mxu2 %v2769_v34  ;;  %2392 = vmatpush.msra.mxu0 %v2801_v53  ;;  %v2684_v34 = vunpack.c.l.bf16 %v2683_v2  ;;  %v2984_v53 = vld [vmem:[%s4215_s10 + $0x1b8] sm:$0xff]   ;;  %v2987_v2 = vld [vmem:[%s4215_s10 + $0x1d0] sm:$0xff]  }
0x1eb7   :  { %2353 = vmatpush.msra.mxu1 %v2736_v14  ;;  %2333 = vmatpush.msra.mxu3 %v2704_v55  ;;  %v2748_v14 = vunpack.c.l.bf16 %v2945_v47  ;;  %v2194_v55 = vld [vmem:[%s4215_s10 + $0x1f0] sm:$0xf]  ;;  %v2917_v4 = vunpack.c.h.bf16 %v2987_v2 }
0x1eb8   :  { %2373 = vmatpush.msrb.mxu2 %v2768_v59  ;;  %2393 = vmatpush.msra.mxu0 %v2800_v62  ;;  %v2841_v59 = vunpack.c.h.bf16 %v2968_v52  ;;  %v2872_v62 = vunpack.c.l.bf16 %v2976_v8 }
0x1eb9   :  { %2354 = vmatpush.msra.mxu1 %v2733_v1  ;;  %2334 = vmatpush.msra.mxu3 %v2701_v57  ;;  %v2905_v1 = vunpack.c.h.bf16 %v2984_v53  ;;  %v2990_v57 = vld [vmem:[%s4215_s10 + $0x1e8] sm:$0xff]  }
0x1eba   :  { %2374 = vmatpush.msrb.mxu2 %v2765_v0  ;;  %2394 = vmatpush.msra.mxu0 %v2797_v5  ;;  %v2319_v0 = vunpack.c.l.bf16 %v2194_v55  ;;  %v2840_v5 = vunpack.c.l.bf16 %v2968_v52  ;;  %v2929_v17 = vunpack.c.h.bf16 %v2990_v57  ;;  %v2986_v52 = vld [vmem:[%s4215_s10 + $0x1c8] sm:$0xff]   ;;  %v2979_v55 = vld [vmem:[%s4215_s10 + $0x190] sm:$0xff]  }
0x1ebb   :  { %2355 = vmatpush.msra.mxu1 %v2732_v13  ;;  %2335 = vmatpush.msra.mxu3 %v2700_v15  ;;  %v2869_v13 = vunpack.c.h.bf16 %v2975_v56  ;;  %v2904_v15 = vunpack.c.l.bf16 %v2984_v53 }
0x1ebc   :  { %2375 = vmatpush.msrb.mxu2 %v2764_v18  ;;  %2395 = vmatpush.msra.mxu0 %v2796_v19  ;;  %v2837_v18 = vunpack.c.h.bf16 %v2967_v63  ;;  %v2868_v19 = vunpack.c.l.bf16 %v2975_v56 }
0x1ebd   :  { %2356 = vmatpush.msra.mxu1 %v2729_v11  ;;  %2336 = vmatpush.msra.mxu3 %v2697_v10  ;;  %v2901_v11 = vunpack.c.h.bf16 %v2983_v7  ;;  %v2989_v10 = vld [vmem:[%s4215_s10 + $0x1e0] sm:$0xff]  }
0x1ebe   :  { %2376 = vmatpush.msrb.mxu2 %v2761_v21  ;;  %2396 = vmatpush.msra.mxu0 %v2793_v22  ;;  %v2928_v21 = vunpack.c.l.bf16 %v2990_v57  ;;  %v2836_v22 = vunpack.c.l.bf16 %v2967_v63  ;;  %v2925_v26 = vunpack.c.h.bf16 %v2989_v10  ;;  %v2924_v30 = vunpack.c.l.bf16 %v2989_v10  ;;  %v2985_v57 = vld [vmem:[%s4215_s10 + $0x1c0] sm:$0xff]  }
0x1ebf   :  { %2357 = vmatpush.msra.mxu1 %v2728_v24  ;;  %2337 = vmatpush.msra.mxu3 %v2696_v9  ;;  %v2865_v24 = vunpack.c.h.bf16 %v2974_v16  ;;  %v2900_v9 = vunpack.c.l.bf16 %v2983_v7  ;;  %v2909_v7 = vunpack.c.h.bf16 %v2985_v57 }
0x1ec0   :  { %2377 = vmatpush.msrb.mxu2 %v2760_v27  ;;  %2397 = vmatpush.msra.mxu0 %v2792_v28  ;;  %v2833_v27 = vunpack.c.h.bf16 %v2966_v20  ;;  %v2864_v28 = vunpack.c.l.bf16 %v2974_v16 }
0x1ec1   :  { %2358 = vmatpush.msra.mxu1 %v2725_v29  ;;  %2338 = vmatpush.msra.mxu3 %v2693_v6  ;;  %v2897_v29 = vunpack.c.h.bf16 %v2982_v23  ;;  %v2988_v6 = vld [vmem:[%s4215_s10 + $0x1d8] sm:$0xff]  }
0x1ec2   :  { %2378 = vmatpush.msrb.mxu2 %v2757_v31  ;;  %2398 = vmatpush.msra.mxu0 %v2789_v32  ;;  %v2832_v31 = vunpack.c.l.bf16 %v2966_v20  ;;  %v2861_v32 = vunpack.c.h.bf16 %v2973_v25  ;;  %v2961_v20 = vld [vmem:[%s4215_s10 + $0x100] sm:$0xff]  }
0x1ec3   :  { %2359 = vmatpush.msra.mxu1 %v2724_v33  ;;  %2339 = vmatpush.msra.mxu3 %v2692_v35  ;;  %v2972_v33 = vld [vmem:[%s4215_s10 + $0x158] sm:$0xff]   ;;  %v2921_v35 = vunpack.c.h.bf16 %v2988_v6  ;;  %v1856_v25 = vld [vmem:[%s4214_s9] sm:$0xff] }
0x1ec4   :  { %2379 = vmatpush.msrb.mxu2 %v2756_v40  ;;  %2399 = vmatpush.msra.mxu0 %v2788_v41  ;;  %v2857_v39 = vunpack.c.h.bf16 %v2972_v33  ;;  %v2965_v40 = vld [vmem:[%s4215_s10 + $0x120] sm:$0xff]  }
0x1ec5   :  { %2360 = vmatpush.msra.mxu1 %v2721_v61  ;;  %2340 = vmatpush.msra.mxu3 %v2689_v42  ;;  %v2981_v41 = vld [vmem:[%s4215_s10 + $0x1a0] sm:$0xff]   ;;  %v2829_v61 = vunpack.c.h.bf16 %v2965_v40  ;;  %v2856_v42 = vunpack.c.l.bf16 %v2972_v33  ;;  %v1860_v33 = vperm.slane %v1856_v25, 2 }
0x1ec6   :  { %2380 = vmatpush.msrb.mxu2 %v2753_v44  ;;  %2400 = vmatpush.msra.mxu0 %v2785_v45  ;;  %v2893_v43 = vunpack.c.h.bf16 %v2981_v41  ;;  %v2920_v44 = vunpack.c.l.bf16 %v2988_v6  ;;  %v2971_v45 = vld [vmem:[%s4215_s10 + $0x150] sm:$0xff]   ;;  %v2892_v47 = vunpack.c.l.bf16 %v2981_v41 }
0x1ec7   :  { %2361 = vmatpush.msra.mxu1 %v2720_v60  ;;  %2341 = vmatpush.msra.mxu3 %v2688_v3  ;;  %v2828_v60 = vunpack.c.l.bf16 %v2965_v40  ;;  %v2853_v3 = vunpack.c.h.bf16 %v2971_v45  ;;  %v2852_v8 = vunpack.c.l.bf16 %v2971_v45 }
0x1ec8   :  { %2381 = vmatpush.msrb.mxu2 %v2752_v48  ;;  %2401 = vmatpush.msra.mxu0 %v2784_v12  ;;  %v2964_v48 = vld [vmem:[%s4215_s10 + $0x118] sm:$0xff]  }
0x1ec9   :  { %2362 = vmatpush.msra.mxu1 %v2717_v46  ;;  %2342 = vmatpush.msra.mxu3 %v2685_v49  ;;  %v2980_v12 = vld [vmem:[%s4215_s10 + $0x198] sm:$0xff]   ;;  %v2825_v46 = vunpack.c.h.bf16 %v2964_v48 }
0x1eca   :  { %2382 = vmatpush.msrb.mxu2 %v2749_v50  ;;  %2402 = vmatpush.msra.mxu0 %v2781_v51  ;;  %v2889_v49 = vunpack.c.h.bf16 %v2980_v12  ;;  %v2916_v50 = vunpack.c.l.bf16 %v2987_v2  ;;  %v2970_v51 = vld [vmem:[%s4215_s10 + $0x148] sm:$0xff]   ;;  %v2888_v53 = vunpack.c.l.bf16 %v2980_v12 }
0x1ecb   :  { %2363 = vmatpush.msra.mxu1 %v2716_v38  ;;  %2343 = vmatpush.msra.mxu3 %v2684_v34  ;;  %v2824_v38 = vunpack.c.l.bf16 %v2964_v48  ;;  %v2849_v34 = vunpack.c.h.bf16 %v2970_v51  ;;  %v1864_v48 = vperm.slane %v1856_v25, 6 }
0x1ecc   :  { %2383 = vmatpush.msrb.mxu2 %v2748_v14  ;;  %2403 = vmatpush.msra.mxu0 %v2780_v58  ;;  %v2963_v14 = vld [vmem:[%s4215_s10 + $0x110] sm:$0xff]   ;;  %v2848_v58 = vunpack.c.l.bf16 %v2970_v51 }
0x1ecd   :  { %2428 = vmatpush.msrb.mxu1 %v2873_v54  ;;  %2408 = vmatpush.msrb.mxu3 %v2841_v59  ;;  %v2913_v54 = vunpack.c.h.bf16 %v2986_v52  ;;  %v2821_v56 = vunpack.c.h.bf16 %v2963_v14  ;;  %v2885_v59 = vunpack.c.h.bf16 %v2979_v55  ;;  %v2820_v63 = vunpack.c.l.bf16 %v2963_v14  ;;  %v2496_v14 = vld [vmem:[%s4217_s12 + $0x38] sm:$0xff] }
0x1ece   :  { %2448 = vmatpush.msra.mxu2 %v2905_v1  ;;  %2471 = vmatpush.msrb.mxu0 %v2319_v0  ;;  %v2969_v1 = vld [vmem:[%s4215_s10 + $0x140] sm:$0xff]  }
0x1ecf   :  { %2429 = vmatpush.msrb.mxu1 %v2872_v62  ;;  %2409 = vmatpush.msrb.mxu3 %v2840_v5  ;;  %v2912_v62 = vunpack.c.l.bf16 %v2986_v52  ;;  %v2845_v0 = vunpack.c.h.bf16 %v2969_v1  ;;  %v2884_v5 = vunpack.c.l.bf16 %v2979_v55  ;;  %v2501_v52 = vld [vmem:[%s4217_s12 + $0x60] sm:$0xf]  ;;  %v2495_v55 = vld [vmem:[%s4217_s12 + $0x30] sm:$0xff] }
0x1ed0   :  { %2449 = vmatpush.msra.mxu2 %v2904_v15  ;;  %2472 = vmatpush.msrb.mxu0 %v2929_v17  ;;  %v2978_v15 = vld [vmem:[%s4215_s10 + $0x188] sm:$0xff]   ;;  %v2844_v17 = vunpack.c.l.bf16 %v2969_v1 }
0x1ed1   :  { %2430 = vmatpush.msrb.mxu1 %v2869_v13  ;;  %2410 = vmatpush.msrb.mxu3 %v2837_v18  ;;  %v2962_v13 = vld [vmem:[%s4215_s10 + $0x108] sm:$0xff]   ;;  %v2881_v18 = vunpack.c.h.bf16 %v2978_v15  ;;  %v2880_v10 = vunpack.c.l.bf16 %v2978_v15 }
0x1ed2   :  { %2450 = vmatpush.msra.mxu2 %v2901_v11  ;;  %2473 = vmatpush.msrb.mxu0 %v2928_v21  ;;  %v2817_v16 = vunpack.c.h.bf16 %v2962_v13  ;;  %v2816_v11 = vunpack.c.l.bf16 %v2962_v13  ;;  %v2977_v21 = vld [vmem:[%s4215_s10 + $0x180] sm:$0xff]   ;;  %v2490_v1 = vld [vmem:[%s4217_s12 + $0x8] sm:$0xff] }
0x1ed3   :  { %2431 = vmatpush.msrb.mxu1 %v2868_v19  ;;  %2411 = vmatpush.msrb.mxu3 %v2836_v22  ;;  %v2908_v19 = vunpack.c.l.bf16 %v2985_v57  ;;  %v2813_v22 = vunpack.c.h.bf16 %v2961_v20  ;;  %v2877_v23 = vunpack.c.h.bf16 %v2977_v21  ;;  %v2489_v57 = vld [vmem:[%s4217_s12] sm:$0xff] }
0x1ed4   :  { %2451 = vmatpush.msra.mxu2 %v2900_v9  ;;  %2474 = vmatpush.msrb.mxu0 %v2925_v26  ;;  %v2876_v9 = vunpack.c.l.bf16 %v2977_v21  ;;  %v1859_v26 = vperm.slane %v1856_v25, 1 }
0x1ed5   :  { %2432 = vmatpush.msrb.mxu1 %v2865_v24  ;;  %2412 = vmatpush.msrb.mxu3 %v2833_v27  ;;  %v2812_v24 = vunpack.c.l.bf16 %v2961_v20  ;;  %v1861_v27 = vperm.slane %v1856_v25, 3 }
0x1ed6   :  { %2452 = vmatpush.msra.mxu2 %v2897_v29  ;;  %2475 = vmatpush.msrb.mxu0 %v2924_v30 }
0x1ed7   :  { %2433 = vmatpush.msrb.mxu1 %v2864_v28  ;;  %2413 = vmatpush.msrb.mxu3 %v2832_v31 }
0x1ed8   :  { %2453 = vmatpush.msra.mxu2 %v2896_v36  ;;  %2476 = vmatpush.msrb.mxu0 %v2921_v35  ;;  %v1863_v35 = vperm.slane %v1856_v25, 5 }
0x1ed9   :  { %2434 = vmatpush.msrb.mxu1 %v2861_v32  ;;  %2414 = vmatpush.msrb.mxu3 %v2829_v61  ;;  %v1858_v32 = vperm.slane %v1856_v25, 0 }
0x1eda   :  { %2454 = vmatpush.msra.mxu2 %v2893_v43  ;;  %2477 = vmatpush.msrb.mxu0 %v2920_v44 }
0x1edb   :  { %2435 = vmatpush.msrb.mxu1 %v2860_v37  ;;  %2415 = vmatpush.msrb.mxu3 %v2828_v60 }
0x1edc   :  { %2455 = vmatpush.msra.mxu2 %v2892_v47  ;;  %2478 = vmatpush.msrb.mxu0 %v2917_v4  ;;  %v1862_v47 = vperm.slane %v1856_v25, 4 }
0x1edd   :  { %2436 = vmatpush.msrb.mxu1 %v2857_v39  ;;  %2416 = vmatpush.msrb.mxu3 %v2825_v46  ;;  %v1865_v39 = vperm.slane %v1856_v25, 7  ;;  %v3011_v25 = vld [vmem:[#allocation3] ss:$0 sm:$0xff] }
0x1ede   :  { %2456 = vmatpush.msra.mxu2 %v2889_v49  ;;  %2479 = vmatpush.msrb.mxu0 %v2916_v50 }
0x1edf   :  { %2437 = vmatpush.msrb.mxu1 %v2856_v42  ;;  %2417 = vmatpush.msrb.mxu3 %v2824_v38  ;;  %v2500_v38 = vld [vmem:[%s4217_s12 + $0x58] sm:$0xff] }
0x1ee0   :  { %2457 = vmatpush.msra.mxu2 %v2888_v53  ;;  %2480 = vmatpush.msrb.mxu0 %v2913_v54  ;;  %v2498_v53 = vld [vmem:[%s4217_s12 + $0x48] sm:$0xff]  ;;  %v2497_v54 = vld [vmem:[%s4217_s12 + $0x40] sm:$0xff] }
0x1ee1   :  { %2438 = vmatpush.msrb.mxu1 %v2853_v3  ;;  %2418 = vmatpush.msrb.mxu3 %v2821_v56  ;;  %v2494_v56 = vld [vmem:[%s4217_s12 + $0x28] sm:$0xff] }
0x1ee2   :  { %2458 = vmatpush.msra.mxu2 %v2885_v59  ;;  %2481 = vmatpush.msrb.mxu0 %v2912_v62  ;;  %v2492_v59 = vld [vmem:[%s4217_s12 + $0x18] sm:$0xff]  ;;  %v2491_v62 = vld [vmem:[%s4217_s12 + $0x10] sm:$0xff] }
0x1ee3   :  { %2439 = vmatpush.msrb.mxu1 %v2852_v8  ;;  %2419 = vmatpush.msrb.mxu3 %v2820_v63  ;;  %v3010_v63 = vld [vmem:[%s4216_s11] ss:$0 sm:$0xff] }
0x1ee4   :  { %2459 = vmatpush.msra.mxu2 %v2884_v5  ;;  %2482 = vmatpush.msrb.mxu0 %v2909_v7 }
0x1ee5   :  { %2440 = vmatpush.msrb.mxu1 %v2849_v34  ;;  %2420 = vmatpush.msrb.mxu3 %v2817_v16  ;;  %v2499_v34 = vld [vmem:[%s4217_s12 + $0x50] sm:$0xff] }
0x1ee6   :  { %2460 = vmatpush.msra.mxu2 %v2881_v18  ;;  %2483 = vmatpush.msrb.mxu0 %v2908_v19 }
0x1ee7   :  { %2441 = vmatpush.msrb.mxu1 %v2848_v58  ;;  %2421 = vmatpush.msrb.mxu3 %v2816_v11  ;;  %v2493_v58 = vld [vmem:[%s4217_s12 + $0x20] sm:$0xff] }
0x1ee8   :  { %2461 = vmatpush.msra.mxu2 %v2880_v10 }
0x1ee9   :  { %2442 = vmatpush.msrb.mxu1 %v2845_v0  ;;  %2422 = vmatpush.msrb.mxu3 %v2813_v22 }
0x1eea   :  { %2462 = vmatpush.msra.mxu2 %v2877_v23 }
0x1eeb   :  { %2443 = vmatpush.msrb.mxu1 %v2844_v17  ;;  %2423 = vmatpush.msrb.mxu3 %v2812_v24 }
0x1eec   :  { %2463 = vmatpush.msra.mxu2 %v2876_v9 }
0x1f26   :  { %v1939_v28 = vpop.f32.mrf.mxu1 }
0x1f27   :  { %v1940_v29 = vadd.f32 %v1939_v28, %v1859_v26  ;;  %v1979_v6 = vpop.f32.mrf.mxu0 }
0x1f28   :  { %v1980_v30 = vadd.f32 %v1979_v6, %v1861_v27 }
0x1f29   :  { %v2063_v31 = vmax.f32 %v1940_v29, 0.0 }
0x1f2a   :  { %v2065_v36 = vmax.f32 %v1980_v30, 0.0 }
0x1f2b   :  { %2364 = vmatmul.f32.vlgmr.msra.gmra.mxu1 %v2063_v31 }
0x1f2c   :  { %2404 = vmatmul.f32.vlgmr.msra.gmra.mxu0 %v2065_v36  ;;  %v1919_v37 = vpop.f32.mrf.mxu3 }
0x1f2d   :  { %v1920_v40 = vadd.f32 %v1919_v37, %v1858_v32  ;;  %v1959_v41 = vpop.f32.mrf.mxu2 }
0x1f2e   :  { %v1960_v61 = vadd.f32 %v1959_v41, %v1860_v33  ;;  %v2019_v42 = vpop.f32.mrf.mxu1 }
0x1f2f   :  { %v2062_v43 = vmax.f32 %v1920_v40, 0.0  ;;  %v2020_v44 = vadd.f32 %v2019_v42, %v1863_v35  ;;  %v2059_v45 = vpop.f32.mrf.mxu0 }
0x1f30   :  { %v2064_v2 = vmax.f32 %v1960_v61, 0.0  ;;  %v2060_v60 = vadd.f32 %v2059_v45, %v1865_v39 }
0x1f31   :  { %v2067_v3 = vmax.f32 %v2020_v44, 0.0  ;;  %2344 = vmatmul.f32.vlgmr.msra.gmra.mxu3 %v2062_v43 }
0x1f32   :  { %v2069_v4 = vmax.f32 %v2060_v60, 0.0  ;;  %2384 = vmatmul.f32.vlgmr.msrb.gmra.mxu2 %v2064_v2  ;;  %2679 = vmatpush.msk.msra.mxu3 %vm1174_vm3, %v2501_v52  ;;  %vm2506_vm3 = vcmask 818176  }
0x1f33   :  { %2444 = vmatmul.f32.vlgmr.msrb.gmra.mxu1 %v2067_v3 }
0x1f34   :  { %2678 = vmatmul.msk.f32.vlgmr.msrb.gmra.mxu0 %vm2324_vm4, %v2069_v4  ;;  %v1999_v12 = vpop.f32.mrf.mxu3  ;;  %2517 = vmatpush.msra.mxu3 %v2500_v38 }
0x1f35   :  { %v2000_v46 = vadd.f32 %v1999_v12, %v1862_v47  ;;  %v2039_v8 = vpop.f32.mrf.mxu2 }
0x1f36   :  { %v2040_v49 = vadd.f32 %v2039_v8, %v1864_v48  ;;  %2518 = vmatpush.msra.mxu3 %v2499_v34 }
0x1f37   :  { %v2066_v50 = vmax.f32 %v2000_v46, 0.0 }
0x1f38   :  { %v2068_v51 = vmax.f32 %v2040_v49, 0.0  ;;  %2519 = vmatpush.msra.mxu3 %v2498_v53 }
0x1f39   :  { %2424 = vmatmul.f32.vlgmr.msrb.gmra.mxu3 %v2066_v50 }
0x1f3a   :  { %2464 = vmatmul.f32.vlgmr.msra.gmra.mxu2 %v2068_v51  ;;  %2520 = vmatpush.msra.mxu3 %v2497_v54 }
0x1f3c   :  { %2521 = vmatpush.msra.mxu3 %v2496_v14 }
0x1f3e   :  { %2522 = vmatpush.msra.mxu3 %v2495_v55 }
0x1f40   :  { %2523 = vmatpush.msra.mxu3 %v2494_v56 }
0x1f42   :  { %2524 = vmatpush.msra.mxu3 %v2493_v58 }
0x1f44   :  { %2525 = vmatpush.msra.mxu3 %v2492_v59 }
0x1f46   :  { %2526 = vmatpush.msra.mxu3 %v2491_v62 }
0x1f48   :  { %2527 = vmatpush.msra.mxu3 %v2490_v1 }
0x1f4a   :  { %2528 = vmatpush.msra.mxu3 %v2489_v57 }
0x1fa8   :  { %v2365_v0 = vpop.f32.mrf.mxu1 }
0x1fa9   :  { %v2405_v16 = vpop.f32.mrf.mxu0 }
0x1fb0   :  { %v2445_v10 = vpop.f32.mrf.mxu1 }
0x1fb1   :  { %v2485_v23 = vpop.f32.mrf.mxu0 }
0x1fb4   :  { %v2345_v5 = vpop.f32.mrf.mxu3 }
0x1fb5   :  { %v2346_v7 = vadd.f32 %v3010_v63, %v2345_v5  ;;  %v2385_v13 = vpop.f32.mrf.mxu2 }
0x1fb7   :  { %v2366_v15 = vadd.f32 %v2365_v0, %v2346_v7 }
0x1fb9   :  { %v2386_v17 = vadd.f32 %v2385_v13, %v2366_v15 }
0x1fbb   :  { %v2406_v18 = vadd.f32 %v2405_v16, %v2386_v17 }
0x1fbc   :  { %v2425_v19 = vpop.f32.mrf.mxu3 }
0x1fbd   :  { %v2426_v11 = vadd.f32 %v2425_v19, %v2406_v18  ;;  %v2465_v21 = vpop.f32.mrf.mxu2 }
0x1fbf   :  { %v2446_v20 = vadd.f32 %v2445_v10, %v2426_v11 }
0x1fc1   :  { %v2466_v22 = vadd.f32 %v2465_v21, %v2446_v20 }
0x1fc3   :  { %v2486_v24 = vadd.f32 %v2485_v23, %v2466_v22 }
0x1fc5   :  { %v2488_v9 = vmax.f32 %v2486_v24, 0.0 }
0x1fc7   :  { %2680 = vmatmul.msk.f32.vlgmr.msra.gmra.mxu3 %vm2506_vm3, %v2488_v9 }
0x204a   :  { %v2530_v26 = vpop.f32.mrf.mxu3 }
0x204b   :  { %v2531_v27 = vadd.f32 %v3011_v25, %v2530_v26 }
0x204d   :  { %v2681_v28 = vmul.f32 -1.442695, %v2531_v27 }
0x204f   :  { %3108 = vpow2.f32 %v2681_v28 }
0x2055   :  { %v3109_v29 = vpop.eup %3108 }
0x2056   :  { %v2536_v6 = vadd.f32 1.0, %v3109_v29 }
0x2058   :  { %3110 = vrcp.f32 %v2536_v6  ;;  %v2548_v36 = vand.u32 2147483648, %v2536_v6  ;;  %v2546_v35 = vand.u32 2147483647, %v2536_v6  ;;  %vm2542_vm8 = vweird.f32 %v2536_v6 }
0x205a   :  { %v2549_v39 = vor.u32 1.1754944e-38, %v2548_v36  ;;  %vm2547_vm7 = vcmp.eq.f32.partialorder %v2546_v35, 8.507059e+37 }
0x205e   :  { %v3111_v30 = vpop.eup %3110 }
0x205f   :  { %v2538_v31 = vmul.f32 %v3111_v30, %v2536_v6  ;;  %vm2543_vm5 = vweird.f32 %v3111_v30 }
0x2060   :  { %vm2544_vm9 = vmor %vm2542_vm8, %vm2543_vm5 }
0x2061   :  { %v2539_v32 = vsub.f32 1.0, %v2538_v31 }
0x2063   :  { %v2540_v33 = vmul.f32 %v3111_v30, %v2539_v32 }
0x2065   :  { %v2541_v37 = vadd.f32 %v3111_v30, %v2540_v33 }
0x2067   :  { %v2545_v40 = vsel %vm2544_vm9, %v3111_v30, %v2541_v37 }
0x2068   :  { %v2550_v41 = vsel %vm2547_vm7, %v2549_v39, %v2545_v40 }
0x2069   :  { %2553 = vst.msk [vmem:[%s4219_s14] sm:$0x3] %vm2552_vm10, %v2550_v41 }
0x206a   :  { %2558 = vsyncpa [#allocation5], 1 }

</bundles_post_ra>
